<compile_context>
chip_gen: v7x
topology: tpu7x:2x2x1
jax: 0.10.0
libtpu: 0.0.40
codegen_flags: <defaults>
</compile_context>

<pallas_src>
import functools

import numpy as np
import jax
import jax.numpy as jnp
from jax.experimental import pallas as pl
from jax.experimental.pallas import tpu as pltpu


_VMEM_LIMIT = 32 * 1024 * 1024     # safe on v5e/v6e (128 MiB) and v7x (64 MiB)
_SQRT1_2 = 0.7071067811865476


def _round_up(x, m):
    return ((x + m - 1) // m) * m


# ----------------------------------------------------------------------------
# In-kernel math helpers (only ops with guaranteed Mosaic lowering)
# ----------------------------------------------------------------------------
def _erf_poly(x):
    # Abramowitz & Stegun 7.1.26, max abs error ~1.5e-7 (f32-level exact).
    a1, a2, a3, a4, a5 = (0.254829592, -0.284496736, 1.421413741,
                          -1.453152027, 1.061405429)
    p = 0.3275911
    sgn = jnp.where(x >= 0.0, 1.0, -1.0)
    ax = jnp.abs(x)
    t = 1.0 / (1.0 + p * ax)
    poly = ((((a5 * t + a4) * t + a3) * t + a2) * t + a1) * t
    return sgn * (1.0 - poly * jnp.exp(-ax * ax))


def _gelu_exact(x):
    # nn.GELU() (erf form).
    # TODO(synk): exact lax.erf has no guaranteed Mosaic lowering; evaluated
    # with a 1.5e-7-accurate polynomial (f32-level exact) inside the kernel.
    return 0.5 * x * (1.0 + _erf_poly(x * _SQRT1_2))


def _softplus(x):
    return jnp.maximum(x, 0.0) + jnp.log(1.0 + jnp.exp(-jnp.abs(x)))


# ----------------------------------------------------------------------------
# Fused TimesBlock (both nets, all k periods, conv1+GELU+conv2, weighting,
# residual) as a single Pallas kernel.
# ----------------------------------------------------------------------------
def _timesblock_kernel(x_ref, a1_ref, b1_ref, a2_ref, b2_ref, pw_ref, o_ref, *, k):
    x = x_ref[...]                                   # (RB, LP)  f32
    acc = x                                          # residual
    for j in range(k):                               # static unroll over periods
        h = jnp.dot(x, a1_ref[0, j],
                    preferred_element_type=jnp.float32) + b1_ref[0]
        h = _gelu_exact(h)
        y = jnp.dot(h, a2_ref[0, j],
                    preferred_element_type=jnp.float32) + b2_ref[0]
        acc = acc + pw_ref[j] * y                    # per-row softmax weight
    o_ref[0] = acc


def fuse_inception(kernels):
    """mean_i Conv2d_{k_i,'same'}(x) == one 'same' conv whose kernel is the
    average of the branch kernels zero-padded (centered) to the max size."""
    kmax = max(w.shape[-1] for w, _ in kernels)
    cout, cin = kernels[0][0].shape[:2]
    acc_w = jnp.zeros((kmax, kmax, cin, cout), jnp.float32)
    acc_b = jnp.zeros((cout,), jnp.float32)
    for w, b in kernels:
        kk = w.shape[-1]
        off = (kmax - kk) // 2
        acc_w = acc_w.at[off:off + kk, off:off + kk].add(
            jnp.transpose(w, (2, 3, 1, 0)))          # (k,k,Cin,Cout)
        acc_b = acc_b + b
    n = float(len(kernels))
    return (acc_w / n).reshape(kmax * kmax, cin, cout), acc_b / n, kmax


def _tap_map(periods, T, kmax):
    """Static (numpy) map M[j, t_in, t_out] = tap index + 1 (0 = no link) for
    the period-j 2D 'same' conv on the (length//period, period) grid."""
    pad = kmax // 2
    lengths = [((T + p - 1) // p) * p for p in periods]
    Lmax = max(lengths)
    M = np.zeros((len(periods), Lmax, Lmax), np.int32)
    for j, p in enumerate(periods):
        length = lengths[j]
        for t_in in range(length):
            h_in, w_in = divmod(t_in, p)
            for t_out in range(length):
                h_o, w_o = divmod(t_out, p)
                dh = h_in - h_o + pad
                dw = w_in - w_o + pad
                if 0 <= dh < kmax and 0 <= dw < kmax:
                    M[j, t_in, t_out] = dh * kmax + dw + 1
    return M, Lmax


def _conv_operator(w_pair, M, Lmax, rows_p, cols_p):
    """Dense linear operator of the fused 'same' conv on the flat (t, c) layout.
    w_pair: (2, KK, Cin, Cout) fused kernels of both nets."""
    two, KK, ci, co = w_pair.shape
    ext = jnp.concatenate(
        [jnp.zeros((two, 1, ci, co), w_pair.dtype), w_pair], axis=1)
    A = ext[:, M]                                    # (2, k, Lmax, Lmax, ci, co)
    A = jnp.transpose(A, (0, 1, 2, 4, 3, 5))
    A = A.reshape(two, M.shape[0], Lmax * ci, Lmax * co)
    return jnp.pad(A, ((0, 0), (0, 0),
                       (0, rows_p - Lmax * ci), (0, cols_p - Lmax * co)))


def _bias_vec(b_pair, Lmax, cols_p):
    """(2, C) biases -> (2, 1, cols_p) flat per-position bias rows."""
    v = jnp.tile(b_pair, (1, Lmax))                  # value at t*C + c == b[c]
    v = jnp.pad(v, ((0, 0), (0, cols_p - v.shape[1])))
    return v[:, None, :]


def fused_timesblock(x, tb_s, tb_t, periods, pw):
    """Both TimesBlocks in one pallas_call; grid=(2 nets,) -> 'parallel'."""
    B, T, D = x.shape
    k = len(periods)

    w1_s, b1_s, kmax = fuse_inception(tb_s["inc1"])
    w2_s, b2_s, _ = fuse_inception(tb_s["inc2"])
    w1_t, b1_t, _ = fuse_inception(tb_t["inc1"])
    w2_t, b2_t, _ = fuse_inception(tb_t["inc2"])
    d_ff = w1_s.shape[-1]

    M, Lmax = _tap_map(periods, T, kmax)
    in_p = _round_up(Lmax * D, 128)                  # lane-dense flat widths
    ff_p = _round_up(Lmax * d_ff, 128)
    out_p = _round_up(Lmax * D, 128)

    A1 = _conv_operator(jnp.stack([w1_s, w1_t]), M, Lmax, in_p, ff_p)
    A2 = _conv_operator(jnp.stack([w2_s, w2_t]), M, Lmax, ff_p, out_p)
    b1v = _bias_vec(jnp.stack([b1_s, b1_t]), Lmax, ff_p)
    b2v = _bias_vec(jnp.stack([b2_s, b2_t]), Lmax, out_p)

    RB = _round_up(B, 8)
    xf = jnp.pad(x.reshape(B, T * D), ((0, RB - B), (0, in_p - T * D)))
    pwt = jnp.pad(pw.T, ((0, 0), (0, RB - B)))[:, :, None]     # (k, RB, 1)

    out = pl.pallas_call(
        functools.partial(_timesblock_kernel, k=k),
        out_shape=jax.ShapeDtypeStruct((2, RB, out_p), jnp.float32),
        grid_spec=pltpu.PrefetchScalarGridSpec(
            num_scalar_prefetch=0,
            grid=(2,),
            in_specs=[
                pl.BlockSpec((RB, in_p), lambda n: (0, 0)),
                pl.BlockSpec((1, k, in_p, ff_p), lambda n: (n, 0, 0, 0)),
                pl.BlockSpec((1, 1, ff_p), lambda n: (n, 0, 0)),
                pl.BlockSpec((1, k, ff_p, out_p), lambda n: (n, 0, 0, 0)),
                pl.BlockSpec((1, 1, out_p), lambda n: (n, 0, 0)),
                pl.BlockSpec((k, RB, 1), lambda n: (0, 0, 0)),
            ],
            out_specs=pl.BlockSpec((1, RB, out_p), lambda n: (n, 0, 0))),
        compiler_params=pltpu.CompilerParams(
            dimension_semantics=("parallel",),
            vmem_limit_bytes=_VMEM_LIMIT),
    )(xf, A1, b1v, A2, b2v, pwt)

    x_s = out[0, :B, :T * D].reshape(B, T, D)
    x_t = out[1, :B, :T * D].reshape(B, T, D)
    return x_s, x_t


# ----------------------------------------------------------------------------
# Batched linear:  y_g = x_g @ w_g + b_g  for G independent problems, one call.
# Optional epilogue: softplus applied to columns >= split (VarUnit var half).
# ----------------------------------------------------------------------------
def _blinear_kernel(x_ref, w_ref, b_ref, o_ref, *, split_softplus):
    y = jnp.dot(x_ref[0], w_ref[0], preferred_element_type=jnp.float32) + b_ref[0]
    if split_softplus is not None:
        col = jax.lax.broadcasted_iota(jnp.int32, y.shape, 1)
        y = jnp.where(col < split_softplus, y, _softplus(y))
    o_ref[0] = y


def batched_linear(xs, ws, bs, split_softplus=None):
    G, R, K = xs.shape
    N = ws.shape[-1]
    Rp = _round_up(R, 8)
    if Rp != R:
        xs = jnp.pad(xs, ((0, 0), (0, Rp - R), (0, 0)))
    bs = bs.reshape(G, 1, N)
    out = pl.pallas_call(
        functools.partial(_blinear_kernel, split_softplus=split_softplus),
        out_shape=jax.ShapeDtypeStruct((G, Rp, N), jnp.float32),
        grid_spec=pltpu.PrefetchScalarGridSpec(
            num_scalar_prefetch=0,
            grid=(G,),
            in_specs=[pl.BlockSpec((1, Rp, K), lambda g: (g, 0, 0)),
                      pl.BlockSpec((1, K, N), lambda g: (g, 0, 0)),
                      pl.BlockSpec((1, 1, N), lambda g: (g, 0, 0))],
            out_specs=pl.BlockSpec((1, Rp, N), lambda g: (g, 0, 0))),
        compiler_params=pltpu.CompilerParams(
            dimension_semantics=("parallel",),
            vmem_limit_bytes=_VMEM_LIMIT),
    )(xs, ws, bs)
    return out[:, :R, :] if Rp != R else out


# ----------------------------------------------------------------------------
# Batched two-layer critics: sigmoid(relu(x@w1+b1)@w2+b2), grid over critics.
# ----------------------------------------------------------------------------
def _critic_kernel(x_ref, w1_ref, b1_ref, w2_ref, b2_ref, o_ref):
    h = jnp.dot(x_ref[0], w1_ref[0], preferred_element_type=jnp.float32) + b1_ref[0]
    h = jnp.maximum(h, 0.0)
    o = jnp.sum(h * w2_ref[0], axis=-1, keepdims=True) + b2_ref[0]
    o_ref[0] = jax.nn.sigmoid(o)


def batched_critic(xs, w1s, b1s, w2s, b2s):
    G, R, C = xs.shape
    H = w1s.shape[-1]
    Rp = _round_up(R, 8)
    if Rp != R:
        xs = jnp.pad(xs, ((0, 0), (0, Rp - R), (0, 0)))
    out = pl.pallas_call(
        _critic_kernel,
        out_shape=jax.ShapeDtypeStruct((G, Rp, 1), jnp.float32),
        grid_spec=pltpu.PrefetchScalarGridSpec(
            num_scalar_prefetch=0,
            grid=(G,),
            in_specs=[pl.BlockSpec((1, Rp, C), lambda g: (g, 0, 0)),
                      pl.BlockSpec((1, C, H), lambda g: (g, 0, 0)),
                      pl.BlockSpec((1, 1, H), lambda g: (g, 0, 0)),
                      pl.BlockSpec((1, 1, H), lambda g: (g, 0, 0)),
                      pl.BlockSpec((1, 1, 1), lambda g: (g, 0, 0))],
            out_specs=pl.BlockSpec((1, Rp, 1), lambda g: (g, 0, 0))),
        compiler_params=pltpu.CompilerParams(
            dimension_semantics=("parallel",),
            vmem_limit_bytes=_VMEM_LIMIT),
    )(xs, w1s, b1s, w2s, b2s)
    return out[:, :R, :] if Rp != R else out


# ----------------------------------------------------------------------------
# TNet prediction head: t_pred_2(t_pred_1(z^T)^T) fused (no XLA transposes).
# ----------------------------------------------------------------------------
def _tpred_kernel(z_ref, w1t_ref, b1_ref, w2_ref, b2_ref, o_ref):
    h = jnp.dot(w1t_ref[...], z_ref[0],
                preferred_element_type=jnp.float32) + b1_ref[...]     # (P, Z)
    o = jnp.dot(h, w2_ref[...],
                preferred_element_type=jnp.float32) + b2_ref[...]     # (P, O)
    o_ref[0] = o


def tnet_pred(z, w1, b1, w2, b2):
    B, T, Z = z.shape
    P = w1.shape[-1]
    O = w2.shape[-1]
    return pl.pallas_call(
        _tpred_kernel,
        out_shape=jax.ShapeDtypeStruct((B, P, O), jnp.float32),
        grid_spec=pltpu.PrefetchScalarGridSpec(
            num_scalar_prefetch=0,
            grid=(B,),
            in_specs=[pl.BlockSpec((1, T, Z), lambda b: (b, 0, 0)),
                      pl.BlockSpec((P, T), lambda b: (0, 0)),
                      pl.BlockSpec((P, 1), lambda b: (0, 0)),
                      pl.BlockSpec((Z, O), lambda b: (0, 0)),
                      pl.BlockSpec((1, O), lambda b: (0, 0))],
            out_specs=pl.BlockSpec((1, P, O), lambda b: (b, 0, 0))),
        compiler_params=pltpu.CompilerParams(
            dimension_semantics=("parallel",),
            vmem_limit_bytes=_VMEM_LIMIT),
    )(z, w1.T, b1.reshape(P, 1), w2, b2.reshape(1, O))


# ----------------------------------------------------------------------------
# Plain-JAX glue (FFT / autocorrelation / similarity / KL)
# ----------------------------------------------------------------------------
_NEXT_FAST_LEN = {}


def next_fast_len(size):
    try:
        return _NEXT_FAST_LEN[size]
    except KeyError:
        pass
    assert isinstance(size, int) and size > 0
    next_size = size
    while True:
        remaining = next_size
        for n in (2, 3, 5):
            while remaining % n == 0:
                remaining //= n
        if remaining == 1:
            _NEXT_FAST_LEN[size] = next_size
            return next_size
        next_size += 1


# TODO(synk): rfft/irfft have no Pallas TPU equivalent; computed with jnp.fft.
def autocorrelation(x):
    N = x.shape[-1]
    M = next_fast_len(N)
    M2 = 2 * M
    centered = x - x.mean(axis=-1, keepdims=True)
    fv = jnp.fft.rfft(centered, n=M2, axis=-1)
    power = jnp.real(fv) ** 2 + jnp.imag(fv) ** 2
    ac = jnp.fft.irfft(power, n=M2, axis=-1)[..., :N]
    ac = ac / jnp.arange(N, 0, -1, dtype=x.dtype)
    ac = ac / ac[..., :1]
    return ac


def period_sim(x, y):
    T = x.shape[1]
    x = x.reshape(-1, T)
    y = y.reshape(-1, T)
    x_ac = autocorrelation(x)[:, 1:]
    y_ac = autocorrelation(y)[:, 1:]
    distance = ((x_ac - y_ac) ** 2).mean(axis=1).mean()
    return -distance


def trend_sim(x, y):
    T = x.shape[1]
    x = x.reshape(-1, T)
    y = y.reshape(-1, T)
    x_t = x[:, 1:] - x[:, :-1]
    y_t = y[:, 1:] - y[:, :-1]
    den = jnp.sqrt((x_t ** 2).sum(axis=1)) * jnp.sqrt((y_t ** 2).sum(axis=1))
    num = (x_t * y_t).sum(axis=1)
    return (num / den).mean()


def compute_KL(z, mean, var):
    log_p_z = jnp.mean(-0.5 * z ** 2, axis=1)
    log_q_z = jnp.mean(-0.5 * (jnp.log(var) + (z - mean) ** 2 / var ** 2), axis=1)
    return (-(log_p_z - log_q_z)).mean()


# ----------------------------------------------------------------------------
# Jitted forward core
# ----------------------------------------------------------------------------
@functools.partial(jax.jit, static_argnums=(3, 4, 5, 6, 7))
def _lastv2_core(params, x, key, periods, top_idx, seq_len, pred_len,
                 mean_inference):
    B, T, D = x.shape
    sp, tp, mp = params["snet"], params["tnet"], params["mubo"]
    Z = sp["var_unit"]["loc_w"].shape[1]
    keys = jax.random.split(key, 7)

    # --- shared FFT period weights (both TimesBlocks see the same input) ---
    amp = jnp.abs(jnp.fft.rfft(x, axis=1)).mean(-1)              # (B, F)
    pw = jax.nn.softmax(amp[:, jnp.asarray(top_idx)], axis=1)     # (B, k)

    # --- both TimesBlocks in one Pallas call ---
    x_his_s, x_his_t = fused_timesblock(
        x, sp["time_block"], tp["time_block"], periods, pw)

    # --- 4 VarUnit (loc|var) projections in one Pallas call.
    #     Order: snet(x_his_s), tnet(x_his_t), tnet(x)->"zs", snet(x)->"zt"
    #     (MuBO argument wiring of the reference). ---
    def vw(vu):
        return (jnp.concatenate([vu["loc_w"], vu["var_w"]], axis=1),
                jnp.concatenate([vu["loc_b"], vu["var_b"]], axis=0))

    ws_s, bs_s = vw(sp["var_unit"])
    ws_t, bs_t = vw(tp["var_unit"])
    xs_stack = jnp.stack([x_his_s.reshape(-1, D), x_his_t.reshape(-1, D),
                          x.reshape(-1, D), x.reshape(-1, D)])
    mv = batched_linear(xs_stack,
                        jnp.stack([ws_s, ws_t, ws_t, ws_s]),
                        jnp.stack([bs_s, bs_t, bs_t, bs_s]),
                        split_softplus=Z)                         # (4, B*T, 2Z)
    mv = mv.reshape(4, B, T, 2 * Z)
    mean_s, var_s = mv[0, ..., :Z], mv[0, ..., Z:]
    mean_t, var_t = mv[1, ..., :Z], mv[1, ..., Z:]
    mean_zs, var_zs = mv[2, ..., :Z], mv[2, ..., Z:]
    mean_zt, var_zt = mv[3, ..., :Z], mv[3, ..., Z:]

    eps = jax.random.normal(keys[0], (4, B, T, Z), jnp.float32)
    qz_s = mean_s + var_s * eps[0]          # Normal(mean, scale=var).rsample()
    qz_t = mean_t + var_t * eps[1]
    zs = mean_zs + var_zs * eps[2]
    zt = mean_zt + var_zt * eps[3]

    # --- both reconstruction projections in one Pallas call ---
    rec = batched_linear(
        jnp.stack([qz_s.reshape(-1, Z), qz_t.reshape(-1, Z)]),
        jnp.stack([sp["rec_w"], tp["rec_w"]]),
        jnp.stack([sp["rec_b"], tp["rec_b"]]))
    xs_rec = rec[0].reshape(B, T, D)
    xt_rec = rec[1].reshape(B, T, D)

    # --- all critic evaluations (snet MLBO, tnet MLBO, MuBO) in one call ---
    cat_dim = max(D + Z, 2 * Z)
    hid_dim = max((D + Z) // 4, (2 * Z) // 4)

    def pad_cols(a, n):
        return jnp.pad(a, ((0, 0), (0, n - a.shape[-1])))

    def mlbo_rows(xh, zq, kperm):
        idx = jax.random.permutation(kperm, zq.shape[0])
        a = jnp.concatenate([xh, zq], axis=-1).reshape(-1, D + Z)
        b = jnp.concatenate([xh, zq[idx]], axis=-1).reshape(-1, D + Z)
        return pad_cols(jnp.concatenate([a, b], axis=0), cat_dim)

    idx_m = jax.random.permutation(keys[3], zt.shape[0])
    mubo_rows = pad_cols(jnp.concatenate(
        [jnp.concatenate([zs, zt], axis=-1).reshape(-1, 2 * Z),
         jnp.concatenate([zs, zt[idx_m]], axis=-1).reshape(-1, 2 * Z)],
        axis=0), cat_dim)

    crit_x = jnp.stack([mlbo_rows(x_his_s, qz_s, keys[1]),
                        mlbo_rows(x_his_t, qz_t, keys[2]),
                        mubo_rows])

    def pad_critic(cp):
        w1 = jnp.pad(cp["w1"], ((0, cat_dim - cp["w1"].shape[0]),
                                (0, hid_dim - cp["w1"].shape[1])))
        b1 = jnp.pad(cp["b1"], (0, hid_dim - cp["b1"].shape[0])).reshape(1, hid_dim)
        w2 = jnp.pad(cp["w2"][:, 0], (0, hid_dim - cp["w2"].shape[0])).reshape(1, hid_dim)
        b2 = cp["b2"].reshape(1, 1)
        return w1, b1, w2, b2

    c_s = pad_critic(sp["var_unit"]["critic"])
    c_t = pad_critic(tp["var_unit"]["critic"])
    c_m = pad_critic(mp["critic_st"])
    crit = batched_critic(crit_x,
                          jnp.stack([c_s[0], c_t[0], c_m[0]]),
                          jnp.stack([c_s[1], c_t[1], c_m[1]]),
                          jnp.stack([c_s[2], c_t[2], c_m[2]]),
                          jnp.stack([c_s[3], c_t[3], c_m[3]]))
    R = B * T
    f_q_s, f_sh_s = crit[0, :R, 0], crit[0, R:, 0]
    f_q_t, f_sh_t = crit[1, :R, 0], crit[1, R:, 0]
    f_st, f_s_t = crit[2, :R, 0], crit[2, R:, 0]

    def mlbo_from(fq, fsh):
        point = jax.lax.stop_gradient(1.0 / jnp.exp(fsh).mean())
        return (fq - point * jnp.exp(fsh)).mean()

    mlbo_s = mlbo_from(f_q_s, f_sh_s)
    mlbo_t = mlbo_from(f_q_t, f_sh_t)
    mubo_vec = f_st - f_s_t
    mubo = mubo_vec.mean() + (jnp.where(mubo_vec < 0, mubo_vec, 0.0) ** 2).mean()

    # --- ELBOs / losses ---
    elbo_s = period_sim(xs_rec, x_his_s) - compute_KL(qz_s, mean_s, var_s)
    elbo_t = trend_sim(xt_rec, x_his_t) - compute_KL(qz_t, mean_t, var_t)
    rec_err = jnp.mean((xs_rec + xt_rec - x) ** 2)
    elbo = elbo_t + elbo_s - rec_err
    mlbo = mlbo_t + mlbo_s

    # --- predictions ---
    z_s = mean_s if mean_inference else qz_s
    z_t = mean_t if mean_inference else qz_t
    # NeuralFourierLayer (mask=False): rfft -> irfft(n=seq_len+pred_len)
    freq_num = seq_len // 2 + 1
    zf = jnp.fft.rfft(z_s, axis=1)[:, :freq_num]
    z_ext = jnp.fft.irfft(zf, n=seq_len + pred_len, axis=1)
    xs_pred = batched_linear(z_ext[:, -pred_len:].reshape(1, -1, Z),
                             sp["pred_w"][None], sp["pred_b"][None])[0]
    xs_pred = xs_pred.reshape(B, pred_len, -1)
    xt_pred = tnet_pred(z_t, tp["tp1_w"], tp["tp1_b"], tp["tp2_w"], tp["tp2_b"])

    x_pred = xs_pred + xt_pred
    return x_pred, elbo, mlbo, mubo


def lastv2_forward(params, x, key, seq_len, pred_len, mean_inference=False,
                   top_k=5):
    """LaSTV2.forward with v_num=1, x_mark=None, norm_model=None."""
    # TODO(synk): data-dependent top-k drives static shapes -> one host sync
    # per forward (mirrors .detach().cpu().numpy()); shared by both TimesBlocks.
    T = x.shape[1]
    freq = jnp.abs(jnp.fft.rfft(x, axis=1)).mean(0).mean(-1).at[0].set(0.0)
    top_list = np.argsort(-np.asarray(jax.device_get(freq)))[:top_k]
    periods = tuple(int(T // int(i)) for i in top_list)
    top_idx = tuple(int(i) for i in top_list)
    return _lastv2_core(params, x, key, periods, top_idx,
                        int(seq_len), int(pred_len), bool(mean_inference))


# ----------------------------------------------------------------------------
# Deterministic parameter initialization (synthetic weights)
# ----------------------------------------------------------------------------
def init_params(key, D, O, L, P, Z):
    keys = iter(jax.random.split(key, 256))

    def W(shape, scale=0.1):
        return jax.random.normal(next(keys), shape, jnp.float32) * scale

    def inception(cin, cout):
        ks = []
        for i in range(6):
            k = 2 * i + 1
            ks.append((W((cout, cin, k, k), scale=0.1 / k),
                       jnp.zeros((cout,), jnp.float32)))
        return ks

    def timesblock(d_model, d_ff):
        return {"inc1": inception(d_model, d_ff), "inc2": inception(d_ff, d_model)}

    def critic(x_dim, y_dim):
        cat = x_dim + y_dim
        return {"w1": W((cat, cat // 4)), "b1": W((cat // 4,), 0.01),
                "w2": W((cat // 4, 1)), "b2": W((1,), 0.01)}

    def varunit(in_dim, z_dim):
        return {"loc_w": W((in_dim, z_dim)), "loc_b": W((z_dim,), 0.01),
                "var_w": W((in_dim, z_dim)), "var_b": W((z_dim,), 0.01),
                "critic": critic(z_dim, in_dim)}

    return {
        "snet": {
            "time_block": timesblock(D, D),
            "var_unit": varunit(D, Z),
            "rec_w": W((Z, D)), "rec_b": W((D,), 0.01),
            "pred_w": W((Z, O)), "pred_b": W((O,), 0.01),
        },
        "tnet": {
            "time_block": timesblock(D, D),
            "var_unit": varunit(D, Z),
            "rec_w": W((Z, D)), "rec_b": W((D,), 0.01),
            "tp1_w": W((L, P)), "tp1_b": W((P,), 0.01),
            "tp2_w": W((Z, O)), "tp2_b": W((O,), 0.01),
        },
        "mubo": {"critic_st": critic(Z, Z)},
    }


# ----------------------------------------------------------------------------
# Main
# ----------------------------------------------------------------------------
if __name__ == "__main__":
    # input_len=16, output_len=8, input_dim=4, out_dim=4, latent_dim=16, var_num=1
    B, L, P, D, O, Z = 2, 16, 8, 4, 4, 16

    root = jax.random.PRNGKey(0)
    pkey, xkey, fkey = jax.random.split(root, 3)
    params = init_params(pkey, D, O, L, P, Z)
    x = jax.random.normal(xkey, (B, L, D), jnp.float32)

    x_pred, elbo, mlbo, mubo = lastv2_forward(
        params, x, fkey, seq_len=L, pred_len=P, mean_inference=False)

    jax.block_until_ready((x_pred, elbo, mlbo, mubo))
    assert x_pred.shape == (B, P, O), x_pred.shape
    assert jnp.isfinite(x_pred).all()
    assert jnp.isfinite(elbo) and jnp.isfinite(mlbo) and jnp.isfinite(mubo)
    print("KERNEL_OK")
</pallas_src>

<mosaic_0001>
module attributes {stable_mosaic.version = 11 : i64} {
  func.func @_timesblock_kernel(%arg0: i32, %arg1: memref<8x128xf32, #tpu.memory_space<vmem>>, %arg2: memref<1x5x128x128xf32, #tpu.memory_space<vmem>>, %arg3: memref<1x1x128xf32, #tpu.memory_space<vmem>>, %arg4: memref<1x5x128x128xf32, #tpu.memory_space<vmem>>, %arg5: memref<1x1x128xf32, #tpu.memory_space<vmem>>, %arg6: memref<5x8x1xf32, #tpu.memory_space<vmem>>, %arg7: memref<1x8x128xf32, #tpu.memory_space<vmem>>) attributes {dimension_semantics = [#tpu.dimension_semantics<parallel>], iteration_bounds = array<i64: 2>, scalar_prefetch = 0 : i64, scratch_operands = 0 : i64, tpu.core_type = #tpu.core_type<tc>, window_params = [{pipeline_mode = #tpu.pipeline_mode<synchronous>, transform_indices = @transform_0, window_bounds = array<i64: 8, 128>}, {transform_indices = @transform_1, window_bounds = array<i64: 1, 5, 128, 128>}, {transform_indices = @transform_2, window_bounds = array<i64: 1, 1, 128>}, {transform_indices = @transform_3, window_bounds = array<i64: 1, 5, 128, 128>}, {transform_indices = @transform_4, window_bounds = array<i64: 1, 1, 128>}, {pipeline_mode = #tpu.pipeline_mode<synchronous>, transform_indices = @transform_5, window_bounds = array<i64: 5, 8, 1>}, {transform_indices = @transform_6, window_bounds = array<i64: 1, 8, 128>}]} {
    %c0 = arith.constant 0 : index
    %c0_0 = arith.constant 0 : index
    %0 = vector.load %arg1[%c0, %c0_0] : memref<8x128xf32, #tpu.memory_space<vmem>>, vector<8x128xf32>
    %c0_1 = arith.constant 0 : index
    %c0_2 = arith.constant 0 : index
    %c0_3 = arith.constant 0 : index
    %c0_4 = arith.constant 0 : index
    %1 = vector.load %arg2[%c0_1, %c0_2, %c0_3, %c0_4] : memref<1x5x128x128xf32, #tpu.memory_space<vmem>>, vector<1x1x128x128xf32>
    %2 = vector.shape_cast %1 : vector<1x1x128x128xf32> to vector<128x128xf32>
    %cst = arith.constant dense<0.000000e+00> : vector<8x128xf32>
    %3 = tpu.matmul %0, %2, %cst {dimension_numbers = #tpu.dot_dimension_numbers<[1], [0], [0], [1], [0, 0, 1, 1], [], []>} : vector<8x128xf32>, vector<128x128xf32>, vector<8x128xf32> -> vector<8x128xf32>
    %c0_5 = arith.constant 0 : index
    %c0_6 = arith.constant 0 : index
    %c0_7 = arith.constant 0 : index
    %4 = vector.load %arg3[%c0_5, %c0_6, %c0_7] : memref<1x1x128xf32, #tpu.memory_space<vmem>>, vector<1x1x128xf32>
    %5 = vector.shape_cast %4 : vector<1x1x128xf32> to vector<1x128xf32>
    %6 = vector.broadcast %5 : vector<1x128xf32> to vector<8x128xf32>
    %7 = arith.addf %3, %6 : vector<8x128xf32>
    %cst_8 = arith.constant 5.000000e-01 : f32
    %8 = vector.broadcast %cst_8 : f32 to vector<8x128xf32>
    %9 = arith.mulf %8, %7 : vector<8x128xf32>
    %cst_9 = arith.constant 0.707106769 : f32
    %10 = vector.broadcast %cst_9 : f32 to vector<8x128xf32>
    %11 = arith.mulf %7, %10 : vector<8x128xf32>
    %cst_10 = arith.constant 0.000000e+00 : f32
    %12 = vector.broadcast %cst_10 : f32 to vector<8x128xf32>
    %13 = arith.cmpf oge, %11, %12 : vector<8x128xf32>
    %cst_11 = arith.constant 1.000000e+00 : f32
    %cst_12 = arith.constant -1.000000e+00 : f32
    %14 = vector.broadcast %cst_11 : f32 to vector<8x128xf32>
    %15 = vector.broadcast %cst_12 : f32 to vector<8x128xf32>
    %16 = arith.select %13, %14, %15 : vector<8x128xi1>, vector<8x128xf32>
    %17 = math.absf %11 : vector<8x128xf32>
    %cst_13 = arith.constant 0.327591091 : f32
    %18 = vector.broadcast %cst_13 : f32 to vector<8x128xf32>
    %19 = arith.mulf %18, %17 : vector<8x128xf32>
    %cst_14 = arith.constant 1.000000e+00 : f32
    %20 = vector.broadcast %cst_14 : f32 to vector<8x128xf32>
    %21 = arith.addf %20, %19 : vector<8x128xf32>
    %cst_15 = arith.constant 1.000000e+00 : f32
    %22 = vector.broadcast %cst_15 : f32 to vector<8x128xf32>
    %23 = arith.divf %22, %21 : vector<8x128xf32>
    %cst_16 = arith.constant 1.06140542 : f32
    %24 = vector.broadcast %cst_16 : f32 to vector<8x128xf32>
    %25 = arith.mulf %24, %23 : vector<8x128xf32>
    %cst_17 = arith.constant -1.45315206 : f32
    %26 = vector.broadcast %cst_17 : f32 to vector<8x128xf32>
    %27 = arith.addf %25, %26 : vector<8x128xf32>
    %28 = arith.mulf %27, %23 : vector<8x128xf32>
    %cst_18 = arith.constant 1.42141378 : f32
    %29 = vector.broadcast %cst_18 : f32 to vector<8x128xf32>
    %30 = arith.addf %28, %29 : vector<8x128xf32>
    %31 = arith.mulf %30, %23 : vector<8x128xf32>
    %cst_19 = arith.constant -0.284496725 : f32
    %32 = vector.broadcast %cst_19 : f32 to vector<8x128xf32>
    %33 = arith.addf %31, %32 : vector<8x128xf32>
    %34 = arith.mulf %33, %23 : vector<8x128xf32>
    %cst_20 = arith.constant 0.254829586 : f32
    %35 = vector.broadcast %cst_20 : f32 to vector<8x128xf32>
    %36 = arith.addf %34, %35 : vector<8x128xf32>
    %37 = arith.mulf %36, %23 : vector<8x128xf32>
    %cst_21 = arith.constant 0.000000e+00 : f32
    %38 = vector.broadcast %cst_21 : f32 to vector<8x128xf32>
    %39 = arith.subf %38, %17 : vector<8x128xf32>
    %40 = arith.mulf %39, %17 : vector<8x128xf32>
    %41 = math.exp %40 : vector<8x128xf32>
    %42 = arith.mulf %37, %41 : vector<8x128xf32>
    %cst_22 = arith.constant 1.000000e+00 : f32
    %43 = vector.broadcast %cst_22 : f32 to vector<8x128xf32>
    %44 = arith.subf %43, %42 : vector<8x128xf32>
    %45 = arith.mulf %16, %44 : vector<8x128xf32>
    %cst_23 = arith.constant 1.000000e+00 : f32
    %46 = vector.broadcast %cst_23 : f32 to vector<8x128xf32>
    %47 = arith.addf %46, %45 : vector<8x128xf32>
    %48 = arith.mulf %9, %47 : vector<8x128xf32>
    %c0_24 = arith.constant 0 : index
    %c0_25 = arith.constant 0 : index
    %c0_26 = arith.constant 0 : index
    %c0_27 = arith.constant 0 : index
    %49 = vector.load %arg4[%c0_24, %c0_25, %c0_26, %c0_27] : memref<1x5x128x128xf32, #tpu.memory_space<vmem>>, vector<1x1x128x128xf32>
    %50 = vector.shape_cast %49 : vector<1x1x128x128xf32> to vector<128x128xf32>
    %cst_28 = arith.constant dense<0.000000e+00> : vector<8x128xf32>
    %51 = tpu.matmul %48, %50, %cst_28 {dimension_numbers = #tpu.dot_dimension_numbers<[1], [0], [0], [1], [0, 0, 1, 1], [], []>} : vector<8x128xf32>, vector<128x128xf32>, vector<8x128xf32> -> vector<8x128xf32>
    %c0_29 = arith.constant 0 : index
    %c0_30 = arith.constant 0 : index
    %c0_31 = arith.constant 0 : index
    %52 = vector.load %arg5[%c0_29, %c0_30, %c0_31] : memref<1x1x128xf32, #tpu.memory_space<vmem>>, vector<1x1x128xf32>
    %53 = vector.shape_cast %52 : vector<1x1x128xf32> to vector<1x128xf32>
    %54 = vector.broadcast %53 : vector<1x128xf32> to vector<8x128xf32>
    %55 = arith.addf %51, %54 : vector<8x128xf32>
    %c0_32 = arith.constant 0 : index
    %c0_33 = arith.constant 0 : index
    %c0_34 = arith.constant 0 : index
    %56 = vector.load %arg6[%c0_32, %c0_33, %c0_34] : memref<5x8x1xf32, #tpu.memory_space<vmem>>, vector<1x8x1xf32>
    %57 = vector.shape_cast %56 : vector<1x8x1xf32> to vector<8x1xf32>
    %58 = vector.broadcast %57 : vector<8x1xf32> to vector<8x128xf32>
    %59 = arith.mulf %58, %55 : vector<8x128xf32>
    %60 = arith.addf %0, %59 : vector<8x128xf32>
    %c0_35 = arith.constant 0 : index
    %c1 = arith.constant 1 : index
    %c0_36 = arith.constant 0 : index
    %c0_37 = arith.constant 0 : index
    %61 = vector.load %arg2[%c0_35, %c1, %c0_36, %c0_37] : memref<1x5x128x128xf32, #tpu.memory_space<vmem>>, vector<1x1x128x128xf32>
    %62 = vector.shape_cast %61 : vector<1x1x128x128xf32> to vector<128x128xf32>
    %cst_38 = arith.constant dense<0.000000e+00> : vector<8x128xf32>
    %63 = tpu.matmul %0, %62, %cst_38 {dimension_numbers = #tpu.dot_dimension_numbers<[1], [0], [0], [1], [0, 0, 1, 1], [], []>} : vector<8x128xf32>, vector<128x128xf32>, vector<8x128xf32> -> vector<8x128xf32>
    %c0_39 = arith.constant 0 : index
    %c0_40 = arith.constant 0 : index
    %c0_41 = arith.constant 0 : index
    %64 = vector.load %arg3[%c0_39, %c0_40, %c0_41] : memref<1x1x128xf32, #tpu.memory_space<vmem>>, vector<1x1x128xf32>
    %65 = vector.shape_cast %64 : vector<1x1x128xf32> to vector<1x128xf32>
    %66 = vector.broadcast %65 : vector<1x128xf32> to vector<8x128xf32>
    %67 = arith.addf %63, %66 : vector<8x128xf32>
    %cst_42 = arith.constant 5.000000e-01 : f32
    %68 = vector.broadcast %cst_42 : f32 to vector<8x128xf32>
    %69 = arith.mulf %68, %67 : vector<8x128xf32>
    %cst_43 = arith.constant 0.707106769 : f32
    %70 = vector.broadcast %cst_43 : f32 to vector<8x128xf32>
    %71 = arith.mulf %67, %70 : vector<8x128xf32>
    %cst_44 = arith.constant 0.000000e+00 : f32
    %72 = vector.broadcast %cst_44 : f32 to vector<8x128xf32>
    %73 = arith.cmpf oge, %71, %72 : vector<8x128xf32>
    %cst_45 = arith.constant 1.000000e+00 : f32
    %cst_46 = arith.constant -1.000000e+00 : f32
    %74 = vector.broadcast %cst_45 : f32 to vector<8x128xf32>
    %75 = vector.broadcast %cst_46 : f32 to vector<8x128xf32>
    %76 = arith.select %73, %74, %75 : vector<8x128xi1>, vector<8x128xf32>
    %77 = math.absf %71 : vector<8x128xf32>
    %cst_47 = arith.constant 0.327591091 : f32
    %78 = vector.broadcast %cst_47 : f32 to vector<8x128xf32>
    %79 = arith.mulf %78, %77 : vector<8x128xf32>
    %cst_48 = arith.constant 1.000000e+00 : f32
    %80 = vector.broadcast %cst_48 : f32 to vector<8x128xf32>
    %81 = arith.addf %80, %79 : vector<8x128xf32>
    %cst_49 = arith.constant 1.000000e+00 : f32
    %82 = vector.broadcast %cst_49 : f32 to vector<8x128xf32>
    %83 = arith.divf %82, %81 : vector<8x128xf32>
    %cst_50 = arith.constant 1.06140542 : f32
    %84 = vector.broadcast %cst_50 : f32 to vector<8x128xf32>
    %85 = arith.mulf %84, %83 : vector<8x128xf32>
    %cst_51 = arith.constant -1.45315206 : f32
    %86 = vector.broadcast %cst_51 : f32 to vector<8x128xf32>
    %87 = arith.addf %85, %86 : vector<8x128xf32>
    %88 = arith.mulf %87, %83 : vector<8x128xf32>
    %cst_52 = arith.constant 1.42141378 : f32
    %89 = vector.broadcast %cst_52 : f32 to vector<8x128xf32>
    %90 = arith.addf %88, %89 : vector<8x128xf32>
    %91 = arith.mulf %90, %83 : vector<8x128xf32>
    %cst_53 = arith.constant -0.284496725 : f32
    %92 = vector.broadcast %cst_53 : f32 to vector<8x128xf32>
    %93 = arith.addf %91, %92 : vector<8x128xf32>
    %94 = arith.mulf %93, %83 : vector<8x128xf32>
    %cst_54 = arith.constant 0.254829586 : f32
    %95 = vector.broadcast %cst_54 : f32 to vector<8x128xf32>
    %96 = arith.addf %94, %95 : vector<8x128xf32>
    %97 = arith.mulf %96, %83 : vector<8x128xf32>
    %cst_55 = arith.constant 0.000000e+00 : f32
    %98 = vector.broadcast %cst_55 : f32 to vector<8x128xf32>
    %99 = arith.subf %98, %77 : vector<8x128xf32>
    %100 = arith.mulf %99, %77 : vector<8x128xf32>
    %101 = math.exp %100 : vector<8x128xf32>
    %102 = arith.mulf %97, %101 : vector<8x128xf32>
    %cst_56 = arith.constant 1.000000e+00 : f32
    %103 = vector.broadcast %cst_56 : f32 to vector<8x128xf32>
    %104 = arith.subf %103, %102 : vector<8x128xf32>
    %105 = arith.mulf %76, %104 : vector<8x128xf32>
    %cst_57 = arith.constant 1.000000e+00 : f32
    %106 = vector.broadcast %cst_57 : f32 to vector<8x128xf32>
    %107 = arith.addf %106, %105 : vector<8x128xf32>
    %108 = arith.mulf %69, %107 : vector<8x128xf32>
    %c0_58 = arith.constant 0 : index
    %c1_59 = arith.constant 1 : index
    %c0_60 = arith.constant 0 : index
    %c0_61 = arith.constant 0 : index
    %109 = vector.load %arg4[%c0_58, %c1_59, %c0_60, %c0_61] : memref<1x5x128x128xf32, #tpu.memory_space<vmem>>, vector<1x1x128x128xf32>
    %110 = vector.shape_cast %109 : vector<1x1x128x128xf32> to vector<128x128xf32>
    %cst_62 = arith.constant dense<0.000000e+00> : vector<8x128xf32>
    %111 = tpu.matmul %108, %110, %cst_62 {dimension_numbers = #tpu.dot_dimension_numbers<[1], [0], [0], [1], [0, 0, 1, 1], [], []>} : vector<8x128xf32>, vector<128x128xf32>, vector<8x128xf32> -> vector<8x128xf32>
    %c0_63 = arith.constant 0 : index
    %c0_64 = arith.constant 0 : index
    %c0_65 = arith.constant 0 : index
    %112 = vector.load %arg5[%c0_63, %c0_64, %c0_65] : memref<1x1x128xf32, #tpu.memory_space<vmem>>, vector<1x1x128xf32>
    %113 = vector.shape_cast %112 : vector<1x1x128xf32> to vector<1x128xf32>
    %114 = vector.broadcast %113 : vector<1x128xf32> to vector<8x128xf32>
    %115 = arith.addf %111, %114 : vector<8x128xf32>
    %c1_66 = arith.constant 1 : index
    %c0_67 = arith.constant 0 : index
    %c0_68 = arith.constant 0 : index
    %116 = vector.load %arg6[%c1_66, %c0_67, %c0_68] : memref<5x8x1xf32, #tpu.memory_space<vmem>>, vector<1x8x1xf32>
    %117 = vector.shape_cast %116 : vector<1x8x1xf32> to vector<8x1xf32>
    %118 = vector.broadcast %117 : vector<8x1xf32> to vector<8x128xf32>
    %119 = arith.mulf %118, %115 : vector<8x128xf32>
    %120 = arith.addf %60, %119 : vector<8x128xf32>
    %c0_69 = arith.constant 0 : index
    %c2 = arith.constant 2 : index
    %c0_70 = arith.constant 0 : index
    %c0_71 = arith.constant 0 : index
    %121 = vector.load %arg2[%c0_69, %c2, %c0_70, %c0_71] : memref<1x5x128x128xf32, #tpu.memory_space<vmem>>, vector<1x1x128x128xf32>
    %122 = vector.shape_cast %121 : vector<1x1x128x128xf32> to vector<128x128xf32>
    %cst_72 = arith.constant dense<0.000000e+00> : vector<8x128xf32>
    %123 = tpu.matmul %0, %122, %cst_72 {dimension_numbers = #tpu.dot_dimension_numbers<[1], [0], [0], [1], [0, 0, 1, 1], [], []>} : vector<8x128xf32>, vector<128x128xf32>, vector<8x128xf32> -> vector<8x128xf32>
    %c0_73 = arith.constant 0 : index
    %c0_74 = arith.constant 0 : index
    %c0_75 = arith.constant 0 : index
    %124 = vector.load %arg3[%c0_73, %c0_74, %c0_75] : memref<1x1x128xf32, #tpu.memory_space<vmem>>, vector<1x1x128xf32>
    %125 = vector.shape_cast %124 : vector<1x1x128xf32> to vector<1x128xf32>
    %126 = vector.broadcast %125 : vector<1x128xf32> to vector<8x128xf32>
    %127 = arith.addf %123, %126 : vector<8x128xf32>
    %cst_76 = arith.constant 5.000000e-01 : f32
    %128 = vector.broadcast %cst_76 : f32 to vector<8x128xf32>
    %129 = arith.mulf %128, %127 : vector<8x128xf32>
    %cst_77 = arith.constant 0.707106769 : f32
    %130 = vector.broadcast %cst_77 : f32 to vector<8x128xf32>
    %131 = arith.mulf %127, %130 : vector<8x128xf32>
    %cst_78 = arith.constant 0.000000e+00 : f32
    %132 = vector.broadcast %cst_78 : f32 to vector<8x128xf32>
    %133 = arith.cmpf oge, %131, %132 : vector<8x128xf32>
    %cst_79 = arith.constant 1.000000e+00 : f32
    %cst_80 = arith.constant -1.000000e+00 : f32
    %134 = vector.broadcast %cst_79 : f32 to vector<8x128xf32>
    %135 = vector.broadcast %cst_80 : f32 to vector<8x128xf32>
    %136 = arith.select %133, %134, %135 : vector<8x128xi1>, vector<8x128xf32>
    %137 = math.absf %131 : vector<8x128xf32>
    %cst_81 = arith.constant 0.327591091 : f32
    %138 = vector.broadcast %cst_81 : f32 to vector<8x128xf32>
    %139 = arith.mulf %138, %137 : vector<8x128xf32>
    %cst_82 = arith.constant 1.000000e+00 : f32
    %140 = vector.broadcast %cst_82 : f32 to vector<8x128xf32>
    %141 = arith.addf %140, %139 : vector<8x128xf32>
    %cst_83 = arith.constant 1.000000e+00 : f32
    %142 = vector.broadcast %cst_83 : f32 to vector<8x128xf32>
    %143 = arith.divf %142, %141 : vector<8x128xf32>
    %cst_84 = arith.constant 1.06140542 : f32
    %144 = vector.broadcast %cst_84 : f32 to vector<8x128xf32>
    %145 = arith.mulf %144, %143 : vector<8x128xf32>
    %cst_85 = arith.constant -1.45315206 : f32
    %146 = vector.broadcast %cst_85 : f32 to vector<8x128xf32>
    %147 = arith.addf %145, %146 : vector<8x128xf32>
    %148 = arith.mulf %147, %143 : vector<8x128xf32>
    %cst_86 = arith.constant 1.42141378 : f32
    %149 = vector.broadcast %cst_86 : f32 to vector<8x128xf32>
    %150 = arith.addf %148, %149 : vector<8x128xf32>
    %151 = arith.mulf %150, %143 : vector<8x128xf32>
    %cst_87 = arith.constant -0.284496725 : f32
    %152 = vector.broadcast %cst_87 : f32 to vector<8x128xf32>
    %153 = arith.addf %151, %152 : vector<8x128xf32>
    %154 = arith.mulf %153, %143 : vector<8x128xf32>
    %cst_88 = arith.constant 0.254829586 : f32
    %155 = vector.broadcast %cst_88 : f32 to vector<8x128xf32>
    %156 = arith.addf %154, %155 : vector<8x128xf32>
    %157 = arith.mulf %156, %143 : vector<8x128xf32>
    %cst_89 = arith.constant 0.000000e+00 : f32
    %158 = vector.broadcast %cst_89 : f32 to vector<8x128xf32>
    %159 = arith.subf %158, %137 : vector<8x128xf32>
    %160 = arith.mulf %159, %137 : vector<8x128xf32>
    %161 = math.exp %160 : vector<8x128xf32>
    %162 = arith.mulf %157, %161 : vector<8x128xf32>
    %cst_90 = arith.constant 1.000000e+00 : f32
    %163 = vector.broadcast %cst_90 : f32 to vector<8x128xf32>
    %164 = arith.subf %163, %162 : vector<8x128xf32>
    %165 = arith.mulf %136, %164 : vector<8x128xf32>
    %cst_91 = arith.constant 1.000000e+00 : f32
    %166 = vector.broadcast %cst_91 : f32 to vector<8x128xf32>
    %167 = arith.addf %166, %165 : vector<8x128xf32>
    %168 = arith.mulf %129, %167 : vector<8x128xf32>
    %c0_92 = arith.constant 0 : index
    %c2_93 = arith.constant 2 : index
    %c0_94 = arith.constant 0 : index
    %c0_95 = arith.constant 0 : index
    %169 = vector.load %arg4[%c0_92, %c2_93, %c0_94, %c0_95] : memref<1x5x128x128xf32, #tpu.memory_space<vmem>>, vector<1x1x128x128xf32>
    %170 = vector.shape_cast %169 : vector<1x1x128x128xf32> to vector<128x128xf32>
    %cst_96 = arith.constant dense<0.000000e+00> : vector<8x128xf32>
    %171 = tpu.matmul %168, %170, %cst_96 {dimension_numbers = #tpu.dot_dimension_numbers<[1], [0], [0], [1], [0, 0, 1, 1], [], []>} : vector<8x128xf32>, vector<128x128xf32>, vector<8x128xf32> -> vector<8x128xf32>
    %c0_97 = arith.constant 0 : index
    %c0_98 = arith.constant 0 : index
    %c0_99 = arith.constant 0 : index
    %172 = vector.load %arg5[%c0_97, %c0_98, %c0_99] : memref<1x1x128xf32, #tpu.memory_space<vmem>>, vector<1x1x128xf32>
    %173 = vector.shape_cast %172 : vector<1x1x128xf32> to vector<1x128xf32>
    %174 = vector.broadcast %173 : vector<1x128xf32> to vector<8x128xf32>
    %175 = arith.addf %171, %174 : vector<8x128xf32>
    %c2_100 = arith.constant 2 : index
    %c0_101 = arith.constant 0 : index
    %c0_102 = arith.constant 0 : index
    %176 = vector.load %arg6[%c2_100, %c0_101, %c0_102] : memref<5x8x1xf32, #tpu.memory_space<vmem>>, vector<1x8x1xf32>
    %177 = vector.shape_cast %176 : vector<1x8x1xf32> to vector<8x1xf32>
    %178 = vector.broadcast %177 : vector<8x1xf32> to vector<8x128xf32>
    %179 = arith.mulf %178, %175 : vector<8x128xf32>
    %180 = arith.addf %120, %179 : vector<8x128xf32>
    %c0_103 = arith.constant 0 : index
    %c3 = arith.constant 3 : index
    %c0_104 = arith.constant 0 : index
    %c0_105 = arith.constant 0 : index
    %181 = vector.load %arg2[%c0_103, %c3, %c0_104, %c0_105] : memref<1x5x128x128xf32, #tpu.memory_space<vmem>>, vector<1x1x128x128xf32>
    %182 = vector.shape_cast %181 : vector<1x1x128x128xf32> to vector<128x128xf32>
    %cst_106 = arith.constant dense<0.000000e+00> : vector<8x128xf32>
    %183 = tpu.matmul %0, %182, %cst_106 {dimension_numbers = #tpu.dot_dimension_numbers<[1], [0], [0], [1], [0, 0, 1, 1], [], []>} : vector<8x128xf32>, vector<128x128xf32>, vector<8x128xf32> -> vector<8x128xf32>
    %c0_107 = arith.constant 0 : index
    %c0_108 = arith.constant 0 : index
    %c0_109 = arith.constant 0 : index
    %184 = vector.load %arg3[%c0_107, %c0_108, %c0_109] : memref<1x1x128xf32, #tpu.memory_space<vmem>>, vector<1x1x128xf32>
    %185 = vector.shape_cast %184 : vector<1x1x128xf32> to vector<1x128xf32>
    %186 = vector.broadcast %185 : vector<1x128xf32> to vector<8x128xf32>
    %187 = arith.addf %183, %186 : vector<8x128xf32>
    %cst_110 = arith.constant 5.000000e-01 : f32
    %188 = vector.broadcast %cst_110 : f32 to vector<8x128xf32>
    %189 = arith.mulf %188, %187 : vector<8x128xf32>
    %cst_111 = arith.constant 0.707106769 : f32
    %190 = vector.broadcast %cst_111 : f32 to vector<8x128xf32>
    %191 = arith.mulf %187, %190 : vector<8x128xf32>
    %cst_112 = arith.constant 0.000000e+00 : f32
    %192 = vector.broadcast %cst_112 : f32 to vector<8x128xf32>
    %193 = arith.cmpf oge, %191, %192 : vector<8x128xf32>
    %cst_113 = arith.constant 1.000000e+00 : f32
    %cst_114 = arith.constant -1.000000e+00 : f32
    %194 = vector.broadcast %cst_113 : f32 to vector<8x128xf32>
    %195 = vector.broadcast %cst_114 : f32 to vector<8x128xf32>
    %196 = arith.select %193, %194, %195 : vector<8x128xi1>, vector<8x128xf32>
    %197 = math.absf %191 : vector<8x128xf32>
    %cst_115 = arith.constant 0.327591091 : f32
    %198 = vector.broadcast %cst_115 : f32 to vector<8x128xf32>
    %199 = arith.mulf %198, %197 : vector<8x128xf32>
    %cst_116 = arith.constant 1.000000e+00 : f32
    %200 = vector.broadcast %cst_116 : f32 to vector<8x128xf32>
    %201 = arith.addf %200, %199 : vector<8x128xf32>
    %cst_117 = arith.constant 1.000000e+00 : f32
    %202 = vector.broadcast %cst_117 : f32 to vector<8x128xf32>
    %203 = arith.divf %202, %201 : vector<8x128xf32>
    %cst_118 = arith.constant 1.06140542 : f32
    %204 = vector.broadcast %cst_118 : f32 to vector<8x128xf32>
    %205 = arith.mulf %204, %203 : vector<8x128xf32>
    %cst_119 = arith.constant -1.45315206 : f32
    %206 = vector.broadcast %cst_119 : f32 to vector<8x128xf32>
    %207 = arith.addf %205, %206 : vector<8x128xf32>
    %208 = arith.mulf %207, %203 : vector<8x128xf32>
    %cst_120 = arith.constant 1.42141378 : f32
    %209 = vector.broadcast %cst_120 : f32 to vector<8x128xf32>
    %210 = arith.addf %208, %209 : vector<8x128xf32>
    %211 = arith.mulf %210, %203 : vector<8x128xf32>
    %cst_121 = arith.constant -0.284496725 : f32
    %212 = vector.broadcast %cst_121 : f32 to vector<8x128xf32>
    %213 = arith.addf %211, %212 : vector<8x128xf32>
    %214 = arith.mulf %213, %203 : vector<8x128xf32>
    %cst_122 = arith.constant 0.254829586 : f32
    %215 = vector.broadcast %cst_122 : f32 to vector<8x128xf32>
    %216 = arith.addf %214, %215 : vector<8x128xf32>
    %217 = arith.mulf %216, %203 : vector<8x128xf32>
    %cst_123 = arith.constant 0.000000e+00 : f32
    %218 = vector.broadcast %cst_123 : f32 to vector<8x128xf32>
    %219 = arith.subf %218, %197 : vector<8x128xf32>
    %220 = arith.mulf %219, %197 : vector<8x128xf32>
    %221 = math.exp %220 : vector<8x128xf32>
    %222 = arith.mulf %217, %221 : vector<8x128xf32>
    %cst_124 = arith.constant 1.000000e+00 : f32
    %223 = vector.broadcast %cst_124 : f32 to vector<8x128xf32>
    %224 = arith.subf %223, %222 : vector<8x128xf32>
    %225 = arith.mulf %196, %224 : vector<8x128xf32>
    %cst_125 = arith.constant 1.000000e+00 : f32
    %226 = vector.broadcast %cst_125 : f32 to vector<8x128xf32>
    %227 = arith.addf %226, %225 : vector<8x128xf32>
    %228 = arith.mulf %189, %227 : vector<8x128xf32>
    %c0_126 = arith.constant 0 : index
    %c3_127 = arith.constant 3 : index
    %c0_128 = arith.constant 0 : index
    %c0_129 = arith.constant 0 : index
    %229 = vector.load %arg4[%c0_126, %c3_127, %c0_128, %c0_129] : memref<1x5x128x128xf32, #tpu.memory_space<vmem>>, vector<1x1x128x128xf32>
    %230 = vector.shape_cast %229 : vector<1x1x128x128xf32> to vector<128x128xf32>
    %cst_130 = arith.constant dense<0.000000e+00> : vector<8x128xf32>
    %231 = tpu.matmul %228, %230, %cst_130 {dimension_numbers = #tpu.dot_dimension_numbers<[1], [0], [0], [1], [0, 0, 1, 1], [], []>} : vector<8x128xf32>, vector<128x128xf32>, vector<8x128xf32> -> vector<8x128xf32>
    %c0_131 = arith.constant 0 : index
    %c0_132 = arith.constant 0 : index
    %c0_133 = arith.constant 0 : index
    %232 = vector.load %arg5[%c0_131, %c0_132, %c0_133] : memref<1x1x128xf32, #tpu.memory_space<vmem>>, vector<1x1x128xf32>
    %233 = vector.shape_cast %232 : vector<1x1x128xf32> to vector<1x128xf32>
    %234 = vector.broadcast %233 : vector<1x128xf32> to vector<8x128xf32>
    %235 = arith.addf %231, %234 : vector<8x128xf32>
    %c3_134 = arith.constant 3 : index
    %c0_135 = arith.constant 0 : index
    %c0_136 = arith.constant 0 : index
    %236 = vector.load %arg6[%c3_134, %c0_135, %c0_136] : memref<5x8x1xf32, #tpu.memory_space<vmem>>, vector<1x8x1xf32>
    %237 = vector.shape_cast %236 : vector<1x8x1xf32> to vector<8x1xf32>
    %238 = vector.broadcast %237 : vector<8x1xf32> to vector<8x128xf32>
    %239 = arith.mulf %238, %235 : vector<8x128xf32>
    %240 = arith.addf %180, %239 : vector<8x128xf32>
    %c0_137 = arith.constant 0 : index
    %c4 = arith.constant 4 : index
    %c0_138 = arith.constant 0 : index
    %c0_139 = arith.constant 0 : index
    %241 = vector.load %arg2[%c0_137, %c4, %c0_138, %c0_139] : memref<1x5x128x128xf32, #tpu.memory_space<vmem>>, vector<1x1x128x128xf32>
    %242 = vector.shape_cast %241 : vector<1x1x128x128xf32> to vector<128x128xf32>
    %cst_140 = arith.constant dense<0.000000e+00> : vector<8x128xf32>
    %243 = tpu.matmul %0, %242, %cst_140 {dimension_numbers = #tpu.dot_dimension_numbers<[1], [0], [0], [1], [0, 0, 1, 1], [], []>} : vector<8x128xf32>, vector<128x128xf32>, vector<8x128xf32> -> vector<8x128xf32>
    %c0_141 = arith.constant 0 : index
    %c0_142 = arith.constant 0 : index
    %c0_143 = arith.constant 0 : index
    %244 = vector.load %arg3[%c0_141, %c0_142, %c0_143] : memref<1x1x128xf32, #tpu.memory_space<vmem>>, vector<1x1x128xf32>
    %245 = vector.shape_cast %244 : vector<1x1x128xf32> to vector<1x128xf32>
    %246 = vector.broadcast %245 : vector<1x128xf32> to vector<8x128xf32>
    %247 = arith.addf %243, %246 : vector<8x128xf32>
    %cst_144 = arith.constant 5.000000e-01 : f32
    %248 = vector.broadcast %cst_144 : f32 to vector<8x128xf32>
    %249 = arith.mulf %248, %247 : vector<8x128xf32>
    %cst_145 = arith.constant 0.707106769 : f32
    %250 = vector.broadcast %cst_145 : f32 to vector<8x128xf32>
    %251 = arith.mulf %247, %250 : vector<8x128xf32>
    %cst_146 = arith.constant 0.000000e+00 : f32
    %252 = vector.broadcast %cst_146 : f32 to vector<8x128xf32>
    %253 = arith.cmpf oge, %251, %252 : vector<8x128xf32>
    %cst_147 = arith.constant 1.000000e+00 : f32
    %cst_148 = arith.constant -1.000000e+00 : f32
    %254 = vector.broadcast %cst_147 : f32 to vector<8x128xf32>
    %255 = vector.broadcast %cst_148 : f32 to vector<8x128xf32>
    %256 = arith.select %253, %254, %255 : vector<8x128xi1>, vector<8x128xf32>
    %257 = math.absf %251 : vector<8x128xf32>
    %cst_149 = arith.constant 0.327591091 : f32
    %258 = vector.broadcast %cst_149 : f32 to vector<8x128xf32>
    %259 = arith.mulf %258, %257 : vector<8x128xf32>
    %cst_150 = arith.constant 1.000000e+00 : f32
    %260 = vector.broadcast %cst_150 : f32 to vector<8x128xf32>
    %261 = arith.addf %260, %259 : vector<8x128xf32>
    %cst_151 = arith.constant 1.000000e+00 : f32
    %262 = vector.broadcast %cst_151 : f32 to vector<8x128xf32>
    %263 = arith.divf %262, %261 : vector<8x128xf32>
    %cst_152 = arith.constant 1.06140542 : f32
    %264 = vector.broadcast %cst_152 : f32 to vector<8x128xf32>
    %265 = arith.mulf %264, %263 : vector<8x128xf32>
    %cst_153 = arith.constant -1.45315206 : f32
    %266 = vector.broadcast %cst_153 : f32 to vector<8x128xf32>
    %267 = arith.addf %265, %266 : vector<8x128xf32>
    %268 = arith.mulf %267, %263 : vector<8x128xf32>
    %cst_154 = arith.constant 1.42141378 : f32
    %269 = vector.broadcast %cst_154 : f32 to vector<8x128xf32>
    %270 = arith.addf %268, %269 : vector<8x128xf32>
    %271 = arith.mulf %270, %263 : vector<8x128xf32>
    %cst_155 = arith.constant -0.284496725 : f32
    %272 = vector.broadcast %cst_155 : f32 to vector<8x128xf32>
    %273 = arith.addf %271, %272 : vector<8x128xf32>
    %274 = arith.mulf %273, %263 : vector<8x128xf32>
    %cst_156 = arith.constant 0.254829586 : f32
    %275 = vector.broadcast %cst_156 : f32 to vector<8x128xf32>
    %276 = arith.addf %274, %275 : vector<8x128xf32>
    %277 = arith.mulf %276, %263 : vector<8x128xf32>
    %cst_157 = arith.constant 0.000000e+00 : f32
    %278 = vector.broadcast %cst_157 : f32 to vector<8x128xf32>
    %279 = arith.subf %278, %257 : vector<8x128xf32>
    %280 = arith.mulf %279, %257 : vector<8x128xf32>
    %281 = math.exp %280 : vector<8x128xf32>
    %282 = arith.mulf %277, %281 : vector<8x128xf32>
    %cst_158 = arith.constant 1.000000e+00 : f32
    %283 = vector.broadcast %cst_158 : f32 to vector<8x128xf32>
    %284 = arith.subf %283, %282 : vector<8x128xf32>
    %285 = arith.mulf %256, %284 : vector<8x128xf32>
    %cst_159 = arith.constant 1.000000e+00 : f32
    %286 = vector.broadcast %cst_159 : f32 to vector<8x128xf32>
    %287 = arith.addf %286, %285 : vector<8x128xf32>
    %288 = arith.mulf %249, %287 : vector<8x128xf32>
    %c0_160 = arith.constant 0 : index
    %c4_161 = arith.constant 4 : index
    %c0_162 = arith.constant 0 : index
    %c0_163 = arith.constant 0 : index
    %289 = vector.load %arg4[%c0_160, %c4_161, %c0_162, %c0_163] : memref<1x5x128x128xf32, #tpu.memory_space<vmem>>, vector<1x1x128x128xf32>
    %290 = vector.shape_cast %289 : vector<1x1x128x128xf32> to vector<128x128xf32>
    %cst_164 = arith.constant dense<0.000000e+00> : vector<8x128xf32>
    %291 = tpu.matmul %288, %290, %cst_164 {dimension_numbers = #tpu.dot_dimension_numbers<[1], [0], [0], [1], [0, 0, 1, 1], [], []>} : vector<8x128xf32>, vector<128x128xf32>, vector<8x128xf32> -> vector<8x128xf32>
    %c0_165 = arith.constant 0 : index
    %c0_166 = arith.constant 0 : index
    %c0_167 = arith.constant 0 : index
    %292 = vector.load %arg5[%c0_165, %c0_166, %c0_167] : memref<1x1x128xf32, #tpu.memory_space<vmem>>, vector<1x1x128xf32>
    %293 = vector.shape_cast %292 : vector<1x1x128xf32> to vector<1x128xf32>
    %294 = vector.broadcast %293 : vector<1x128xf32> to vector<8x128xf32>
    %295 = arith.addf %291, %294 : vector<8x128xf32>
    %c4_168 = arith.constant 4 : index
    %c0_169 = arith.constant 0 : index
    %c0_170 = arith.constant 0 : index
    %296 = vector.load %arg6[%c4_168, %c0_169, %c0_170] : memref<5x8x1xf32, #tpu.memory_space<vmem>>, vector<1x8x1xf32>
    %297 = vector.shape_cast %296 : vector<1x8x1xf32> to vector<8x1xf32>
    %298 = vector.broadcast %297 : vector<8x1xf32> to vector<8x128xf32>
    %299 = arith.mulf %298, %295 : vector<8x128xf32>
    %300 = arith.addf %240, %299 : vector<8x128xf32>
    %c0_171 = arith.constant 0 : index
    %c0_172 = arith.constant 0 : index
    %c0_173 = arith.constant 0 : index
    %301 = vector.load %arg7[%c0_171, %c0_172, %c0_173] : memref<1x8x128xf32, #tpu.memory_space<vmem>>, vector<1x8x128xf32>
    %302 = vector.shape_cast %301 : vector<1x8x128xf32> to vector<8x128xf32>
    %303 = vector.shape_cast %300 : vector<8x128xf32> to vector<1x8x128xf32>
    tpu.vector_store %arg7[%c0_171, %c0_172, %c0_173], %303 {strides = array<i32>} : memref<1x8x128xf32, #tpu.memory_space<vmem>>, vector<1x8x128xf32>,
    return
  }
  func.func @transform_0(%arg0: i32) -> (i32, i32) {
    %c0_i32 = arith.constant 0 : i32
    %c0_i32_0 = arith.constant 0 : i32
    %c0_i32_1 = arith.constant 0 : i32
    return %c0_i32, %c0_i32_0 : i32, i32
  }
  func.func @transform_1(%arg0: i32) -> (i32, i32, i32, i32) {
    %c0_i32 = arith.constant 0 : i32
    %c0_i32_0 = arith.constant 0 : i32
    %c0_i32_1 = arith.constant 0 : i32
    %c0_i32_2 = arith.constant 0 : i32
    return %arg0, %c0_i32, %c0_i32_0, %c0_i32_1 : i32, i32, i32, i32
  }
  func.func @transform_2(%arg0: i32) -> (i32, i32, i32) {
    %c0_i32 = arith.constant 0 : i32
    %c0_i32_0 = arith.constant 0 : i32
    %c0_i32_1 = arith.constant 0 : i32
    return %arg0, %c0_i32, %c0_i32_0 : i32, i32, i32
  }
  func.func @transform_3(%arg0: i32) -> (i32, i32, i32, i32) {
    %c0_i32 = arith.constant 0 : i32
    %c0_i32_0 = arith.constant 0 : i32
    %c0_i32_1 = arith.constant 0 : i32
    %c0_i32_2 = arith.constant 0 : i32
    return %arg0, %c0_i32, %c0_i32_0, %c0_i32_1 : i32, i32, i32, i32
  }
  func.func @transform_4(%arg0: i32) -> (i32, i32, i32) {
    %c0_i32 = arith.constant 0 : i32
    %c0_i32_0 = arith.constant 0 : i32
    %c0_i32_1 = arith.constant 0 : i32
    return %arg0, %c0_i32, %c0_i32_0 : i32, i32, i32
  }
  func.func @transform_5(%arg0: i32) -> (i32, i32, i32) {
    %c0_i32 = arith.constant 0 : i32
    %c0_i32_0 = arith.constant 0 : i32
    %c0_i32_1 = arith.constant 0 : i32
    %c0_i32_2 = arith.constant 0 : i32
    return %c0_i32, %c0_i32_0, %c0_i32_1 : i32, i32, i32
  }
  func.func @transform_6(%arg0: i32) -> (i32, i32, i32) {
    %c0_i32 = arith.constant 0 : i32
    %c0_i32_0 = arith.constant 0 : i32
    %c0_i32_1 = arith.constant 0 : i32
    return %arg0, %c0_i32, %c0_i32_0 : i32, i32, i32
  }
}

module attributes {stable_mosaic.version = 11 : i64} {
  func.func @_blinear_kernel(%arg0: i32, %arg1: memref<1x32x4xf32, #tpu.memory_space<vmem>>, %arg2: memref<1x4x32xf32, #tpu.memory_space<vmem>>, %arg3: memref<1x1x32xf32, #tpu.memory_space<vmem>>, %arg4: memref<1x32x32xf32, #tpu.memory_space<vmem>>) attributes {dimension_semantics = [#tpu.dimension_semantics<parallel>], iteration_bounds = array<i64: 4>, scalar_prefetch = 0 : i64, scratch_operands = 0 : i64, tpu.core_type = #tpu.core_type<tc>, window_params = [{transform_indices = @transform_0, window_bounds = array<i64: 1, 32, 4>}, {transform_indices = @transform_1, window_bounds = array<i64: 1, 4, 32>}, {transform_indices = @transform_2, window_bounds = array<i64: 1, 1, 32>}, {transform_indices = @transform_3, window_bounds = array<i64: 1, 32, 32>}]} {
    %c0 = arith.constant 0 : index
    %c0_0 = arith.constant 0 : index
    %c0_1 = arith.constant 0 : index
    %0 = vector.load %arg1[%c0, %c0_0, %c0_1] : memref<1x32x4xf32, #tpu.memory_space<vmem>>, vector<1x32x4xf32>
    %1 = vector.shape_cast %0 : vector<1x32x4xf32> to vector<32x4xf32>
    %c0_2 = arith.constant 0 : index
    %c0_3 = arith.constant 0 : index
    %c0_4 = arith.constant 0 : index
    %2 = vector.load %arg2[%c0_2, %c0_3, %c0_4] : memref<1x4x32xf32, #tpu.memory_space<vmem>>, vector<1x4x32xf32>
    %3 = vector.shape_cast %2 : vector<1x4x32xf32> to vector<4x32xf32>
    %cst = arith.constant dense<0.000000e+00> : vector<32x32xf32>
    %4 = tpu.matmul %1, %3, %cst {dimension_numbers = #tpu.dot_dimension_numbers<[1], [0], [0], [1], [0, 0, 1, 1], [], []>} : vector<32x4xf32>, vector<4x32xf32>, vector<32x32xf32> -> vector<32x32xf32>
    %c0_5 = arith.constant 0 : index
    %c0_6 = arith.constant 0 : index
    %c0_7 = arith.constant 0 : index
    %5 = vector.load %arg3[%c0_5, %c0_6, %c0_7] : memref<1x1x32xf32, #tpu.memory_space<vmem>>, vector<1x1x32xf32>
    %6 = vector.shape_cast %5 : vector<1x1x32xf32> to vector<1x32xf32>
    %7 = vector.broadcast %6 : vector<1x32xf32> to vector<32x32xf32>
    %8 = arith.addf %4, %7 : vector<32x32xf32>
    %9 = tpu.iota {dimensions = array<i32: 1>} : vector<32x32xi32>
    %c16_i32 = arith.constant 16 : i32
    %10 = vector.broadcast %c16_i32 : i32 to vector<32x32xi32>
    %11 = arith.cmpi slt, %9, %10 : vector<32x32xi32>
    %cst_8 = arith.constant 0.000000e+00 : f32
    %12 = vector.broadcast %cst_8 : f32 to vector<32x32xf32>
    %13 = arith.maximumf %8, %12 : vector<32x32xf32>
    %14 = math.absf %8 : vector<32x32xf32>
    %cst_9 = arith.constant 0.000000e+00 : f32
    %15 = vector.broadcast %cst_9 : f32 to vector<32x32xf32>
    %16 = arith.subf %15, %14 : vector<32x32xf32>
    %17 = math.exp %16 : vector<32x32xf32>
    %cst_10 = arith.constant 1.000000e+00 : f32
    %18 = vector.broadcast %cst_10 : f32 to vector<32x32xf32>
    %19 = arith.addf %18, %17 : vector<32x32xf32>
    %20 = math.log %19 : vector<32x32xf32>
    %21 = arith.addf %13, %20 : vector<32x32xf32>
    %22 = arith.select %11, %8, %21 : vector<32x32xi1>, vector<32x32xf32>
    %c0_11 = arith.constant 0 : index
    %c0_12 = arith.constant 0 : index
    %c0_13 = arith.constant 0 : index
    %23 = vector.load %arg4[%c0_11, %c0_12, %c0_13] : memref<1x32x32xf32, #tpu.memory_space<vmem>>, vector<1x32x32xf32>
    %24 = vector.shape_cast %23 : vector<1x32x32xf32> to vector<32x32xf32>
    %25 = vector.shape_cast %22 : vector<32x32xf32> to vector<1x32x32xf32>
    tpu.vector_store %arg4[%c0_11, %c0_12, %c0_13], %25 {strides = array<i32>} : memref<1x32x32xf32, #tpu.memory_space<vmem>>, vector<1x32x32xf32>,
    return
  }
  func.func @transform_0(%arg0: i32) -> (i32, i32, i32) {
    %c0_i32 = arith.constant 0 : i32
    %c0_i32_0 = arith.constant 0 : i32
    %c0_i32_1 = arith.constant 0 : i32
    return %arg0, %c0_i32, %c0_i32_0 : i32, i32, i32
  }
  func.func @transform_1(%arg0: i32) -> (i32, i32, i32) {
    %c0_i32 = arith.constant 0 : i32
    %c0_i32_0 = arith.constant 0 : i32
    %c0_i32_1 = arith.constant 0 : i32
    return %arg0, %c0_i32, %c0_i32_0 : i32, i32, i32
  }
  func.func @transform_2(%arg0: i32) -> (i32, i32, i32) {
    %c0_i32 = arith.constant 0 : i32
    %c0_i32_0 = arith.constant 0 : i32
    %c0_i32_1 = arith.constant 0 : i32
    return %arg0, %c0_i32, %c0_i32_0 : i32, i32, i32
  }
  func.func @transform_3(%arg0: i32) -> (i32, i32, i32) {
    %c0_i32 = arith.constant 0 : i32
    %c0_i32_0 = arith.constant 0 : i32
    %c0_i32_1 = arith.constant 0 : i32
    return %arg0, %c0_i32, %c0_i32_0 : i32, i32, i32
  }
}

module attributes {stable_mosaic.version = 11 : i64} {
  func.func @_critic_kernel(%arg0: i32, %arg1: memref<1x64x32xf32, #tpu.memory_space<vmem>>, %arg2: memref<1x32x8xf32, #tpu.memory_space<vmem>>, %arg3: memref<1x1x8xf32, #tpu.memory_space<vmem>>, %arg4: memref<1x1x8xf32, #tpu.memory_space<vmem>>, %arg5: memref<1x1x1xf32, #tpu.memory_space<vmem>>, %arg6: memref<1x64x1xf32, #tpu.memory_space<vmem>>) attributes {dimension_semantics = [#tpu.dimension_semantics<parallel>], iteration_bounds = array<i64: 3>, scalar_prefetch = 0 : i64, scratch_operands = 0 : i64, tpu.core_type = #tpu.core_type<tc>, window_params = [{transform_indices = @transform_0, window_bounds = array<i64: 1, 64, 32>}, {transform_indices = @transform_1, window_bounds = array<i64: 1, 32, 8>}, {transform_indices = @transform_2, window_bounds = array<i64: 1, 1, 8>}, {transform_indices = @transform_3, window_bounds = array<i64: 1, 1, 8>}, {transform_indices = @transform_4, window_bounds = array<i64: 1, 1, 1>}, {transform_indices = @transform_5, window_bounds = array<i64: 1, 64, 1>}]} {
    %c0 = arith.constant 0 : index
    %c0_0 = arith.constant 0 : index
    %c0_1 = arith.constant 0 : index
    %0 = vector.load %arg1[%c0, %c0_0, %c0_1] : memref<1x64x32xf32, #tpu.memory_space<vmem>>, vector<1x64x32xf32>
    %1 = vector.shape_cast %0 : vector<1x64x32xf32> to vector<64x32xf32>
    %c0_2 = arith.constant 0 : index
    %c0_3 = arith.constant 0 : index
    %c0_4 = arith.constant 0 : index
    %2 = vector.load %arg2[%c0_2, %c0_3, %c0_4] : memref<1x32x8xf32, #tpu.memory_space<vmem>>, vector<1x32x8xf32>
    %3 = vector.shape_cast %2 : vector<1x32x8xf32> to vector<32x8xf32>
    %cst = arith.constant dense<0.000000e+00> : vector<64x8xf32>
    %4 = tpu.matmul %1, %3, %cst {dimension_numbers = #tpu.dot_dimension_numbers<[1], [0], [0], [1], [0, 0, 1, 1], [], []>} : vector<64x32xf32>, vector<32x8xf32>, vector<64x8xf32> -> vector<64x8xf32>
    %c0_5 = arith.constant 0 : index
    %c0_6 = arith.constant 0 : index
    %c0_7 = arith.constant 0 : index
    %5 = vector.load %arg3[%c0_5, %c0_6, %c0_7] : memref<1x1x8xf32, #tpu.memory_space<vmem>>, vector<1x1x8xf32>
    %6 = vector.shape_cast %5 : vector<1x1x8xf32> to vector<1x8xf32>
    %7 = vector.broadcast %6 : vector<1x8xf32> to vector<64x8xf32>
    %8 = arith.addf %4, %7 : vector<64x8xf32>
    %cst_8 = arith.constant 0.000000e+00 : f32
    %9 = vector.broadcast %cst_8 : f32 to vector<64x8xf32>
    %10 = arith.maximumf %8, %9 : vector<64x8xf32>
    %c0_9 = arith.constant 0 : index
    %c0_10 = arith.constant 0 : index
    %c0_11 = arith.constant 0 : index
    %11 = vector.load %arg4[%c0_9, %c0_10, %c0_11] : memref<1x1x8xf32, #tpu.memory_space<vmem>>, vector<1x1x8xf32>
    %12 = vector.shape_cast %11 : vector<1x1x8xf32> to vector<1x8xf32>
    %13 = vector.broadcast %12 : vector<1x8xf32> to vector<64x8xf32>
    %14 = arith.mulf %10, %13 : vector<64x8xf32>
    %cst_12 = arith.constant dense<0.000000e+00> : vector<64xf32>
    %15 = vector.multi_reduction <add>, %14, %cst_12 [1] : vector<64x8xf32> to vector<64xf32>
    %16 = vector.shape_cast %15 : vector<64xf32> to vector<64x1xf32>
    %c0_13 = arith.constant 0 : index
    %c0_14 = arith.constant 0 : index
    %c0_15 = arith.constant 0 : index
    %17 = vector.load %arg5[%c0_13, %c0_14, %c0_15] : memref<1x1x1xf32, #tpu.memory_space<vmem>>, vector<1x1x1xf32>
    %18 = vector.shape_cast %17 : vector<1x1x1xf32> to vector<1x1xf32>
    %19 = vector.broadcast %18 : vector<1x1xf32> to vector<64x1xf32>
    %20 = arith.addf %16, %19 : vector<64x1xf32>
    %21 = arith.negf %20 : vector<64x1xf32>
    %22 = math.exp %21 : vector<64x1xf32>
    %cst_16 = arith.constant 1.000000e+00 : f32
    %23 = vector.broadcast %cst_16 : f32 to vector<64x1xf32>
    %24 = arith.addf %23, %22 : vector<64x1xf32>
    %25 = arith.divf %23, %24 : vector<64x1xf32>
    %c0_17 = arith.constant 0 : index
    %c0_18 = arith.constant 0 : index
    %c0_19 = arith.constant 0 : index
    %26 = vector.load %arg6[%c0_17, %c0_18, %c0_19] : memref<1x64x1xf32, #tpu.memory_space<vmem>>, vector<1x64x1xf32>
    %27 = vector.shape_cast %26 : vector<1x64x1xf32> to vector<64x1xf32>
    %28 = vector.shape_cast %25 : vector<64x1xf32> to vector<1x64x1xf32>
    tpu.vector_store %arg6[%c0_17, %c0_18, %c0_19], %28 {strides = array<i32>} : memref<1x64x1xf32, #tpu.memory_space<vmem>>, vector<1x64x1xf32>,
    return
  }
  func.func @transform_0(%arg0: i32) -> (i32, i32, i32) {
    %c0_i32 = arith.constant 0 : i32
    %c0_i32_0 = arith.constant 0 : i32
    %c0_i32_1 = arith.constant 0 : i32
    return %arg0, %c0_i32, %c0_i32_0 : i32, i32, i32
  }
  func.func @transform_1(%arg0: i32) -> (i32, i32, i32) {
    %c0_i32 = arith.constant 0 : i32
    %c0_i32_0 = arith.constant 0 : i32
    %c0_i32_1 = arith.constant 0 : i32
    return %arg0, %c0_i32, %c0_i32_0 : i32, i32, i32
  }
  func.func @transform_2(%arg0: i32) -> (i32, i32, i32) {
    %c0_i32 = arith.constant 0 : i32
    %c0_i32_0 = arith.constant 0 : i32
    %c0_i32_1 = arith.constant 0 : i32
    return %arg0, %c0_i32, %c0_i32_0 : i32, i32, i32
  }
  func.func @transform_3(%arg0: i32) -> (i32, i32, i32) {
    %c0_i32 = arith.constant 0 : i32
    %c0_i32_0 = arith.constant 0 : i32
    %c0_i32_1 = arith.constant 0 : i32
    return %arg0, %c0_i32, %c0_i32_0 : i32, i32, i32
  }
  func.func @transform_4(%arg0: i32) -> (i32, i32, i32) {
    %c0_i32 = arith.constant 0 : i32
    %c0_i32_0 = arith.constant 0 : i32
    %c0_i32_1 = arith.constant 0 : i32
    return %arg0, %c0_i32, %c0_i32_0 : i32, i32, i32
  }
  func.func @transform_5(%arg0: i32) -> (i32, i32, i32) {
    %c0_i32 = arith.constant 0 : i32
    %c0_i32_0 = arith.constant 0 : i32
    %c0_i32_1 = arith.constant 0 : i32
    return %arg0, %c0_i32, %c0_i32_0 : i32, i32, i32
  }
}

module attributes {stable_mosaic.version = 11 : i64} {
  func.func @_blinear_kernel(%arg0: i32, %arg1: memref<1x32x16xf32, #tpu.memory_space<vmem>>, %arg2: memref<1x16x4xf32, #tpu.memory_space<vmem>>, %arg3: memref<1x1x4xf32, #tpu.memory_space<vmem>>, %arg4: memref<1x32x4xf32, #tpu.memory_space<vmem>>) attributes {dimension_semantics = [#tpu.dimension_semantics<parallel>], iteration_bounds = array<i64: 2>, scalar_prefetch = 0 : i64, scratch_operands = 0 : i64, tpu.core_type = #tpu.core_type<tc>, window_params = [{transform_indices = @transform_0, window_bounds = array<i64: 1, 32, 16>}, {transform_indices = @transform_1, window_bounds = array<i64: 1, 16, 4>}, {transform_indices = @transform_2, window_bounds = array<i64: 1, 1, 4>}, {transform_indices = @transform_3, window_bounds = array<i64: 1, 32, 4>}]} {
    %c0 = arith.constant 0 : index
    %c0_0 = arith.constant 0 : index
    %c0_1 = arith.constant 0 : index
    %0 = vector.load %arg1[%c0, %c0_0, %c0_1] : memref<1x32x16xf32, #tpu.memory_space<vmem>>, vector<1x32x16xf32>
    %1 = vector.shape_cast %0 : vector<1x32x16xf32> to vector<32x16xf32>
    %c0_2 = arith.constant 0 : index
    %c0_3 = arith.constant 0 : index
    %c0_4 = arith.constant 0 : index
    %2 = vector.load %arg2[%c0_2, %c0_3, %c0_4] : memref<1x16x4xf32, #tpu.memory_space<vmem>>, vector<1x16x4xf32>
    %3 = vector.shape_cast %2 : vector<1x16x4xf32> to vector<16x4xf32>
    %cst = arith.constant dense<0.000000e+00> : vector<32x4xf32>
    %4 = tpu.matmul %1, %3, %cst {dimension_numbers = #tpu.dot_dimension_numbers<[1], [0], [0], [1], [0, 0, 1, 1], [], []>} : vector<32x16xf32>, vector<16x4xf32>, vector<32x4xf32> -> vector<32x4xf32>
    %c0_5 = arith.constant 0 : index
    %c0_6 = arith.constant 0 : index
    %c0_7 = arith.constant 0 : index
    %5 = vector.load %arg3[%c0_5, %c0_6, %c0_7] : memref<1x1x4xf32, #tpu.memory_space<vmem>>, vector<1x1x4xf32>
    %6 = vector.shape_cast %5 : vector<1x1x4xf32> to vector<1x4xf32>
    %7 = vector.broadcast %6 : vector<1x4xf32> to vector<32x4xf32>
    %8 = arith.addf %4, %7 : vector<32x4xf32>
    %c0_8 = arith.constant 0 : index
    %c0_9 = arith.constant 0 : index
    %c0_10 = arith.constant 0 : index
    %9 = vector.load %arg4[%c0_8, %c0_9, %c0_10] : memref<1x32x4xf32, #tpu.memory_space<vmem>>, vector<1x32x4xf32>
    %10 = vector.shape_cast %9 : vector<1x32x4xf32> to vector<32x4xf32>
    %11 = vector.shape_cast %8 : vector<32x4xf32> to vector<1x32x4xf32>
    tpu.vector_store %arg4[%c0_8, %c0_9, %c0_10], %11 {strides = array<i32>} : memref<1x32x4xf32, #tpu.memory_space<vmem>>, vector<1x32x4xf32>,
    return
  }
  func.func @transform_0(%arg0: i32) -> (i32, i32, i32) {
    %c0_i32 = arith.constant 0 : i32
    %c0_i32_0 = arith.constant 0 : i32
    %c0_i32_1 = arith.constant 0 : i32
    return %arg0, %c0_i32, %c0_i32_0 : i32, i32, i32
  }
  func.func @transform_1(%arg0: i32) -> (i32, i32, i32) {
    %c0_i32 = arith.constant 0 : i32
    %c0_i32_0 = arith.constant 0 : i32
    %c0_i32_1 = arith.constant 0 : i32
    return %arg0, %c0_i32, %c0_i32_0 : i32, i32, i32
  }
  func.func @transform_2(%arg0: i32) -> (i32, i32, i32) {
    %c0_i32 = arith.constant 0 : i32
    %c0_i32_0 = arith.constant 0 : i32
    %c0_i32_1 = arith.constant 0 : i32
    return %arg0, %c0_i32, %c0_i32_0 : i32, i32, i32
  }
  func.func @transform_3(%arg0: i32) -> (i32, i32, i32) {
    %c0_i32 = arith.constant 0 : i32
    %c0_i32_0 = arith.constant 0 : i32
    %c0_i32_1 = arith.constant 0 : i32
    return %arg0, %c0_i32, %c0_i32_0 : i32, i32, i32
  }
}

module attributes {stable_mosaic.version = 11 : i64} {
  func.func @_blinear_kernel(%arg0: i32, %arg1: memref<1x16x16xf32, #tpu.memory_space<vmem>>, %arg2: memref<1x16x4xf32, #tpu.memory_space<vmem>>, %arg3: memref<1x1x4xf32, #tpu.memory_space<vmem>>, %arg4: memref<1x16x4xf32, #tpu.memory_space<vmem>>) attributes {dimension_semantics = [#tpu.dimension_semantics<parallel>], iteration_bounds = array<i64: 1>, scalar_prefetch = 0 : i64, scratch_operands = 0 : i64, tpu.core_type = #tpu.core_type<tc>, window_params = [{transform_indices = @transform_0, window_bounds = array<i64: 1, 16, 16>}, {transform_indices = @transform_1, window_bounds = array<i64: 1, 16, 4>}, {transform_indices = @transform_2, window_bounds = array<i64: 1, 1, 4>}, {transform_indices = @transform_3, window_bounds = array<i64: 1, 16, 4>}]} {
    %c0 = arith.constant 0 : index
    %c0_0 = arith.constant 0 : index
    %c0_1 = arith.constant 0 : index
    %0 = vector.load %arg1[%c0, %c0_0, %c0_1] : memref<1x16x16xf32, #tpu.memory_space<vmem>>, vector<1x16x16xf32>
    %1 = vector.shape_cast %0 : vector<1x16x16xf32> to vector<16x16xf32>
    %c0_2 = arith.constant 0 : index
    %c0_3 = arith.constant 0 : index
    %c0_4 = arith.constant 0 : index
    %2 = vector.load %arg2[%c0_2, %c0_3, %c0_4] : memref<1x16x4xf32, #tpu.memory_space<vmem>>, vector<1x16x4xf32>
    %3 = vector.shape_cast %2 : vector<1x16x4xf32> to vector<16x4xf32>
    %cst = arith.constant dense<0.000000e+00> : vector<16x4xf32>
    %4 = tpu.matmul %1, %3, %cst {dimension_numbers = #tpu.dot_dimension_numbers<[1], [0], [0], [1], [0, 0, 1, 1], [], []>} : vector<16x16xf32>, vector<16x4xf32>, vector<16x4xf32> -> vector<16x4xf32>
    %c0_5 = arith.constant 0 : index
    %c0_6 = arith.constant 0 : index
    %c0_7 = arith.constant 0 : index
    %5 = vector.load %arg3[%c0_5, %c0_6, %c0_7] : memref<1x1x4xf32, #tpu.memory_space<vmem>>, vector<1x1x4xf32>
    %6 = vector.shape_cast %5 : vector<1x1x4xf32> to vector<1x4xf32>
    %7 = vector.broadcast %6 : vector<1x4xf32> to vector<16x4xf32>
    %8 = arith.addf %4, %7 : vector<16x4xf32>
    %c0_8 = arith.constant 0 : index
    %c0_9 = arith.constant 0 : index
    %c0_10 = arith.constant 0 : index
    %9 = vector.load %arg4[%c0_8, %c0_9, %c0_10] : memref<1x16x4xf32, #tpu.memory_space<vmem>>, vector<1x16x4xf32>
    %10 = vector.shape_cast %9 : vector<1x16x4xf32> to vector<16x4xf32>
    %11 = vector.shape_cast %8 : vector<16x4xf32> to vector<1x16x4xf32>
    tpu.vector_store %arg4[%c0_8, %c0_9, %c0_10], %11 {strides = array<i32>} : memref<1x16x4xf32, #tpu.memory_space<vmem>>, vector<1x16x4xf32>,
    return
  }
  func.func @transform_0(%arg0: i32) -> (i32, i32, i32) {
    %c0_i32 = arith.constant 0 : i32
    %c0_i32_0 = arith.constant 0 : i32
    %c0_i32_1 = arith.constant 0 : i32
    return %arg0, %c0_i32, %c0_i32_0 : i32, i32, i32
  }
  func.func @transform_1(%arg0: i32) -> (i32, i32, i32) {
    %c0_i32 = arith.constant 0 : i32
    %c0_i32_0 = arith.constant 0 : i32
    %c0_i32_1 = arith.constant 0 : i32
    return %arg0, %c0_i32, %c0_i32_0 : i32, i32, i32
  }
  func.func @transform_2(%arg0: i32) -> (i32, i32, i32) {
    %c0_i32 = arith.constant 0 : i32
    %c0_i32_0 = arith.constant 0 : i32
    %c0_i32_1 = arith.constant 0 : i32
    return %arg0, %c0_i32, %c0_i32_0 : i32, i32, i32
  }
  func.func @transform_3(%arg0: i32) -> (i32, i32, i32) {
    %c0_i32 = arith.constant 0 : i32
    %c0_i32_0 = arith.constant 0 : i32
    %c0_i32_1 = arith.constant 0 : i32
    return %arg0, %c0_i32, %c0_i32_0 : i32, i32, i32
  }
}

module attributes {stable_mosaic.version = 11 : i64} {
  func.func @_tpred_kernel(%arg0: i32, %arg1: memref<1x16x16xf32, #tpu.memory_space<vmem>>, %arg2: memref<8x16xf32, #tpu.memory_space<vmem>>, %arg3: memref<8x1xf32, #tpu.memory_space<vmem>>, %arg4: memref<16x4xf32, #tpu.memory_space<vmem>>, %arg5: memref<1x4xf32, #tpu.memory_space<vmem>>, %arg6: memref<1x8x4xf32, #tpu.memory_space<vmem>>) attributes {dimension_semantics = [#tpu.dimension_semantics<parallel>], iteration_bounds = array<i64: 2>, scalar_prefetch = 0 : i64, scratch_operands = 0 : i64, tpu.core_type = #tpu.core_type<tc>, window_params = [{transform_indices = @transform_0, window_bounds = array<i64: 1, 16, 16>}, {pipeline_mode = #tpu.pipeline_mode<synchronous>, transform_indices = @transform_1, window_bounds = array<i64: 8, 16>}, {pipeline_mode = #tpu.pipeline_mode<synchronous>, transform_indices = @transform_2, window_bounds = array<i64: 8, 1>}, {pipeline_mode = #tpu.pipeline_mode<synchronous>, transform_indices = @transform_3, window_bounds = array<i64: 16, 4>}, {pipeline_mode = #tpu.pipeline_mode<synchronous>, transform_indices = @transform_4, window_bounds = array<i64: 1, 4>}, {transform_indices = @transform_5, window_bounds = array<i64: 1, 8, 4>}]} {
    %c0 = arith.constant 0 : index
    %c0_0 = arith.constant 0 : index
    %0 = vector.load %arg2[%c0, %c0_0] : memref<8x16xf32, #tpu.memory_space<vmem>>, vector<8x16xf32>
    %c0_1 = arith.constant 0 : index
    %c0_2 = arith.constant 0 : index
    %c0_3 = arith.constant 0 : index
    %1 = vector.load %arg1[%c0_1, %c0_2, %c0_3] : memref<1x16x16xf32, #tpu.memory_space<vmem>>, vector<1x16x16xf32>
    %2 = vector.shape_cast %1 : vector<1x16x16xf32> to vector<16x16xf32>
    %cst = arith.constant dense<0.000000e+00> : vector<8x16xf32>
    %3 = tpu.matmul %0, %2, %cst {dimension_numbers = #tpu.dot_dimension_numbers<[1], [0], [0], [1], [0, 0, 1, 1], [], []>} : vector<8x16xf32>, vector<16x16xf32>, vector<8x16xf32> -> vector<8x16xf32>
    %c0_4 = arith.constant 0 : index
    %c0_5 = arith.constant 0 : index
    %4 = vector.load %arg3[%c0_4, %c0_5] : memref<8x1xf32, #tpu.memory_space<vmem>>, vector<8x1xf32>
    %5 = vector.broadcast %4 : vector<8x1xf32> to vector<8x16xf32>
    %6 = arith.addf %3, %5 : vector<8x16xf32>
    %c0_6 = arith.constant 0 : index
    %c0_7 = arith.constant 0 : index
    %7 = vector.load %arg4[%c0_6, %c0_7] : memref<16x4xf32, #tpu.memory_space<vmem>>, vector<16x4xf32>
    %cst_8 = arith.constant dense<0.000000e+00> : vector<8x4xf32>
    %8 = tpu.matmul %6, %7, %cst_8 {dimension_numbers = #tpu.dot_dimension_numbers<[1], [0], [0], [1], [0, 0, 1, 1], [], []>} : vector<8x16xf32>, vector<16x4xf32>, vector<8x4xf32> -> vector<8x4xf32>
    %c0_9 = arith.constant 0 : index
    %c0_10 = arith.constant 0 : index
    %9 = vector.load %arg5[%c0_9, %c0_10] : memref<1x4xf32, #tpu.memory_space<vmem>>, vector<1x4xf32>
    %10 = vector.broadcast %9 : vector<1x4xf32> to vector<8x4xf32>
    %11 = arith.addf %8, %10 : vector<8x4xf32>
    %c0_11 = arith.constant 0 : index
    %c0_12 = arith.constant 0 : index
    %c0_13 = arith.constant 0 : index
    %12 = vector.load %arg6[%c0_11, %c0_12, %c0_13] : memref<1x8x4xf32, #tpu.memory_space<vmem>>, vector<1x8x4xf32>
    %13 = vector.shape_cast %12 : vector<1x8x4xf32> to vector<8x4xf32>
    %14 = vector.shape_cast %11 : vector<8x4xf32> to vector<1x8x4xf32>
    tpu.vector_store %arg6[%c0_11, %c0_12, %c0_13], %14 {strides = array<i32>} : memref<1x8x4xf32, #tpu.memory_space<vmem>>, vector<1x8x4xf32>,
    return
  }
  func.func @transform_0(%arg0: i32) -> (i32, i32, i32) {
    %c0_i32 = arith.constant 0 : i32
    %c0_i32_0 = arith.constant 0 : i32
    %c0_i32_1 = arith.constant 0 : i32
    return %arg0, %c0_i32, %c0_i32_0 : i32, i32, i32
  }
  func.func @transform_1(%arg0: i32) -> (i32, i32) {
    %c0_i32 = arith.constant 0 : i32
    %c0_i32_0 = arith.constant 0 : i32
    %c0_i32_1 = arith.constant 0 : i32
    return %c0_i32, %c0_i32_0 : i32, i32
  }
  func.func @transform_2(%arg0: i32) -> (i32, i32) {
    %c0_i32 = arith.constant 0 : i32
    %c0_i32_0 = arith.constant 0 : i32
    %c0_i32_1 = arith.constant 0 : i32
    return %c0_i32, %c0_i32_0 : i32, i32
  }
  func.func @transform_3(%arg0: i32) -> (i32, i32) {
    %c0_i32 = arith.constant 0 : i32
    %c0_i32_0 = arith.constant 0 : i32
    %c0_i32_1 = arith.constant 0 : i32
    return %c0_i32, %c0_i32_0 : i32, i32
  }
  func.func @transform_4(%arg0: i32) -> (i32, i32) {
    %c0_i32 = arith.constant 0 : i32
    %c0_i32_0 = arith.constant 0 : i32
    %c0_i32_1 = arith.constant 0 : i32
    return %c0_i32, %c0_i32_0 : i32, i32
  }
  func.func @transform_5(%arg0: i32) -> (i32, i32, i32) {
    %c0_i32 = arith.constant 0 : i32
    %c0_i32_0 = arith.constant 0 : i32
    %c0_i32_1 = arith.constant 0 : i32
    return %arg0, %c0_i32, %c0_i32_0 : i32, i32, i32
  }
}

</mosaic_0001>

<bundles_post_ra>
// kernel: tile.14
= control target key start
LH: loop header
LB: loop body
LE: loop exit
PB: predicated region body
PF: predicated region fallthrough
CT: control target
= control target key end

     0   :  { %s7_s6 = smov 3  ;;  %s21_s9 = smov 3  ;;  %vm4_vm0 = vcmask 31744   ;;  %vm11_vm1 = vcmask 654944   ;;  %vm18_vm2 = vcmask 622144   ;;  %vm25_vm3 = vcmask 589344   ;;  %s275_s0 = inlined_call_operand.vmem [shape: f32[2,20,4], index: 0, kind: input, shape index: {}]   ;;  %s276_s1 = inlined_call_operand.vmem [shape: f32[2,80], index: 1, kind: output, shape index: {}]  }
   0x1   :  { %v145_v0 = vld [vmem:[%s275_s0 + $0x13] ss:$24 sm:%s7_s6]   ;;  %s183_s10 = smov 76   ;;  %v147_v1 = vld [vmem:[%s275_s0 + $0x11] ss:$24 sm:%s21_s9]   ;;  %s14_s13 = smov 3 }
   0x2   :  { %9 = vrot.lane.b32.xlu0 %v145_v0, %s183_s10  ;;  %s184_s14 = smov 68   ;;  %v146_v2 = vld [vmem:[%s275_s0 + $0x12] ss:$24 sm:%s14_s13]   ;;  %s28_s17 = smov 3  ;;  %vm32_vm4 = vcmask 556544   ;;  %vm39_vm5 = vcmask 523744  }
   0x3   :  { %23 = vrot.lane.b32.xlu1 %v147_v1, %s184_s14  ;;  %v148_v3 = vld [vmem:[%s275_s0 + $0x10] ss:$24 sm:%s28_s17]   ;;  %s35_s20 = smov 3  ;;  %s42_s21 = smov 3  ;;  %vm46_vm6 = vcmask 490944   ;;  %vm53_vm7 = vcmask 458144  }
   0x4   :  { %s185_s22 = smov 72   ;;  %s186_s23 = smov 64   ;;  %v149_v4 = vld [vmem:[%s275_s0 + $0xf] ss:$24 sm:%s35_s20]   ;;  %v150_v5 = vld [vmem:[%s275_s0 + $0xe] ss:$24 sm:%s42_s21]  }
   0x5   :  { %s49_s28 = smov 3  ;;  %s56_s29 = smov 3  ;;  %vm60_vm8 = vcmask 425344   ;;  %vm67_vm9 = vcmask 392544   ;;  %vm74_vm10 = vcmask 359744   ;;  %vm81_vm11 = vcmask 326944  }
   0x6   :  { %16 = vrot.lane.b32.xlu0 %v146_v2, %s185_s22  ;;  %s187_s30 = smov 60   ;;  %s188_s2 = smov 56   ;;  %v151_v6 = vld [vmem:[%s275_s0 + $0xd] ss:$24 sm:%s49_s28]   ;;  %vm88_vm12 = vcmask 294144   ;;  %vm95_vm13 = vcmask 261344  }
   0x7   :  { %30 = vrot.lane.b32.xlu1 %v148_v3, %s186_s23  ;;  %v152_v7 = vld [vmem:[%s275_s0 + $0xc] ss:$24 sm:%s56_s29]   ;;  %s63_s7 = smov 3  ;;  %s70_s8 = smov 3  ;;  %vm102_vm14 = vcmask 228544   ;;  %vm109_vm15 = vcmask 195744  }
   0x8   :  { %s189_s9 = smov 52   ;;  %s190_s10 = smov 48   ;;  %v153_v8 = vld [vmem:[%s275_s0 + $0xb] ss:$24 sm:%s63_s7]   ;;  %v154_v9 = vld [vmem:[%s275_s0 + $0xa] ss:$24 sm:%s70_s8]  }
   0x9   :  { %s77_s15 = smov 3  ;;  %s84_s16 = smov 3 }
   0xa   :  { %37 = vrot.lane.b32.xlu0 %v149_v4, %s187_s30  ;;  %s191_s17 = smov 44   ;;  %s192_s18 = smov 40   ;;  %v155_v10 = vld [vmem:[%s275_s0 + $0x9] ss:$24 sm:%s77_s15]  }
   0xb   :  { %44 = vrot.lane.b32.xlu1 %v150_v5, %s188_s2  ;;  %s2_s21 = smov 3  ;;  %v156_v11 = vld [vmem:[%s275_s0 + $0x8] ss:$24 sm:%s84_s16]   ;;  %s91_s24 = smov 3 }
   0xc   :  { %v3_v12 = vld [vmem:[%s275_s0] ss:$24 sm:%s2_s21]   ;;  %s98_s27 = smov 3  ;;  %s193_s28 = smov 36   ;;  %v157_v13 = vld [vmem:[%s275_s0 + $0x7] ss:$24 sm:%s91_s24]  }
   0xd   :  { %5 = vst.msk [vmem:[#allocation0] sm:$0x3] %vm4_vm0, %v3_v12   ;;  %s194_s29 = smov 32   ;;  %v158_v14 = vld [vmem:[%s275_s0 + $0x6] ss:$24 sm:%s98_s27]   ;;  %s105_s5 = smov 3 }
   0xe   :  { %51 = vrot.lane.b32.xlu0 %v151_v6, %s189_s9  ;;  %s112_s6 = smov 3  ;;  %s195_s7 = smov 28   ;;  %v159_v15 = vld [vmem:[%s275_s0 + $0x5] ss:$24 sm:%s105_s5]   ;;  %vm116_vm0 = vcmask 162944  }
   0xf   :  { %58 = vrot.lane.b32.xlu1 %v152_v7, %s190_s10  ;;  %s196_s8 = smov 24   ;;  %v160_v16 = vld [vmem:[%s275_s0 + $0x4] ss:$24 sm:%s112_s6]   ;;  %s119_s13 = smov 3 }
  0x10   :  { %s126_s14 = smov 3  ;;  %s197_s15 = smov 20   ;;  %v161_v17 = vld [vmem:[%s275_s0 + $0x3] ss:$24 sm:%s119_s13]  }
  0x11   :  { %s198_s16 = smov 16   ;;  %v162_v18 = vld [vmem:[%s275_s0 + $0x2] ss:$24 sm:%s126_s14]   ;;  %s133_s21 = smov 3 }
  0x12   :  { %65 = vrot.lane.b32.xlu0 %v153_v8, %s191_s17  ;;  %s199_s22 = smov 12   ;;  %s200_s23 = smov 8   ;;  %v163_v19 = vld [vmem:[%s275_s0 + $0x1] ss:$24 sm:%s133_s21]  }
  0x13   :  { %72 = vrot.lane.b32.xlu1 %v154_v9, %s192_s18  ;;  %s201_s0 = smov 4  }
  0x16   :  { %79 = vrot.lane.b32.xlu0 %v155_v10, %s193_s28 }
  0x17   :  { %86 = vrot.lane.b32.xlu1 %v156_v11, %s194_s29 }
  0x1a   :  { %93 = vrot.lane.b32.xlu0 %v157_v13, %s195_s7 }
  0x1b   :  { %100 = vrot.lane.b32.xlu1 %v158_v14, %s196_s8 }
  0x1e   :  { %107 = vrot.lane.b32.xlu0 %v159_v15, %s197_s15 }
  0x1f   :  { %114 = vrot.lane.b32.xlu1 %v160_v16, %s198_s16 }
  0x22   :  { %121 = vrot.lane.b32.xlu0 %v161_v17, %s199_s22 }
  0x23   :  { %128 = vrot.lane.b32.xlu1 %v162_v18, %s200_s23 }
  0x26   :  { %135 = vrot.lane.b32.xlu0 %v163_v19, %s201_s0 }
  0x74   :  { %v10_v20 = vpop.permute.xlu0 %9  }
  0x75   :  { %12 = vst.msk [vmem:[#allocation0] sm:$0x3] %vm11_vm1, %v10_v20   ;;  %v24_v21 = vpop.permute.xlu1 %23   ;;  %vm123_vm1 = vcmask 130144  }
  0x78   :  { %v17_v22 = vpop.permute.xlu0 %16  }
  0x79   :  { %19 = vst.msk [vmem:[#allocation0] sm:$0x3] %vm18_vm2, %v17_v22   ;;  %v31_v23 = vpop.permute.xlu1 %30   ;;  %vm130_vm2 = vcmask 97344  }
  0x7a   :  { %26 = vst.msk [vmem:[#allocation0] sm:$0x3] %vm25_vm3, %v24_v21   ;;  %vm137_vm3 = vcmask 64544  }
  0x7b   :  { %33 = vst.msk [vmem:[#allocation0] sm:$0x3] %vm32_vm4, %v31_v23  }
  0x7c   :  { %v38_v24 = vpop.permute.xlu0 %37  }
  0x7d   :  { %40 = vst.msk [vmem:[#allocation0] sm:$0x3] %vm39_vm5, %v38_v24   ;;  %v45_v25 = vpop.permute.xlu1 %44  }
  0x7e   :  { %47 = vst.msk [vmem:[#allocation0] sm:$0x3] %vm46_vm6, %v45_v25  }
  0x80   :  { %v52_v26 = vpop.permute.xlu0 %51  }
  0x81   :  { %54 = vst.msk [vmem:[#allocation0] sm:$0x3] %vm53_vm7, %v52_v26   ;;  %v59_v27 = vpop.permute.xlu1 %58  }
  0x82   :  { %61 = vst.msk [vmem:[#allocation0] sm:$0x3] %vm60_vm8, %v59_v27  }
  0x84   :  { %v66_v28 = vpop.permute.xlu0 %65  }
  0x85   :  { %68 = vst.msk [vmem:[#allocation0] sm:$0x3] %vm67_vm9, %v66_v28   ;;  %v73_v29 = vpop.permute.xlu1 %72  }
  0x86   :  { %75 = vst.msk [vmem:[#allocation0] sm:$0x3] %vm74_vm10, %v73_v29  }
  0x88   :  { %v80_v30 = vpop.permute.xlu0 %79  }
  0x89   :  { %82 = vst.msk [vmem:[#allocation0] sm:$0x3] %vm81_vm11, %v80_v30   ;;  %v87_v31 = vpop.permute.xlu1 %86  }
  0x8a   :  { %89 = vst.msk [vmem:[#allocation0] sm:$0x3] %vm88_vm12, %v87_v31  }
  0x8c   :  { %v94_v32 = vpop.permute.xlu0 %93  }
  0x8d   :  { %96 = vst.msk [vmem:[#allocation0] sm:$0x3] %vm95_vm13, %v94_v32   ;;  %v101_v33 = vpop.permute.xlu1 %100  }
  0x8e   :  { %103 = vst.msk [vmem:[#allocation0] sm:$0x3] %vm102_vm14, %v101_v33  }
  0x90   :  { %v108_v34 = vpop.permute.xlu0 %107  }
  0x91   :  { %110 = vst.msk [vmem:[#allocation0] sm:$0x3] %vm109_vm15, %v108_v34   ;;  %v115_v35 = vpop.permute.xlu1 %114  }
  0x92   :  { %117 = vst.msk [vmem:[#allocation0] sm:$0x3] %vm116_vm0, %v115_v35  }
  0x94   :  { %v122_v36 = vpop.permute.xlu0 %121  }
  0x95   :  { %124 = vst.msk [vmem:[#allocation0] sm:$0x3] %vm123_vm1, %v122_v36   ;;  %v129_v37 = vpop.permute.xlu1 %128  }
  0x96   :  { %131 = vst.msk [vmem:[#allocation0] sm:$0x3] %vm130_vm2, %v129_v37  }
  0x98   :  { %v136_v38 = vpop.permute.xlu0 %135  }
  0x99   :  { %138 = vst.msk [vmem:[#allocation0] sm:$0x3] %vm137_vm3, %v136_v38  }
  0xa0   :  { %v142_v39 = vld [vmem:[#allocation0] sm:$0x3] }
  0xa1   :  { %144 = vst [vmem:[%s276_s1] sm:$0x3] %v142_v39 }

// kernel: squeeze.56
= control target key start
LH: loop header
LB: loop body
LE: loop exit
PB: predicated region body
PF: predicated region fallthrough
CT: control target
= control target key end

     0   :  { %s130_s8 = smov 116   ;;  %s131_s9 = smov 120   ;;  %vm7_vm0 = vcmask 31744   ;;  %s221_s0 = inlined_call_operand.vmem [shape: f32[1,2,64], index: 0, kind: input, shape index: {}]   ;;  %s222_s1 = inlined_call_operand.vmem [shape: f32[1,32,4], index: 1, kind: output, shape index: {}]  }
   0x1   :  { %v4_v0 = vld [vmem:[%s221_s0] sm:$0x3]  ;;  %s129_s0 = smov 124   ;;  %s132_s10 = smov 112  }
   0x2   :  { %5 = vst [vmem:[#allocation0] sm:$0x3] %v4_v0  ;;  %s133_s11 = smov 108   ;;  %s134_s12 = smov 104  }
   0x3   :  { %s135_s13 = smov 100   ;;  %s136_s14 = smov 96  }
   0x4   :  { %s137_s17 = smov 92   ;;  %s138_s18 = smov 88  }
   0x5   :  { %s139_s19 = smov 84   ;;  %s140_s20 = smov 80  }
   0x6   :  { %s141_s21 = smov 76   ;;  %s142_s22 = smov 72  }
   0x7   :  { %s143_s23 = smov 68  }
   0x9   :  { %v9_v1 = vld [vmem:[#allocation0] sm:$0x3]  }
   0xa   :  { %v21_v2 = vld [vmem:[#allocation0] sm:$0x3]   ;;  %10 = vrot.lane.b32.xlu0 %v9_v1, %s129_s0 }
   0xb   :  { %22 = vrot.lane.b32.xlu1 %v21_v2, %s130_s8  ;;  %v15_v3 = vld [vmem:[#allocation0] sm:$0x3]  }
   0xc   :  { %v27_v4 = vld [vmem:[#allocation0] sm:$0x3]  }
   0xd   :  { %v33_v5 = vld [vmem:[#allocation0] sm:$0x3]  }
   0xe   :  { %16 = vrot.lane.b32.xlu0 %v15_v3, %s131_s9  ;;  %v39_v6 = vld [vmem:[#allocation0] sm:$0x3]  }
   0xf   :  { %28 = vrot.lane.b32.xlu1 %v27_v4, %s132_s10  ;;  %v45_v7 = vld [vmem:[#allocation0] sm:$0x3]  }
  0x10   :  { %v51_v8 = vld [vmem:[#allocation0] sm:$0x3]  }
  0x11   :  { %v57_v9 = vld [vmem:[#allocation0] sm:$0x3]  }
  0x12   :  { %34 = vrot.lane.b32.xlu0 %v33_v5, %s133_s11  ;;  %v63_v10 = vld [vmem:[#allocation0] sm:$0x3]  }
  0x13   :  { %40 = vrot.lane.b32.xlu1 %v39_v6, %s134_s12  ;;  %v6_v11 = vld [vmem:[#allocation0] sm:$0x3]  }
  0x14   :  { %8 = vst.msk [vmem:[%s222_s1] ss:$16 sm:$0x3] %vm7_vm0, %v6_v11   ;;  %v69_v12 = vld [vmem:[#allocation0] sm:$0x3]  }
  0x15   :  { %v75_v13 = vld [vmem:[#allocation0] sm:$0x3]  }
  0x16   :  { %46 = vrot.lane.b32.xlu0 %v45_v7, %s135_s13  ;;  %v81_v14 = vld [vmem:[#allocation0] sm:$0x3]  }
  0x17   :  { %52 = vrot.lane.b32.xlu1 %v51_v8, %s136_s14  ;;  %v87_v15 = vld [vmem:[#allocation0] sm:$0x3]  }
  0x18   :  { %v93_v16 = vld [vmem:[#allocation0] sm:$0x3]  }
  0x1a   :  { %58 = vrot.lane.b32.xlu0 %v57_v9, %s137_s17 }
  0x1b   :  { %64 = vrot.lane.b32.xlu1 %v63_v10, %s138_s18 }
  0x1e   :  { %70 = vrot.lane.b32.xlu0 %v69_v12, %s139_s19 }
  0x1f   :  { %76 = vrot.lane.b32.xlu1 %v75_v13, %s140_s20 }
  0x22   :  { %82 = vrot.lane.b32.xlu0 %v81_v14, %s141_s21 }
  0x23   :  { %88 = vrot.lane.b32.xlu1 %v87_v15, %s142_s22 }
  0x26   :  { %94 = vrot.lane.b32.xlu0 %v93_v16, %s143_s23 }
  0x7c   :  { %v11_v17 = vpop.permute.xlu0 %10  }
  0x7d   :  { %v23_v18 = vpop.permute.xlu1 %22   ;;  %99 = vst.msk [vmem:[%s222_s1 + $0x1] ss:$16 sm:$0x3] %vm7_vm0, %v11_v17  }
  0x7e   :  { %101 = vst.msk [vmem:[%s222_s1 + $0x3] ss:$16 sm:$0x3] %vm7_vm0, %v23_v18  }
  0x80   :  { %v17_v19 = vpop.permute.xlu0 %16  }
  0x81   :  { %v29_v20 = vpop.permute.xlu1 %28   ;;  %100 = vst.msk [vmem:[%s222_s1 + $0x2] ss:$16 sm:$0x3] %vm7_vm0, %v17_v19  }
  0x82   :  { %102 = vst.msk [vmem:[%s222_s1 + $0x4] ss:$16 sm:$0x3] %vm7_vm0, %v29_v20  }
  0x84   :  { %v35_v21 = vpop.permute.xlu0 %34  }
  0x85   :  { %v41_v22 = vpop.permute.xlu1 %40   ;;  %103 = vst.msk [vmem:[%s222_s1 + $0x5] ss:$16 sm:$0x3] %vm7_vm0, %v35_v21  }
  0x86   :  { %104 = vst.msk [vmem:[%s222_s1 + $0x6] ss:$16 sm:$0x3] %vm7_vm0, %v41_v22  }
  0x88   :  { %v47_v23 = vpop.permute.xlu0 %46  }
  0x89   :  { %v53_v24 = vpop.permute.xlu1 %52   ;;  %105 = vst.msk [vmem:[%s222_s1 + $0x7] ss:$16 sm:$0x3] %vm7_vm0, %v47_v23  }
  0x8a   :  { %106 = vst.msk [vmem:[%s222_s1 + $0x8] ss:$16 sm:$0x3] %vm7_vm0, %v53_v24  }
  0x8c   :  { %v59_v25 = vpop.permute.xlu0 %58  }
  0x8d   :  { %v65_v26 = vpop.permute.xlu1 %64   ;;  %107 = vst.msk [vmem:[%s222_s1 + $0x9] ss:$16 sm:$0x3] %vm7_vm0, %v59_v25  }
  0x8e   :  { %108 = vst.msk [vmem:[%s222_s1 + $0xa] ss:$16 sm:$0x3] %vm7_vm0, %v65_v26  }
  0x90   :  { %v71_v27 = vpop.permute.xlu0 %70  }
  0x91   :  { %v77_v28 = vpop.permute.xlu1 %76   ;;  %109 = vst.msk [vmem:[%s222_s1 + $0xb] ss:$16 sm:$0x3] %vm7_vm0, %v71_v27  }
  0x92   :  { %110 = vst.msk [vmem:[%s222_s1 + $0xc] ss:$16 sm:$0x3] %vm7_vm0, %v77_v28  }
  0x94   :  { %v83_v29 = vpop.permute.xlu0 %82  }
  0x95   :  { %v89_v30 = vpop.permute.xlu1 %88   ;;  %111 = vst.msk [vmem:[%s222_s1 + $0xd] ss:$16 sm:$0x3] %vm7_vm0, %v83_v29  }
  0x96   :  { %112 = vst.msk [vmem:[%s222_s1 + $0xe] ss:$16 sm:$0x3] %vm7_vm0, %v89_v30  }
  0x98   :  { %v95_v31 = vpop.permute.xlu0 %94  }
  0x99   :  { %113 = vst.msk [vmem:[%s222_s1 + $0xf] ss:$16 sm:$0x3] %vm7_vm0, %v95_v31  }

// kernel: _lastv2_core.9
= control target key start
LH: loop header
LB: loop body
LE: loop exit
PB: predicated region body
PF: predicated region fallthrough
CT: control target
= control target key end

     0   :  { %s527_s12 = smov 0   ;;  %s563_s0 = inlined_call_operand.vmem [shape: f32[4,32,4], index: 0, kind: input, shape index: {}]   ;;  %s564_s1 = inlined_call_operand.vmem [shape: f32[4,4,32], index: 1, kind: input, shape index: {}]   ;;  %s565_s2 = inlined_call_operand.vmem [shape: f32[4,1,32], index: 2, kind: input, shape index: {}]   ;;  %s566_s3 = inlined_call_operand.vmem [shape: f32[4,32,32], index: 3, kind: output, shape index: {}]  }
   0x1 LB: > { %s440_s13 = sadd.s32 4294967295, %s505_s12   ;;  %p444_p0 = scmp.ge.s32.totalorder %s505_s12, 1  ;;  %s505_s12 = sphi %s527_s12, %s13_s12  }
   0x2   : > { %p154_p1 = scmp.lt.s32.totalorder %s505_s12, 5 }
   0x4   : > { %p155_p2 = pnand %p444_p0, %p154_p1 }
   0x5   : > { %p185_p3 = scmp.lt.s32.totalorder (!%p155_p2), %s440_s13, 3  ;;  %vm227_vm0 = vcmask (!%p155_p2), 1043456   ;;  %vm214_vm1 = vcmask (!%p155_p2), 31744   ;;  %v316_v34 = vlaneseq (!%p155_p2)  ;;  %vm359_vm3 = vcmask (!%p155_p2), 261120  }
   0x6   : > { %158 = sbr.rel (%p155_p2) target bundleno = 273 (0x111), region = 32 }
   0x7   : > { %v317_v35 = vand.u32 (!%p155_p2), 127, %v316_v34 }
   0x9   : > { %vm318_vm2 = vcmp.lt.s32.totalorder (!%p155_p2), %v317_v35, 16 }
   0xd   : > { %s568_s13 = smov (!%p185_p3, %s440_s13), 3 }
   0xe   : > { %s447_s14 = sshll.u32 %s568_s13, 2  ;;  %s458_s15 = sshll.u32 %s568_s13, 5 }
   0xf   : > { %s193_s18 = scalar_lea.vmem %s564_s1, %s447_s14  ;;  %s189_s21 = scalar_lea.vmem %s563_s0, %s458_s15 }
  0x10   : > { %v206_v0 = vld [vmem:[%s193_s18] sm:$0xf]  ;;  %v204_v2 = vld [vmem:[%s189_s21 + $0x10] sm:$0xff]  ;;  %v203_v3 = vld [vmem:[%s189_s21 + $0x8] sm:$0xff]  ;;  %s196_s24 = scalar_lea.vmem %s565_s2, %s568_s13  ;;  %s201_s27 = scalar_lea.vmem %s566_s3, %s458_s15 }
  0x11   : > { %v202_v1 = vld [vmem:[%s189_s21] sm:$0xff]  ;;  %465 = vmatprep.subr.msk.mxu0 %vm227_vm0, %v206_v0  ;;  %473 = vmatprep.subr.msk.mxu1 %vm227_vm0, %v206_v0  ;;  %v205_v4 = vld [vmem:[%s189_s21 + $0x18] sm:$0xff] }
  0x12   : > { %466 = vmatpush3.msk.msra.mxu0 %vm227_vm0, %v206_v0  ;;  %474 = vmatpush3.msk.msra.mxu1 %vm227_vm0, %v206_v0  ;;  %v450_v5 = vld [vmem:[%s196_s24] ss:$0 sm:$0xff] }
  0x13   : > { %467 = vmatprep.mubr.msk.f32.mxu0 %vm214_vm1, %v202_v1  ;;  %470 = vmatprep.mubr.msk.f32.mxu1 %vm214_vm1, %v204_v2 }
  0x14   : > { %468 = vmatmul.mubr.msk.f32.vlgmr.msra.gmra.mrb[0].mxu0 %vm214_vm1, %v203_v3  ;;  %471 = vmatmul.mubr.msk.f32.vlgmr.msra.gmra.mrb[0].mxu1 %vm214_vm1, %v205_v4 }
  0xe7   : > { %v469_v6 = vpop.f32.mrb[0].mxu0  ;;  %v472_v7 = vpop.f32.mrb[0].mxu1 }
  0xe8   : > { %v303_v8 = vadd.f32 %v469_v6, %v450_v5  ;;  %v313_v9 = vadd.f32 %v472_v7, %v450_v5  ;;  %v297_v10 = vpop.f32.mrb[1].mxu0  ;;  %v307_v11 = vpop.f32.mrb[1].mxu1 }
  0xe9   : > { %v298_v12 = vadd.f32 %v450_v5, %v297_v10  ;;  %v308_v13 = vadd.f32 %v450_v5, %v307_v11 }
  0xea   : > { %v324_v14 = vand.u32 2147483647, %v303_v8  ;;  %v326_v15 = vand.u32 2147483647, %v313_v9  ;;  %v320_v38 = vmax.f32 %v303_v8, 0.0  ;;  %v322_v41 = vmax.f32 %v313_v9, 0.0 }
  0xeb   : > { %v323_v16 = vand.u32 2147483647, %v298_v12  ;;  %v325_v17 = vand.u32 2147483647, %v308_v13  ;;  %v319_v45 = vmax.f32 %v298_v12, 0.0  ;;  %v321_v48 = vmax.f32 %v308_v13, 0.0 }
  0xec   : > { %v328_v18 = vsub.f32 0.0, %v324_v14  ;;  %v330_v19 = vsub.f32 0.0, %v326_v15 }
  0xed   : > { %v327_v20 = vsub.f32 0.0, %v323_v16  ;;  %v329_v21 = vsub.f32 0.0, %v325_v17 }
  0xee   : > { %v333_v22 = vmul.f32 1.442695, %v328_v18  ;;  %v337_v23 = vmul.f32 1.442695, %v330_v19 }
  0xef   : > { %v331_v24 = vmul.f32 1.442695, %v327_v20  ;;  %v335_v25 = vmul.f32 1.442695, %v329_v21 }
  0xf0   : > { %483 = vpow2.f32 %v333_v22 }
  0xf1   : > { %485 = vpow2.f32 %v337_v23 }
  0xf2   : > { %487 = vpow2.f32 %v331_v24 }
  0xf3   : > { %489 = vpow2.f32 %v335_v25 }
  0xfa   : > { %v484_v26 = vpop.eup %483 }
  0xfb   : > { %v486_v27 = vpop.eup %485  ;;  %v340_v28 = vadd.f32 1.0, %v484_v26 }
  0xfc   : > { %v488_v29 = vpop.eup %487  ;;  %v342_v30 = vadd.f32 1.0, %v486_v27 }
  0xfd   : > { %v490_v31 = vpop.eup %489  ;;  %491 = vlog2.f32 %v340_v28  ;;  %v339_v32 = vadd.f32 1.0, %v488_v29 }
  0xfe   : > { %493 = vlog2.f32 %v342_v30  ;;  %v341_v33 = vadd.f32 1.0, %v490_v31 }
  0xff   : > { %495 = vlog2.f32 %v339_v32 }
 0x100   : > { %497 = vlog2.f32 %v341_v33 }
 0x107   : > { %v492_v36 = vpop.eup %491 }
 0x108   : > { %v494_v37 = vpop.eup %493  ;;  %v346_v39 = vmul.f32 0.6931472, %v492_v36 }
 0x109   : > { %v496_v40 = vpop.eup %495  ;;  %v350_v42 = vmul.f32 0.6931472, %v494_v37 }
 0x10a   : > { %v498_v43 = vpop.eup %497  ;;  %v352_v44 = vadd.f32 %v346_v39, %v320_v38  ;;  %v344_v46 = vmul.f32 0.6931472, %v496_v40 }
 0x10b   : > { %v354_v47 = vadd.f32 %v350_v42, %v322_v41  ;;  %v348_v49 = vmul.f32 0.6931472, %v498_v43 }
 0x10c   : > { %v356_v50 = vsel %vm318_vm2, %v303_v8, %v352_v44  ;;  %v351_v51 = vadd.f32 %v344_v46, %v319_v45 }
 0x10d   : > { %361 = vst.msk [vmem:[%s201_s27 + $0x8] sm:$0xff] %vm359_vm3, %v356_v50  ;;  %v358_v52 = vsel %vm318_vm2, %v313_v9, %v354_v47  ;;  %v353_v53 = vadd.f32 %v348_v49, %v321_v48 }
 0x10e   : > { %363 = vst.msk [vmem:[%s201_s27 + $0x18] sm:$0xff] %vm359_vm3, %v358_v52  ;;  %v355_v54 = vsel %vm318_vm2, %v298_v12, %v351_v51 }
 0x10f   : > { %360 = vst.msk [vmem:[%s201_s27] sm:$0xff] %vm359_vm3, %v355_v54  ;;  %v357_v55 = vsel %vm318_vm2, %v308_v13, %v353_v53 }
 0x110   : > { %362 = vst.msk [vmem:[%s201_s27 + $0x10] sm:$0xff] %vm359_vm3, %v357_v55 }
 0x111 PF: > { %s13_s12 = sadd.s32 1, %s505_s12  }
 0x112   : > { %p10_p4 = scmp.ge.s32.totalorder %s13_s12, 6  }
 0x114   :  { %12 = sbr.rel (!%p10_p4) target bundleno = 1 (0x1), region = 68 }

// kernel: _lastv2_core.8
= control target key start
LH: loop header
LB: loop body
LE: loop exit
PB: predicated region body
PF: predicated region fallthrough
CT: control target
= control target key end

     0   :  { %s2433_s21 = smov 0   ;;  %s2805_s0 = inlined_call_operand.vmem [shape: f32[8,128], index: 0, kind: input, shape index: {}]   ;;  %s2806_s1 = inlined_call_operand.vmem [shape: f32[2,5,128,128], index: 1, kind: input, shape index: {}]   ;;  %s2807_s2 = inlined_call_operand.vmem [shape: f32[2,1,128], index: 2, kind: input, shape index: {}]   ;;  %s2808_s3 = inlined_call_operand.vmem [shape: f32[2,5,128,128], index: 3, kind: input, shape index: {}]   ;;  %s2809_s4 = inlined_call_operand.vmem [shape: f32[2,1,128], index: 4, kind: input, shape index: {}]   ;;  %s2810_s5 = inlined_call_operand.vmem [shape: f32[5,8,1], index: 5, kind: input, shape index: {}]   ;;  %s2811_s6 = inlined_call_operand.vmem [shape: f32[2,8,128], index: 6, kind: output, shape index: {}]  }
   0x1 LB: > { %s1444_s22 = sadd.s32 4294967295, %s2391_s21   ;;  %p1448_p0 = scmp.ge.s32.totalorder %s2391_s21, 1  ;;  %s2391_s21 = sphi %s2433_s21, %s16_s21  }
   0x2   : > { %p238_p1 = scmp.lt.s32.totalorder %s2391_s21, 3 }
   0x4   : > { %p239_p2 = pnand %p1448_p0, %p238_p1 }
   0x5   : > { %p278_p3 = scmp.lt.s32.totalorder (!%p239_p2), %s1444_s22, 1  ;;  %v2393_v0 = vmov (!%p239_p2), 0.0|0.0   ;;  %vm2394_vm0 = vmmov (!%p239_p2), 0   ;;  %v2395_v1 = vmov (!%p239_p2), 0.0   ;;  %v2485_v28 = vld [vmem:[%s2805_s0] sm:$0xff] (!%p239_p2) }
   0x6   : > { %242 = sbr.rel (%p239_p2) target bundleno = 659 (0x293), region = 44  ;;  %2108 = vmatprep.subr.bf16.mxu0 (!%p239_p2), %v2393_v0  ;;  %1790 = vmatprep.mubr.msk.f32.mxu0 (!%p239_p2), %vm2394_vm0, %v2395_v1 }
   0x7   : > { %2132 = vmatprep.subr.bf16.mxu1 (!%p239_p2), %v2393_v0  ;;  %1825 = vmatprep.mubr.msk.f32.mxu1 (!%p239_p2), %vm2394_vm0, %v2395_v1 }
   0xd   : > { %s2813_s22 = smov (!%p278_p3, %s1444_s22), 1 }
   0xe   : > { %s2348_s23 = smul.u32 640, %s2813_s22  ;;  %s285_s10 = scalar_lea.vmem %s2807_s2, %s2813_s22 }
   0xf   : > { %s293_s25 = scalar_lea.vmem %s2809_s4, %s2813_s22  ;;  %s1451_s28 = sshll.u32 %s2813_s22, 3 }
  0x10   : > { %s2455_s26 = scalar_lea.vmem %s2806_s1, %s2348_s23  ;;  %s2577_s7 = scalar_lea.vmem %s2808_s3, %s2348_s23 }
  0x11   : > { %v299_v2 = vld [vmem:[%s2455_s26] sm:$0xff]  ;;  %v300_v3 = vld [vmem:[%s2455_s26 + $0x8] sm:$0xff]  ;;  %v301_v4 = vld [vmem:[%s2455_s26 + $0x10] sm:$0xff] }
  0x12   : > { %v2109_v5 = vpack.c.bf16 %v300_v3, %v299_v2  ;;  %v302_v6 = vld [vmem:[%s2455_s26 + $0x18] sm:$0xff]  ;;  %v303_v8 = vld [vmem:[%s2455_s26 + $0x20] sm:$0xff]  ;;  %v304_v9 = vld [vmem:[%s2455_s26 + $0x28] sm:$0xff] }
  0x13   : > { %v2112_v7 = vpack.c.bf16 %v302_v6, %v301_v4  ;;  %v2115_v10 = vpack.c.bf16 %v304_v9, %v303_v8  ;;  %v305_v11 = vld [vmem:[%s2455_s26 + $0x30] sm:$0xff]  ;;  %v306_v12 = vld [vmem:[%s2455_s26 + $0x38] sm:$0xff]  ;;  %v307_v14 = vld [vmem:[%s2455_s26 + $0x40] sm:$0xff] }
  0x14   : > { %2110 = vmatpush3.bf16.msra.mxu0 %v2109_v5  ;;  %v2118_v13 = vpack.c.bf16 %v306_v12, %v305_v11  ;;  %v308_v15 = vld [vmem:[%s2455_s26 + $0x48] sm:$0xff]  ;;  %v309_v17 = vld [vmem:[%s2455_s26 + $0x50] sm:$0xff]  ;;  %v310_v18 = vld [vmem:[%s2455_s26 + $0x58] sm:$0xff] }
  0x15   : > { %2111 = vmatprep.subr.bf16.mxu0 %v2393_v0  ;;  %v2121_v16 = vpack.c.bf16 %v308_v15, %v307_v14  ;;  %v2124_v19 = vpack.c.bf16 %v310_v18, %v309_v17  ;;  %v311_v20 = vld [vmem:[%s2455_s26 + $0x60] sm:$0xff]  ;;  %v312_v21 = vld [vmem:[%s2455_s26 + $0x68] sm:$0xff]  ;;  %v313_v23 = vld [vmem:[%s2455_s26 + $0x70] sm:$0xff] }
  0x16   : > { %v2127_v22 = vpack.c.bf16 %v312_v21, %v311_v20  ;;  %v314_v24 = vld [vmem:[%s2455_s26 + $0x78] sm:$0xff]  ;;  %v1454_v26 = vld [vmem:[%s2455_s26 + $0x80] sm:$0xff]  ;;  %v1455_v27 = vld [vmem:[%s2455_s26 + $0x88] sm:$0xff] }
  0x17   : > { %v2130_v25 = vpack.c.bf16 %v314_v24, %v313_v23  ;;  %v2157_v29 = vpack.c.bf16 %v1455_v27, %v1454_v26  ;;  %v1456_v30 = vld [vmem:[%s2455_s26 + $0x90] sm:$0xff]  ;;  %v1457_v31 = vld [vmem:[%s2455_s26 + $0x98] sm:$0xff]  ;;  %v1458_v33 = vld [vmem:[%s2455_s26 + $0xa0] sm:$0xff] }
  0x18   : > { %2113 = vmatpush3.bf16.msra.mxu0 %v2112_v7  ;;  %v2160_v32 = vpack.c.bf16 %v1457_v31, %v1456_v30  ;;  %v1459_v34 = vld [vmem:[%s2455_s26 + $0xa8] sm:$0xff]  ;;  %v1460_v36 = vld [vmem:[%s2455_s26 + $0xb0] sm:$0xff]  ;;  %v1461_v37 = vld [vmem:[%s2455_s26 + $0xb8] sm:$0xff] }
  0x19   : > { %2114 = vmatprep.subr.bf16.mxu0 %v2393_v0  ;;  %v2163_v35 = vpack.c.bf16 %v1459_v34, %v1458_v33  ;;  %v2166_v38 = vpack.c.bf16 %v1461_v37, %v1460_v36  ;;  %v1462_v39 = vld [vmem:[%s2455_s26 + $0xc0] sm:$0xff]  ;;  %v1463_v40 = vld [vmem:[%s2455_s26 + $0xc8] sm:$0xff]  ;;  %v1464_v42 = vld [vmem:[%s2455_s26 + $0xd0] sm:$0xff] }
  0x1a   : > { %v2169_v41 = vpack.c.bf16 %v1463_v40, %v1462_v39  ;;  %v1465_v43 = vld [vmem:[%s2455_s26 + $0xd8] sm:$0xff]  ;;  %v1466_v45 = vld [vmem:[%s2455_s26 + $0xe0] sm:$0xff]  ;;  %v1467_v46 = vld [vmem:[%s2455_s26 + $0xe8] sm:$0xff] }
  0x1b   : > { %v2172_v44 = vpack.c.bf16 %v1465_v43, %v1464_v42  ;;  %v2175_v47 = vpack.c.bf16 %v1467_v46, %v1466_v45  ;;  %v1468_v48 = vld [vmem:[%s2455_s26 + $0xf0] sm:$0xff]  ;;  %v1469_v49 = vld [vmem:[%s2455_s26 + $0xf8] sm:$0xff]  ;;  %v1487_v51 = vld [vmem:[%s2455_s26 + $0x100] sm:$0xff] }
  0x1c   : > { %2116 = vmatpush3.bf16.msra.mxu0 %v2115_v10  ;;  %v2178_v50 = vpack.c.bf16 %v1469_v49, %v1468_v48  ;;  %v1488_v52 = vld [vmem:[%s2455_s26 + $0x108] sm:$0xff]  ;;  %v1489_v54 = vld [vmem:[%s2455_s26 + $0x110] sm:$0xff]  ;;  %v1490_v55 = vld [vmem:[%s2455_s26 + $0x118] sm:$0xff] }
  0x1d   : > { %2117 = vmatprep.subr.bf16.mxu0 %v2393_v0  ;;  %v2205_v53 = vpack.c.bf16 %v1488_v52, %v1487_v51  ;;  %v2208_v56 = vpack.c.bf16 %v1490_v55, %v1489_v54  ;;  %v1491_v57 = vld [vmem:[%s2455_s26 + $0x120] sm:$0xff]  ;;  %v1492_v58 = vld [vmem:[%s2455_s26 + $0x128] sm:$0xff]  ;;  %v1493_v60 = vld [vmem:[%s2455_s26 + $0x130] sm:$0xff] }
  0x1e   : > { %v2211_v59 = vpack.c.bf16 %v1492_v58, %v1491_v57  ;;  %v1494_v61 = vld [vmem:[%s2455_s26 + $0x138] sm:$0xff]  ;;  %v1495_v63 = vld [vmem:[%s2455_s26 + $0x140] sm:$0xff]  ;;  %v1496_v2 = vld [vmem:[%s2455_s26 + $0x148] sm:$0xff] }
  0x1f   : > { %v2214_v62 = vpack.c.bf16 %v1494_v61, %v1493_v60  ;;  %v2217_v3 = vpack.c.bf16 %v1496_v2, %v1495_v63  ;;  %v1497_v4 = vld [vmem:[%s2455_s26 + $0x150] sm:$0xff]  ;;  %v1498_v5 = vld [vmem:[%s2455_s26 + $0x158] sm:$0xff]  ;;  %v1499_v7 = vld [vmem:[%s2455_s26 + $0x160] sm:$0xff] }
  0x20   : > { %2119 = vmatpush3.bf16.msra.mxu0 %v2118_v13  ;;  %v2220_v6 = vpack.c.bf16 %v1498_v5, %v1497_v4  ;;  %v1500_v8 = vld [vmem:[%s2455_s26 + $0x168] sm:$0xff]  ;;  %v1501_v10 = vld [vmem:[%s2455_s26 + $0x170] sm:$0xff]  ;;  %v1502_v11 = vld [vmem:[%s2455_s26 + $0x178] sm:$0xff] }
  0x21   : > { %2120 = vmatprep.subr.bf16.mxu0 %v2393_v0  ;;  %v2223_v9 = vpack.c.bf16 %v1500_v8, %v1499_v7  ;;  %v2226_v12 = vpack.c.bf16 %v1502_v11, %v1501_v10  ;;  %v1520_v13 = vld [vmem:[%s2455_s26 + $0x180] sm:$0xff]  ;;  %v1521_v14 = vld [vmem:[%s2455_s26 + $0x188] sm:$0xff]  ;;  %v1523_v17 = vld [vmem:[%s2455_s26 + $0x198] sm:$0xff] }
  0x22   : > { %v2253_v15 = vpack.c.bf16 %v1521_v14, %v1520_v13  ;;  %v1525_v20 = vld [vmem:[%s2455_s26 + $0x1a8] sm:$0xff]  ;;  %v1527_v23 = vld [vmem:[%s2455_s26 + $0x1b8] sm:$0xff]  ;;  %v421_v46 = vld [vmem:[%s2577_s7 + $0x10] sm:$0xff] }
  0x23   : > { %v1529_v26 = vld [vmem:[%s2455_s26 + $0x1c8] sm:$0xff]  ;;  %v1531_v30 = vld [vmem:[%s2455_s26 + $0x1d8] sm:$0xff]  ;;  %v1559_v55 = vld [vmem:[%s2455_s26 + $0x230] sm:$0xff] }
  0x24   : > { %2122 = vmatpush3.bf16.msra.mxu0 %v2121_v16  ;;  %v1522_v16 = vld [vmem:[%s2455_s26 + $0x190] sm:$0xff]  ;;  %v1533_v33 = vld [vmem:[%s2455_s26 + $0x1e8] sm:$0xff]  ;;  %v1535_v36 = vld [vmem:[%s2455_s26 + $0x1f8] sm:$0xff] }
  0x25   : > { %2123 = vmatprep.subr.bf16.mxu0 %v2393_v0  ;;  %v2256_v18 = vpack.c.bf16 %v1523_v17, %v1522_v16  ;;  %v1554_v39 = vld [vmem:[%s2455_s26 + $0x208] sm:$0xff]  ;;  %v1556_v42 = vld [vmem:[%s2455_s26 + $0x218] sm:$0xff]  ;;  %v1561_v61 = vld [vmem:[%s2455_s26 + $0x240] sm:$0xff] }
  0x26   : > { %v420_v45 = vld [vmem:[%s2577_s7 + $0x8] sm:$0xff]  ;;  %v426_v60 = vld [vmem:[%s2577_s7 + $0x38] sm:$0xff]  ;;  %v427_v8 = vld [vmem:[%s2577_s7 + $0x40] sm:$0xff] }
  0x27   : > { %v1558_v48 = vld [vmem:[%s2455_s26 + $0x228] sm:$0xff]  ;;  %v1564_v4 = vld [vmem:[%s2455_s26 + $0x258] sm:$0xff]  ;;  %v429_v14 = vld [vmem:[%s2577_s7 + $0x50] sm:$0xff] }
  0x28   : > { %2125 = vmatpush3.bf16.msra.mxu0 %v2124_v19  ;;  %v1524_v19 = vld [vmem:[%s2455_s26 + $0x1a0] sm:$0xff]  ;;  %v424_v54 = vld [vmem:[%s2577_s7 + $0x28] sm:$0xff]  ;;  %v1568_v13 = vld [vmem:[%s2455_s26 + $0x278] sm:$0xff] }
  0x29   : > { %2126 = vmatprep.subr.bf16.mxu0 %v2393_v0  ;;  %v2259_v21 = vpack.c.bf16 %v1525_v20, %v1524_v19  ;;  %v1566_v7 = vld [vmem:[%s2455_s26 + $0x268] sm:$0xff] }
  0x2a   : > { %v432_v19 = vld [vmem:[%s2577_s7 + $0x68] sm:$0xff] }
  0x2c   : > { %2128 = vmatpush3.bf16.msra.mxu0 %v2127_v22  ;;  %v1526_v22 = vld [vmem:[%s2455_s26 + $0x1b0] sm:$0xff] }
  0x2d   : > { %2129 = vmatprep.subr.bf16.mxu0 %v2393_v0  ;;  %v2262_v24 = vpack.c.bf16 %v1527_v23, %v1526_v22  ;;  %v434_v22 = vld [vmem:[%s2577_s7 + $0x78] sm:$0xff] }
  0x30   : > { %2131 = vmatpush3.bf16.msra.mxu0 %v2130_v25  ;;  %v1528_v25 = vld [vmem:[%s2455_s26 + $0x1c0] sm:$0xff] }
  0x31   : > { %2156 = vmatprep.subr.bf16.mxu0 %v2393_v0  ;;  %v2265_v27 = vpack.c.bf16 %v1529_v26, %v1528_v25 }
  0x33   : > { %1791 = vmatmul.mubr.f32.vlgmr.msra.gmra.mrb[0].mxu0 %v2485_v28 }
  0x34   : > { %2158 = vmatpush3.bf16.msra.mxu0 %v2157_v29  ;;  %1860 = vmatprep.mubr.msk.f32.mxu0 %vm2394_vm0, %v2395_v1  ;;  %v1530_v29 = vld [vmem:[%s2455_s26 + $0x1d0] sm:$0xff] }
  0x35   : > { %2159 = vmatprep.subr.bf16.mxu0 %v2393_v0  ;;  %v2268_v31 = vpack.c.bf16 %v1531_v30, %v1530_v29 }
  0x38   : > { %2161 = vmatpush3.bf16.msra.mxu0 %v2160_v32  ;;  %v1532_v32 = vld [vmem:[%s2455_s26 + $0x1e0] sm:$0xff] }
  0x39   : > { %2162 = vmatprep.subr.bf16.mxu0 %v2393_v0  ;;  %v2271_v34 = vpack.c.bf16 %v1533_v33, %v1532_v32  ;;  %v2396_v32 = vmov 0  }
  0x3a   : > { %2362 = vset.pattern.permute.xlu0 %v2396_v32  ;;  %2363 = vset.pattern.permute.xlu1 %v2396_v32 }
  0x3c   : > { %2164 = vmatpush3.bf16.msra.mxu0 %v2163_v35  ;;  %v1534_v35 = vld [vmem:[%s2455_s26 + $0x1f0] sm:$0xff] }
  0x3d   : > { %2165 = vmatprep.subr.bf16.mxu0 %v2393_v0  ;;  %v2274_v37 = vpack.c.bf16 %v1535_v36, %v1534_v35 }
  0x40   : > { %2167 = vmatpush3.bf16.msra.mxu0 %v2166_v38  ;;  %v1553_v38 = vld [vmem:[%s2455_s26 + $0x200] sm:$0xff] }
  0x41   : > { %2168 = vmatprep.subr.bf16.mxu0 %v2393_v0  ;;  %v2301_v40 = vpack.c.bf16 %v1554_v39, %v1553_v38 }
  0x44   : > { %2170 = vmatpush3.bf16.msra.mxu0 %v2169_v41  ;;  %v1555_v41 = vld [vmem:[%s2455_s26 + $0x210] sm:$0xff] }
  0x45   : > { %2171 = vmatprep.subr.bf16.mxu0 %v2393_v0  ;;  %v2304_v43 = vpack.c.bf16 %v1556_v42, %v1555_v41 }
  0x48   : > { %2173 = vmatpush3.bf16.msra.mxu0 %v2172_v44  ;;  %v419_v44 = vld [vmem:[%s2577_s7] sm:$0xff] }
  0x49   : > { %2174 = vmatprep.subr.bf16.mxu0 %v2393_v0  ;;  %v2133_v49 = vpack.c.bf16 %v420_v45, %v419_v44 }
  0x4b   : > { %2134 = vmatpush3.bf16.msra.mxu1 %v2133_v49 }
  0x4c   : > { %2176 = vmatpush3.bf16.msra.mxu0 %v2175_v47  ;;  %v1557_v47 = vld [vmem:[%s2455_s26 + $0x220] sm:$0xff]  ;;  %2135 = vmatprep.subr.bf16.mxu1 %v2393_v0 }
  0x4d   : > { %2177 = vmatprep.subr.bf16.mxu0 %v2393_v0  ;;  %v2307_v52 = vpack.c.bf16 %v1558_v48, %v1557_v47 }
  0x50   : > { %2179 = vmatpush3.bf16.msra.mxu0 %v2178_v50  ;;  %v422_v50 = vld [vmem:[%s2577_s7 + $0x18] sm:$0xff] }
  0x51   : > { %2204 = vmatprep.subr.bf16.mxu0 %v2393_v0  ;;  %v2136_v51 = vpack.c.bf16 %v422_v50, %v421_v46 }
  0x53   : > { %1861 = vmatmul.mubr.f32.vlgmr.msra.gmra.mrb[2].mxu0 %v2485_v28  ;;  %2137 = vmatpush3.bf16.msra.mxu1 %v2136_v51 }
  0x54   : > { %2206 = vmatpush3.bf16.msra.mxu0 %v2205_v53  ;;  %1930 = vmatprep.mubr.msk.f32.mxu0 %vm2394_vm0, %v2395_v1  ;;  %v423_v53 = vld [vmem:[%s2577_s7 + $0x20] sm:$0xff] }
  0x55   : > { %2207 = vmatprep.subr.bf16.mxu0 %v2393_v0  ;;  %v2139_v57 = vpack.c.bf16 %v424_v54, %v423_v53  ;;  %2138 = vmatprep.subr.bf16.mxu1 %v2393_v0  ;;  %v1486_v54 = vld [vmem:[%s2810_s5 + $0x8] sm:$0xff] }
  0x57   : > { %2140 = vmatpush3.bf16.msra.mxu1 %v2139_v57 }
  0x58   : > { %2209 = vmatpush3.bf16.msra.mxu0 %v2208_v56  ;;  %v1560_v56 = vld [vmem:[%s2455_s26 + $0x238] sm:$0xff]  ;;  %2141 = vmatprep.subr.bf16.mxu1 %v2393_v0 }
  0x59   : > { %2210 = vmatprep.subr.bf16.mxu0 %v2393_v0  ;;  %v2310_v58 = vpack.c.bf16 %v1560_v56, %v1559_v55 }
  0x5c   : > { %2212 = vmatpush3.bf16.msra.mxu0 %v2211_v59  ;;  %v425_v59 = vld [vmem:[%s2577_s7 + $0x30] sm:$0xff] }
  0x5d   : > { %2213 = vmatprep.subr.bf16.mxu0 %v2393_v0  ;;  %v2142_v63 = vpack.c.bf16 %v426_v60, %v425_v59 }
  0x5f   : > { %2143 = vmatpush3.bf16.msra.mxu1 %v2142_v63 }
  0x60   : > { %2215 = vmatpush3.bf16.msra.mxu0 %v2214_v62  ;;  %v1562_v62 = vld [vmem:[%s2455_s26 + $0x248] sm:$0xff]  ;;  %2144 = vmatprep.subr.bf16.mxu1 %v2393_v0 }
  0x61   : > { %2216 = vmatprep.subr.bf16.mxu0 %v2393_v0  ;;  %v2313_v2 = vpack.c.bf16 %v1562_v62, %v1561_v61  ;;  %v1470_v61 = vld [vmem:[%s2577_s7 + $0x80] sm:$0xff]  ;;  %v1471_v62 = vld [vmem:[%s2577_s7 + $0x88] sm:$0xff] }
  0x64   : > { %2218 = vmatpush3.bf16.msra.mxu0 %v2217_v3  ;;  %v1563_v3 = vld [vmem:[%s2455_s26 + $0x250] sm:$0xff] }
  0x65   : > { %2219 = vmatprep.subr.bf16.mxu0 %v2393_v0  ;;  %v2316_v5 = vpack.c.bf16 %v1564_v4, %v1563_v3  ;;  %v2181_v3 = vpack.c.bf16 %v1471_v62, %v1470_v61 }
  0x68   : > { %2221 = vmatpush3.bf16.msra.mxu0 %v2220_v6  ;;  %v1565_v6 = vld [vmem:[%s2455_s26 + $0x260] sm:$0xff] }
  0x69   : > { %2222 = vmatprep.subr.bf16.mxu0 %v2393_v0  ;;  %v2319_v11 = vpack.c.bf16 %v1566_v7, %v1565_v6  ;;  %v1473_v6 = vld [vmem:[%s2577_s7 + $0x98] sm:$0xff] }
  0x6c   : > { %2224 = vmatpush3.bf16.msra.mxu0 %v2223_v9  ;;  %v428_v9 = vld [vmem:[%s2577_s7 + $0x48] sm:$0xff] }
  0x6d   : > { %2225 = vmatprep.subr.bf16.mxu0 %v2393_v0  ;;  %v2145_v10 = vpack.c.bf16 %v428_v9, %v427_v8  ;;  %v1519_v8 = vld [vmem:[%s2810_s5 + $0x10] sm:$0xff]  ;;  %v1585_v9 = vld [vmem:[%s2810_s5 + $0x20] sm:$0xff] }
  0x6e   : > { %935 = vperm.xlu1 %2363, %v1519_v8  }
  0x6f   : > { %2146 = vmatpush3.bf16.msra.mxu1 %v2145_v10 }
  0x70   : > { %2227 = vmatpush3.bf16.msra.mxu0 %v2226_v12  ;;  %v1567_v12 = vld [vmem:[%s2455_s26 + $0x270] sm:$0xff]  ;;  %2147 = vmatprep.subr.bf16.mxu1 %v2393_v0 }
  0x71   : > { %2252 = vmatprep.subr.bf16.mxu0 %v2393_v0  ;;  %v2322_v17 = vpack.c.bf16 %v1568_v13, %v1567_v12  ;;  %v1475_v12 = vld [vmem:[%s2577_s7 + $0xa8] sm:$0xff] }
  0x73   : > { %1931 = vmatmul.mubr.f32.vlgmr.msra.gmra.mrb[4].mxu0 %v2485_v28 }
  0x74   : > { %2254 = vmatpush3.bf16.msra.mxu0 %v2253_v15  ;;  %2000 = vmatprep.mubr.msk.f32.mxu0 %vm2394_vm0, %v2395_v1  ;;  %v430_v15 = vld [vmem:[%s2577_s7 + $0x58] sm:$0xff] }
  0x75   : > { %2255 = vmatprep.subr.bf16.mxu0 %v2393_v0  ;;  %v2148_v16 = vpack.c.bf16 %v430_v15, %v429_v14  ;;  %v1552_v15 = vld [vmem:[%s2810_s5 + $0x18] sm:$0xff] }
  0x76   : > { %1145 = vperm.xlu1 %2363, %v1552_v15  }
  0x77   : > { %2149 = vmatpush3.bf16.msra.mxu1 %v2148_v16 }
  0x78   : > { %2257 = vmatpush3.bf16.msra.mxu0 %v2256_v18  ;;  %2150 = vmatprep.subr.bf16.mxu1 %v2393_v0  ;;  %v431_v18 = vld [vmem:[%s2577_s7 + $0x60] sm:$0xff] }
  0x79   : > { %2258 = vmatprep.subr.bf16.mxu0 %v2393_v0  ;;  %v2151_v20 = vpack.c.bf16 %v432_v19, %v431_v18  ;;  %v1476_v19 = vld [vmem:[%s2577_s7 + $0xb0] sm:$0xff] }
  0x7b   : > { %2152 = vmatpush3.bf16.msra.mxu1 %v2151_v20  ;;  %v1477_v20 = vld [vmem:[%s2577_s7 + $0xb8] sm:$0xff] }
  0x7c   : > { %2260 = vmatpush3.bf16.msra.mxu0 %v2259_v21  ;;  %2153 = vmatprep.subr.bf16.mxu1 %v2393_v0  ;;  %v433_v21 = vld [vmem:[%s2577_s7 + $0x70] sm:$0xff] }
  0x7d   : > { %2261 = vmatprep.subr.bf16.mxu0 %v2393_v0  ;;  %v2154_v23 = vpack.c.bf16 %v434_v22, %v433_v21 }
  0x7f   : > { %2155 = vmatpush3.bf16.msra.mxu1 %v2154_v23  ;;  %v2190_v23 = vpack.c.bf16 %v1477_v20, %v1476_v19 }
  0x80   : > { %2263 = vmatpush3.bf16.msra.mxu0 %v2262_v24  ;;  %2180 = vmatprep.subr.bf16.mxu1 %v2393_v0  ;;  %v2629_v24 = vld [vmem:[%s285_s10] ss:$0 sm:$0xff] }
  0x81   : > { %2264 = vmatprep.subr.bf16.mxu0 %v2393_v0 }
  0x84   : > { %2266 = vmatpush3.bf16.msra.mxu0 %v2265_v27 }
  0x85   : > { %2267 = vmatprep.subr.bf16.mxu0 %v2393_v0 }
  0x88   : > { %2269 = vmatpush3.bf16.msra.mxu0 %v2268_v31 }
  0x89   : > { %2270 = vmatprep.subr.bf16.mxu0 %v2393_v0 }
  0x8c   : > { %2272 = vmatpush3.bf16.msra.mxu0 %v2271_v34 }
  0x8d   : > { %2273 = vmatprep.subr.bf16.mxu0 %v2393_v0 }
  0x90   : > { %2275 = vmatpush3.bf16.msra.mxu0 %v2274_v37 }
  0x91   : > { %2300 = vmatprep.subr.bf16.mxu0 %v2393_v0 }
  0x93   : > { %2001 = vmatmul.mubr.f32.vlgmr.msra.gmra.mrb[6].mxu0 %v2485_v28 }
  0x94   : > { %2302 = vmatpush3.bf16.msra.mxu0 %v2301_v40  ;;  %2070 = vmatprep.mubr.msk.f32.mxu0 %vm2394_vm0, %v2395_v1 }
  0x95   : > { %2303 = vmatprep.subr.bf16.mxu0 %v2393_v0 }
  0x98   : > { %2305 = vmatpush3.bf16.msra.mxu0 %v2304_v43 }
  0x99   : > { %2306 = vmatprep.subr.bf16.mxu0 %v2393_v0 }
  0x9c   : > { %2308 = vmatpush3.bf16.msra.mxu0 %v2307_v52 }
  0x9d   : > { %2309 = vmatprep.subr.bf16.mxu0 %v2393_v0 }
  0xa0   : > { %2311 = vmatpush3.bf16.msra.mxu0 %v2310_v58  ;;  %v2397_v58 = vmov -1.0  }
  0xa1   : > { %2312 = vmatprep.subr.bf16.mxu0 %v2393_v0 }
  0xa4   : > { %2314 = vmatpush3.bf16.msra.mxu0 %v2313_v2 }
  0xa5   : > { %2315 = vmatprep.subr.bf16.mxu0 %v2393_v0 }
  0xa8   : > { %2317 = vmatpush3.bf16.msra.mxu0 %v2316_v5  ;;  %v1472_v5 = vld [vmem:[%s2577_s7 + $0x90] sm:$0xff] }
  0xa9   : > { %2318 = vmatprep.subr.bf16.mxu0 %v2393_v0  ;;  %v2184_v10 = vpack.c.bf16 %v1473_v6, %v1472_v5  ;;  %v1508_v5 = vld [vmem:[%s2577_s7 + $0x128] sm:$0xff] }
  0xac   : > { %2320 = vmatpush3.bf16.msra.mxu0 %v2319_v11  ;;  %v1474_v11 = vld [vmem:[%s2577_s7 + $0xa0] sm:$0xff] }
  0xad   : > { %2321 = vmatprep.subr.bf16.mxu0 %v2393_v0 }
  0xb0   : > { %2323 = vmatpush3.bf16.msra.mxu0 %v2322_v17  ;;  %v2187_v17 = vpack.c.bf16 %v1475_v12, %v1474_v11  ;;  %v1509_v11 = vld [vmem:[%s2577_s7 + $0x130] sm:$0xff]  ;;  %v1510_v12 = vld [vmem:[%s2577_s7 + $0x138] sm:$0xff] }
  0xb1   : > { %v2238_v15 = vpack.c.bf16 %v1510_v12, %v1509_v11 }
  0xb3   : > { %2071 = vmatmul.mubr.f32.vlgmr.msra.gmra.mrb[8].mxu0 %v2485_v28  ;;  %v512_v28 = vld [vmem:[%s2810_s5] sm:$0xff] }
  0xb4   : > { %515 = vperm.xlu0 %2362, %v512_v28   ;;  %v1480_v28 = vld [vmem:[%s2577_s7 + $0xd0] sm:$0xff] }
  0xb8   : > { %725 = vperm.xlu0 %2362, %v1486_v54  }
  0xbc   : > { %1355 = vperm.xlu0 %2362, %v1585_v9  }
 0x106   : > { %v388_v25 = vpop.f32.mrb[0].mxu0 }
 0x107   : > { %v389_v26 = vadd.f32 %v2629_v24, %v388_v25  ;;  %v1792_v27 = vpop.f32.mrb[1].mxu0 }
 0x108   : > { %v1479_v27 = vld [vmem:[%s2577_s7 + $0xc8] sm:$0xff] }
 0x109   : > { %v393_v29 = vmul.f32 0.70710677, %v389_v26  ;;  %v392_v63 = vmul.f32 0.5, %v389_v26  ;;  %v1478_v26 = vld [vmem:[%s2577_s7 + $0xc0] sm:$0xff] }
 0x10b   : > { %v396_v30 = vand.u32 2147483647, %v393_v29  ;;  %vm394_vm1 = vcmp.ge.f32.partialorder %v393_v29, 0.0 }
 0x10c   : > { %v395_v59 = vsel %vm394_vm1, 1.0, %v2397_v58 }
 0x10d   : > { %v397_v31 = vmul.f32 0.3275911, %v396_v30  ;;  %v410_v34 = vsub.f32 0.0, %v396_v30 }
 0x10f   : > { %v398_v33 = vadd.f32 1.0, %v397_v31  ;;  %v411_v36 = vmul.f32 %v410_v34, %v396_v30  ;;  %v2193_v30 = vpack.c.bf16 %v1479_v27, %v1478_v26 }
 0x111   : > { %2364 = vrcp.f32 %v398_v33  ;;  %v412_v39 = vmul.f32 1.442695, %v411_v36  ;;  %v1481_v33 = vld [vmem:[%s2577_s7 + $0xd8] sm:$0xff] }
 0x113   : > { %2366 = vpow2.f32 %v412_v39 }
 0x11b   : > { %v2365_v35 = vpop.eup %2364 }
 0x11c   : > { %v401_v37 = vmul.f32 1.0614054, %v2365_v35 }
 0x11d   : > { %v2367_v52 = vpop.eup %2366 }
 0x11e   : > { %v402_v38 = vadd.f32 -1.4531521, %v401_v37 }
 0x120   : > { %v403_v40 = vmul.f32 %v2365_v35, %v402_v38  ;;  %v2196_v38 = vpack.c.bf16 %v1481_v33, %v1480_v28  ;;  %v1515_v28 = vld [vmem:[%s2577_s7 + $0x160] sm:$0xff]  ;;  %v1516_v33 = vld [vmem:[%s2577_s7 + $0x168] sm:$0xff] }
 0x122   : > { %v404_v41 = vadd.f32 1.4214138, %v403_v40  ;;  %v1482_v40 = vld [vmem:[%s2577_s7 + $0xe0] sm:$0xff] }
 0x124   : > { %v405_v42 = vmul.f32 %v2365_v35, %v404_v41  ;;  %v1483_v41 = vld [vmem:[%s2577_s7 + $0xe8] sm:$0xff] }
 0x126   : > { %v603_v43 = vpop.f32.mrb[2].mxu0  ;;  %v406_v44 = vadd.f32 -0.28449672, %v405_v42 }
 0x127   : > { %v2636_v45 = vadd.f32 %v2629_v24, %v603_v43  ;;  %v1862_v46 = vpop.f32.mrb[3].mxu0 }
 0x128   : > { %v407_v47 = vmul.f32 %v2365_v35, %v406_v44 }
 0x129   : > { %v2639_v48 = vmul.f32 0.70710677, %v2636_v45 }
 0x12a   : > { %v408_v49 = vadd.f32 0.2548296, %v407_v47  ;;  %v2199_v47 = vpack.c.bf16 %v1483_v41, %v1482_v40  ;;  %v2247_v40 = vpack.c.bf16 %v1516_v33, %v1515_v28  ;;  %v1550_v33 = vld [vmem:[%s2577_s7 + $0x1f0] sm:$0xff] }
 0x12b   : > { %v611_v50 = vand.u32 2147483647, %v2639_v48  ;;  %vm609_vm2 = vcmp.ge.f32.partialorder %v2639_v48, 0.0  ;;  %v1504_v48 = vld [vmem:[%s2577_s7 + $0x108] sm:$0xff] }
 0x12c   : > { %v409_v51 = vmul.f32 %v2365_v35, %v408_v49  ;;  %v610_v54 = vsel %vm609_vm2, 1.0, %v2397_v58 }
 0x12d   : > { %v612_v53 = vmul.f32 0.3275911, %v611_v50  ;;  %v625_v7 = vsub.f32 0.0, %v611_v50 }
 0x12e   : > { %v414_v55 = vmul.f32 %v2367_v52, %v409_v51  ;;  %v1485_v51 = vld [vmem:[%s2577_s7 + $0xf8] sm:$0xff] }
 0x12f   : > { %v613_v56 = vadd.f32 1.0, %v612_v53  ;;  %v626_v14 = vmul.f32 %v625_v7, %v611_v50  ;;  %v1484_v50 = vld [vmem:[%s2577_s7 + $0xf0] sm:$0xff] }
 0x130   : > { %v415_v57 = vsub.f32 1.0, %v414_v55  ;;  %v2202_v55 = vpack.c.bf16 %v1485_v51, %v1484_v50  ;;  %v1536_v51 = vld [vmem:[%s2577_s7 + $0x180] sm:$0xff] }
 0x131   : > { %2368 = vrcp.f32 %v613_v56  ;;  %v627_v21 = vmul.f32 1.442695, %v626_v14 }
 0x132   : > { %v416_v60 = vmul.f32 %v415_v57, %v395_v59  ;;  %v1503_v57 = vld [vmem:[%s2577_s7 + $0x100] sm:$0xff]  ;;  %v607_v59 = vmul.f32 0.5, %v2636_v45 }
 0x133   : > { %2370 = vpow2.f32 %v627_v21  ;;  %v2229_v61 = vpack.c.bf16 %v1504_v48, %v1503_v57  ;;  %v1507_v45 = vld [vmem:[%s2577_s7 + $0x120] sm:$0xff]  ;;  %v1539_v57 = vld [vmem:[%s2577_s7 + $0x198] sm:$0xff] }
 0x134   : > { %v417_v2 = vadd.f32 1.0, %v416_v60  ;;  %v2235_v9 = vpack.c.bf16 %v1508_v5, %v1507_v45  ;;  %v1543_v45 = vld [vmem:[%s2577_s7 + $0x1b8] sm:$0xff] }
 0x136   : > { %v418_v4 = vmul.f32 %v417_v2, %v392_v63  ;;  %v1505_v63 = vld [vmem:[%s2577_s7 + $0x110] sm:$0xff]  ;;  %v1506_v2 = vld [vmem:[%s2577_s7 + $0x118] sm:$0xff] }
 0x138   : > { %1826 = vmatmul.mubr.f32.vlgmr.msra.gmra.mrb[0].mxu1 %v418_v4  ;;  %v2232_v4 = vpack.c.bf16 %v1506_v2, %v1505_v63 }
 0x139   : > { %2182 = vmatpush3.bf16.msra.mxu1 %v2181_v3  ;;  %1895 = vmatprep.mubr.msk.f32.mxu1 %vm2394_vm0, %v2395_v1 }
 0x13a   : > { %2183 = vmatprep.subr.bf16.mxu1 %v2393_v0 }
 0x13b   : > { %v2369_v13 = vpop.eup %2368 }
 0x13c   : > { %v616_v16 = vmul.f32 1.0614054, %v2369_v13 }
 0x13d   : > { %2185 = vmatpush3.bf16.msra.mxu1 %v2184_v10  ;;  %v2371_v44 = vpop.eup %2370 }
 0x13e   : > { %v617_v18 = vadd.f32 -1.4531521, %v616_v16  ;;  %2186 = vmatprep.subr.bf16.mxu1 %v2393_v0 }
 0x140   : > { %v618_v22 = vmul.f32 %v2369_v13, %v617_v18  ;;  %v1512_v18 = vld [vmem:[%s2577_s7 + $0x148] sm:$0xff] }
 0x141   : > { %2188 = vmatpush3.bf16.msra.mxu1 %v2187_v17  ;;  %v1511_v17 = vld [vmem:[%s2577_s7 + $0x140] sm:$0xff] }
 0x142   : > { %v619_v25 = vadd.f32 1.4214138, %v618_v22  ;;  %2189 = vmatprep.subr.bf16.mxu1 %v2393_v0  ;;  %v2241_v20 = vpack.c.bf16 %v1512_v18, %v1511_v17 }
 0x144   : > { %v620_v29 = vmul.f32 %v2369_v13, %v619_v25  ;;  %v1514_v25 = vld [vmem:[%s2577_s7 + $0x158] sm:$0xff] }
 0x145   : > { %2191 = vmatpush3.bf16.msra.mxu1 %v2190_v23  ;;  %v1513_v23 = vld [vmem:[%s2577_s7 + $0x150] sm:$0xff] }
 0x146   : > { %v621_v31 = vadd.f32 -0.28449672, %v620_v29  ;;  %v813_v32 = vpop.f32.mrb[4].mxu0  ;;  %2192 = vmatprep.subr.bf16.mxu1 %v2393_v0 }
 0x147   : > { %v2674_v34 = vadd.f32 %v2629_v24, %v813_v32  ;;  %v1932_v35 = vpop.f32.mrb[5].mxu0 }
 0x148   : > { %v622_v36 = vmul.f32 %v2369_v13, %v621_v31  ;;  %v2244_v31 = vpack.c.bf16 %v1514_v25, %v1513_v23  ;;  %v1548_v23 = vld [vmem:[%s2577_s7 + $0x1e0] sm:$0xff]  ;;  %v1549_v25 = vld [vmem:[%s2577_s7 + $0x1e8] sm:$0xff] }
 0x149   : > { %v2677_v37 = vmul.f32 0.70710677, %v2674_v34  ;;  %2194 = vmatpush3.bf16.msra.mxu1 %v2193_v30 }
 0x14a   : > { %v623_v39 = vadd.f32 0.2548296, %v622_v36  ;;  %2195 = vmatprep.subr.bf16.mxu1 %v2393_v0 }
 0x14b   : > { %v821_v42 = vand.u32 2147483647, %v2677_v37  ;;  %vm819_vm3 = vcmp.ge.f32.partialorder %v2677_v37, 0.0  ;;  %v1537_v37 = vld [vmem:[%s2577_s7 + $0x188] sm:$0xff] }
 0x14c   : > { %v624_v43 = vmul.f32 %v2369_v13, %v623_v39 }
 0x14d   : > { %v822_v46 = vmul.f32 0.3275911, %v821_v42  ;;  %2197 = vmatpush3.bf16.msra.mxu1 %v2196_v38  ;;  %v835_v3 = vsub.f32 0.0, %v821_v42 }
 0x14e   : > { %v629_v49 = vmul.f32 %v2371_v44, %v624_v43  ;;  %2198 = vmatprep.subr.bf16.mxu1 %v2393_v0  ;;  %v1518_v43 = vld [vmem:[%s2577_s7 + $0x178] sm:$0xff] }
 0x14f   : > { %v823_v52 = vadd.f32 1.0, %v822_v46  ;;  %v836_v7 = vmul.f32 %v835_v3, %v821_v42  ;;  %v1517_v42 = vld [vmem:[%s2577_s7 + $0x170] sm:$0xff] }
 0x150   : > { %v630_v53 = vsub.f32 1.0, %v629_v49  ;;  %v2250_v49 = vpack.c.bf16 %v1518_v43, %v1517_v42  ;;  %v1569_v42 = vld [vmem:[%s2577_s7 + $0x200] sm:$0xff] }
 0x151   : > { %2372 = vrcp.f32 %v823_v52  ;;  %2200 = vmatpush3.bf16.msra.mxu1 %v2199_v47  ;;  %v837_v13 = vmul.f32 1.442695, %v836_v7  ;;  %v820_v47 = vsel %vm819_vm3, 1.0, %v2397_v58  ;;  %v817_v52 = vmul.f32 0.5, %v2674_v34  ;;  %v1540_v34 = vld [vmem:[%s2577_s7 + $0x1a0] sm:$0xff] }
 0x152   : > { %v631_v56 = vmul.f32 %v630_v53, %v610_v54  ;;  %2201 = vmatprep.subr.bf16.mxu1 %v2393_v0  ;;  %v2277_v54 = vpack.c.bf16 %v1537_v37, %v1536_v51 }
 0x153   : > { %2374 = vpow2.f32 %v837_v13 }
 0x154   : > { %v632_v60 = vadd.f32 1.0, %v631_v56  ;;  %v1538_v56 = vld [vmem:[%s2577_s7 + $0x190] sm:$0xff] }
 0x155   : > { %2203 = vmatpush3.bf16.msra.mxu1 %v2202_v55 }
 0x156   : > { %v633_v62 = vmul.f32 %v632_v60, %v607_v59  ;;  %2228 = vmatprep.subr.bf16.mxu1 %v2393_v0  ;;  %v2280_v59 = vpack.c.bf16 %v1539_v57, %v1538_v56  ;;  %v1541_v60 = vld [vmem:[%s2577_s7 + $0x1a8] sm:$0xff] }
 0x157   : > { %v2283_v2 = vpack.c.bf16 %v1541_v60, %v1540_v34 }
 0x158   : > { %1896 = vmatmul.mubr.f32.vlgmr.msra.gmra.mrb[2].mxu1 %v633_v62 }
 0x159   : > { %2230 = vmatpush3.bf16.msra.mxu1 %v2229_v61  ;;  %1965 = vmatprep.mubr.msk.f32.mxu1 %vm2394_vm0, %v2395_v1 }
 0x15a   : > { %2231 = vmatprep.subr.bf16.mxu1 %v2393_v0 }
 0x15b   : > { %v2373_v6 = vpop.eup %2372 }
 0x15c   : > { %v826_v8 = vmul.f32 1.0614054, %v2373_v6 }
 0x15d   : > { %2233 = vmatpush3.bf16.msra.mxu1 %v2232_v4  ;;  %v2375_v38 = vpop.eup %2374  ;;  %v1542_v4 = vld [vmem:[%s2577_s7 + $0x1b0] sm:$0xff] }
 0x15e   : > { %v827_v10 = vadd.f32 -1.4531521, %v826_v8  ;;  %2234 = vmatprep.subr.bf16.mxu1 %v2393_v0  ;;  %v2286_v7 = vpack.c.bf16 %v1543_v45, %v1542_v4  ;;  %v1579_v45 = vld [vmem:[%s2577_s7 + $0x250] sm:$0xff] }
 0x160   : > { %v828_v14 = vmul.f32 %v2373_v6, %v827_v10  ;;  %v1545_v10 = vld [vmem:[%s2577_s7 + $0x1c8] sm:$0xff] }
 0x161   : > { %2236 = vmatpush3.bf16.msra.mxu1 %v2235_v9  ;;  %v1544_v9 = vld [vmem:[%s2577_s7 + $0x1c0] sm:$0xff] }
 0x162   : > { %v829_v16 = vadd.f32 1.4214138, %v828_v14  ;;  %2237 = vmatprep.subr.bf16.mxu1 %v2393_v0  ;;  %v2289_v12 = vpack.c.bf16 %v1545_v10, %v1544_v9  ;;  %v1581_v9 = vld [vmem:[%s2577_s7 + $0x260] sm:$0xff]  ;;  %v1582_v10 = vld [vmem:[%s2577_s7 + $0x268] sm:$0xff] }
 0x164   : > { %v830_v19 = vmul.f32 %v2373_v6, %v829_v16  ;;  %v1547_v16 = vld [vmem:[%s2577_s7 + $0x1d8] sm:$0xff] }
 0x165   : > { %2239 = vmatpush3.bf16.msra.mxu1 %v2238_v15  ;;  %v1546_v15 = vld [vmem:[%s2577_s7 + $0x1d0] sm:$0xff] }
 0x166   : > { %v831_v21 = vadd.f32 -0.28449672, %v830_v19  ;;  %v1023_v22 = vpop.f32.mrb[6].mxu0  ;;  %2240 = vmatprep.subr.bf16.mxu1 %v2393_v0 }
 0x167   : > { %v2710_v26 = vadd.f32 %v2629_v24, %v1023_v22  ;;  %v2002_v27 = vpop.f32.mrb[7].mxu0 }
 0x168   : > { %v832_v29 = vmul.f32 %v2373_v6, %v831_v21  ;;  %v2292_v21 = vpack.c.bf16 %v1547_v16, %v1546_v15  ;;  %v1583_v15 = vld [vmem:[%s2577_s7 + $0x270] sm:$0xff]  ;;  %v1584_v16 = vld [vmem:[%s2577_s7 + $0x278] sm:$0xff] }
 0x169   : > { %v2713_v30 = vmul.f32 0.70710677, %v2710_v26  ;;  %2242 = vmatpush3.bf16.msra.mxu1 %v2241_v20  ;;  %v1027_v43 = vmul.f32 0.5, %v2710_v26  ;;  %v1573_v26 = vld [vmem:[%s2577_s7 + $0x220] sm:$0xff] }
 0x16a   : > { %v833_v32 = vadd.f32 0.2548296, %v832_v29  ;;  %2243 = vmatprep.subr.bf16.mxu1 %v2393_v0 }
 0x16b   : > { %v1031_v35 = vand.u32 2147483647, %v2713_v30  ;;  %vm1029_vm4 = vcmp.ge.f32.partialorder %v2713_v30, 0.0  ;;  %v1570_v30 = vld [vmem:[%s2577_s7 + $0x208] sm:$0xff] }
 0x16c   : > { %v834_v36 = vmul.f32 %v2373_v6, %v833_v32  ;;  %v2295_v32 = vpack.c.bf16 %v1549_v25, %v1548_v23 }
 0x16d   : > { %v1032_v39 = vmul.f32 0.3275911, %v1031_v35  ;;  %2245 = vmatpush3.bf16.msra.mxu1 %v2244_v31  ;;  %v1045_v48 = vsub.f32 0.0, %v1031_v35 }
 0x16e   : > { %v839_v41 = vmul.f32 %v2375_v38, %v834_v36  ;;  %2246 = vmatprep.subr.bf16.mxu1 %v2393_v0 }
 0x16f   : > { %v1033_v44 = vadd.f32 1.0, %v1032_v39  ;;  %v1046_v62 = vmul.f32 %v1045_v48, %v1031_v35  ;;  %v1551_v35 = vld [vmem:[%s2577_s7 + $0x1f8] sm:$0xff]  ;;  %v1030_v39 = vsel %vm1029_vm4, 1.0, %v2397_v58  ;;  %v1575_v48 = vld [vmem:[%s2577_s7 + $0x230] sm:$0xff] }
 0x170   : > { %v840_v46 = vsub.f32 1.0, %v839_v41 }
 0x171   : > { %2376 = vrcp.f32 %v1033_v44  ;;  %2248 = vmatpush3.bf16.msra.mxu1 %v2247_v40  ;;  %v1047_v5 = vmul.f32 1.442695, %v1046_v62  ;;  %v2298_v40 = vpack.c.bf16 %v1551_v35, %v1550_v33  ;;  %v1577_v62 = vld [vmem:[%s2577_s7 + $0x240] sm:$0xff] }
 0x172   : > { %v841_v50 = vmul.f32 %v840_v46, %v820_v47  ;;  %2249 = vmatprep.subr.bf16.mxu1 %v2393_v0  ;;  %v2325_v46 = vpack.c.bf16 %v1570_v30, %v1569_v42 }
 0x173   : > { %2378 = vpow2.f32 %v1047_v5  ;;  %v1580_v5 = vld [vmem:[%s2577_s7 + $0x258] sm:$0xff] }
 0x174   : > { %v842_v53 = vadd.f32 1.0, %v841_v50  ;;  %v1572_v50 = vld [vmem:[%s2577_s7 + $0x218] sm:$0xff] }
 0x175   : > { %2251 = vmatpush3.bf16.msra.mxu1 %v2250_v49  ;;  %v1571_v49 = vld [vmem:[%s2577_s7 + $0x210] sm:$0xff] }
 0x176   : > { %v843_v55 = vmul.f32 %v842_v53, %v817_v52  ;;  %2276 = vmatprep.subr.bf16.mxu1 %v2393_v0  ;;  %v2328_v37 = vpack.c.bf16 %v1572_v50, %v1571_v49  ;;  %v1574_v52 = vld [vmem:[%s2577_s7 + $0x228] sm:$0xff] }
 0x177   : > { %v2331_v56 = vpack.c.bf16 %v1574_v52, %v1573_v26 }
 0x178   : > { %1966 = vmatmul.mubr.f32.vlgmr.msra.gmra.mrb[4].mxu1 %v843_v55 }
 0x179   : > { %2278 = vmatpush3.bf16.msra.mxu1 %v2277_v54  ;;  %2035 = vmatprep.mubr.msk.f32.mxu1 %vm2394_vm0, %v2395_v1 }
 0x17a   : > { %2279 = vmatprep.subr.bf16.mxu1 %v2393_v0 }
 0x17b   : > { %v2377_v61 = vpop.eup %2376 }
 0x17c   : > { %v1036_v63 = vmul.f32 1.0614054, %v2377_v61 }
 0x17d   : > { %2281 = vmatpush3.bf16.msra.mxu1 %v2280_v59  ;;  %v2379_v31 = vpop.eup %2378  ;;  %v1576_v59 = vld [vmem:[%s2577_s7 + $0x238] sm:$0xff] }
 0x17e   : > { %v1037_v3 = vadd.f32 -1.4531521, %v1036_v63  ;;  %2282 = vmatprep.subr.bf16.mxu1 %v2393_v0  ;;  %v2334_v60 = vpack.c.bf16 %v1576_v59, %v1575_v48  ;;  %v1578_v63 = vld [vmem:[%s2577_s7 + $0x248] sm:$0xff]  ;;  %s297_s7 = scalar_lea.vmem %s2811_s6, %s1451_s28 }
 0x180   : > { %v1038_v6 = vmul.f32 %v2377_v61, %v1037_v3  ;;  %v2337_v3 = vpack.c.bf16 %v1578_v63, %v1577_v62 }
 0x181   : > { %2284 = vmatpush3.bf16.msra.mxu1 %v2283_v2 }
 0x182   : > { %v1039_v8 = vadd.f32 1.4214138, %v1038_v6  ;;  %2285 = vmatprep.subr.bf16.mxu1 %v2393_v0 }
 0x184   : > { %v1040_v11 = vmul.f32 %v2377_v61, %v1039_v8 }
 0x185   : > { %2287 = vmatpush3.bf16.msra.mxu1 %v2286_v7  ;;  %v2340_v7 = vpack.c.bf16 %v1580_v5, %v1579_v45 }
 0x186   : > { %v1041_v13 = vadd.f32 -0.28449672, %v1040_v11  ;;  %v1233_v14 = vpop.f32.mrb[8].mxu0  ;;  %2288 = vmatprep.subr.bf16.mxu1 %v2393_v0 }
 0x187   : > { %v2746_v17 = vadd.f32 %v2629_v24, %v1233_v14  ;;  %v2072_v18 = vpop.f32.mrb[9].mxu0 }
 0x188   : > { %v1042_v19 = vmul.f32 %v2377_v61, %v1041_v13  ;;  %v2343_v13 = vpack.c.bf16 %v1582_v10, %v1581_v9 }
 0x189   : > { %v2749_v20 = vmul.f32 0.70710677, %v2746_v17  ;;  %2290 = vmatpush3.bf16.msra.mxu1 %v2289_v12  ;;  %v1237_v23 = vmul.f32 0.5, %v2746_v17  ;;  %v2384_v17 = vld [vmem:[%s2805_s0] sm:$0xff] }
 0x18a   : > { %v1043_v22 = vadd.f32 0.2548296, %v1042_v19  ;;  %2291 = vmatprep.subr.bf16.mxu1 %v2393_v0 }
 0x18b   : > { %v1241_v27 = vand.u32 2147483647, %v2749_v20  ;;  %vm1239_vm5 = vcmp.ge.f32.partialorder %v2749_v20, 0.0 }
 0x18c   : > { %v1044_v29 = vmul.f32 %v2377_v61, %v1043_v22  ;;  %v1240_v19 = vsel %vm1239_vm5, 1.0, %v2397_v58  ;;  %v516_v58 = vpop.permute.xlu0 %515 }
 0x18d   : > { %v1242_v24 = vmul.f32 0.3275911, %v1241_v27  ;;  %2293 = vmatpush3.bf16.msra.mxu1 %v2292_v21  ;;  %v1255_v51 = vsub.f32 0.0, %v1241_v27  ;;  %v2346_v21 = vpack.c.bf16 %v1584_v16, %v1583_v15 }
 0x18e   : > { %v1049_v28 = vmul.f32 %v2379_v31, %v1044_v29  ;;  %2294 = vmatprep.subr.bf16.mxu1 %v2393_v0  ;;  %v1453_v31 = vld [vmem:[%s293_s25] ss:$0 sm:$0xff] }
 0x18f   : > { %v1243_v36 = vadd.f32 1.0, %v1242_v24  ;;  %v1256_v54 = vmul.f32 %v1255_v51, %v1241_v27 }
 0x190   : > { %v1050_v38 = vsub.f32 1.0, %v1049_v28  ;;  %v726_v33 = vpop.permute.xlu0 %725 }
 0x191   : > { %2380 = vrcp.f32 %v1243_v36  ;;  %2296 = vmatpush3.bf16.msra.mxu1 %v2295_v32  ;;  %v1257_v34 = vmul.f32 1.442695, %v1256_v54 }
 0x192   : > { %v1051_v41 = vmul.f32 %v1050_v38, %v1030_v39  ;;  %2297 = vmatprep.subr.bf16.mxu1 %v2393_v0 }
 0x193   : > { %2382 = vpow2.f32 %v1257_v34 }
 0x194   : > { %v1052_v44 = vadd.f32 1.0, %v1051_v41  ;;  %v936_v41 = vpop.permute.xlu1 %935  ;;  %v1356_v54 = vpop.permute.xlu0 %1355 }
 0x195   : > { %2299 = vmatpush3.bf16.msra.mxu1 %v2298_v40 }
 0x196   : > { %v1053_v47 = vmul.f32 %v1052_v44, %v1027_v43  ;;  %2324 = vmatprep.subr.bf16.mxu1 %v2393_v0 }
 0x198   : > { %2036 = vmatmul.mubr.f32.vlgmr.msra.gmra.mrb[6].mxu1 %v1053_v47  ;;  %v1146_v47 = vpop.permute.xlu1 %1145 }
 0x199   : > { %2326 = vmatpush3.bf16.msra.mxu1 %v2325_v46  ;;  %2105 = vmatprep.mubr.msk.f32.mxu1 %vm2394_vm0, %v2395_v1 }
 0x19a   : > { %2327 = vmatprep.subr.bf16.mxu1 %v2393_v0 }
 0x19b   : > { %v2381_v53 = vpop.eup %2380 }
 0x19c   : > { %v1246_v55 = vmul.f32 1.0614054, %v2381_v53 }
 0x19d   : > { %2329 = vmatpush3.bf16.msra.mxu1 %v2328_v37  ;;  %v2383_v12 = vpop.eup %2382 }
 0x19e   : > { %v1247_v57 = vadd.f32 -1.4531521, %v1246_v55  ;;  %2330 = vmatprep.subr.bf16.mxu1 %v2393_v0 }
 0x1a0   : > { %v1248_v1 = vmul.f32 %v2381_v53, %v1247_v57 }
 0x1a1   : > { %2332 = vmatpush3.bf16.msra.mxu1 %v2331_v56 }
 0x1a2   : > { %v1249_v61 = vadd.f32 1.4214138, %v1248_v1  ;;  %2333 = vmatprep.subr.bf16.mxu1 %v2393_v0 }
 0x1a4   : > { %v1250_v2 = vmul.f32 %v2381_v53, %v1249_v61 }
 0x1a5   : > { %2335 = vmatpush3.bf16.msra.mxu1 %v2334_v60 }
 0x1a6   : > { %v1251_v4 = vadd.f32 -0.28449672, %v1250_v2  ;;  %2336 = vmatprep.subr.bf16.mxu1 %v2393_v0 }
 0x1a8   : > { %v1252_v6 = vmul.f32 %v2381_v53, %v1251_v4 }
 0x1a9   : > { %2338 = vmatpush3.bf16.msra.mxu1 %v2337_v3 }
 0x1aa   : > { %v1253_v8 = vadd.f32 0.2548296, %v1252_v6  ;;  %2339 = vmatprep.subr.bf16.mxu1 %v2393_v0 }
 0x1ac   : > { %v1254_v11 = vmul.f32 %v2381_v53, %v1253_v8 }
 0x1ad   : > { %2341 = vmatpush3.bf16.msra.mxu1 %v2340_v7 }
 0x1ae   : > { %v1259_v14 = vmul.f32 %v2383_v12, %v1254_v11  ;;  %2342 = vmatprep.subr.bf16.mxu1 %v2393_v0 }
 0x1b0   : > { %v1260_v18 = vsub.f32 1.0, %v1259_v14 }
 0x1b1   : > { %2344 = vmatpush3.bf16.msra.mxu1 %v2343_v13 }
 0x1b2   : > { %v1261_v22 = vmul.f32 %v1260_v18, %v1240_v19  ;;  %2345 = vmatprep.subr.bf16.mxu1 %v2393_v0 }
 0x1b4   : > { %v1262_v25 = vadd.f32 1.0, %v1261_v22 }
 0x1b5   : > { %2347 = vmatpush3.bf16.msra.mxu1 %v2346_v21 }
 0x1b6   : > { %v1263_v27 = vmul.f32 %v1262_v25, %v1237_v23 }
 0x1b8   : > { %2106 = vmatmul.mubr.f32.vlgmr.msra.gmra.mrb[8].mxu1 %v1263_v27 }
 0x20b   : > { %v508_v20 = vpop.f32.mrb[0].mxu1 }
 0x20c   : > { %v1827_v29 = vpop.f32.mrb[1].mxu1  ;;  %v509_v24 = vadd.f32 %v1453_v31, %v508_v20 }
 0x20e   : > { %v518_v32 = vmul.f32 %v516_v58, %v509_v24 }
 0x210   : > { %v519_v36 = vadd.f32 %v2384_v17, %v518_v32 }
 0x22b   : > { %v717_v28 = vpop.f32.mrb[2].mxu1 }
 0x22c   : > { %v718_v35 = vadd.f32 %v1453_v31, %v717_v28  ;;  %v1897_v0 = vpop.f32.mrb[3].mxu1 }
 0x22e   : > { %v728_v38 = vmul.f32 %v726_v33, %v718_v35 }
 0x230   : > { %v729_v39 = vadd.f32 %v728_v38, %v519_v36 }
 0x24b   : > { %v927_v40 = vpop.f32.mrb[4].mxu1 }
 0x24c   : > { %v928_v42 = vadd.f32 %v1453_v31, %v927_v40  ;;  %v1967_v30 = vpop.f32.mrb[5].mxu1 }
 0x24e   : > { %v938_v43 = vmul.f32 %v936_v41, %v928_v42 }
 0x250   : > { %v939_v44 = vadd.f32 %v938_v43, %v729_v39 }
 0x26b   : > { %v1137_v46 = vpop.f32.mrb[6].mxu1 }
 0x26c   : > { %v1138_v49 = vadd.f32 %v1453_v31, %v1137_v46  ;;  %v2037_v50 = vpop.f32.mrb[7].mxu1 }
 0x26e   : > { %v1148_v51 = vmul.f32 %v1146_v47, %v1138_v49 }
 0x270   : > { %v1149_v37 = vadd.f32 %v1148_v51, %v939_v44 }
 0x28b   : > { %v1347_v26 = vpop.f32.mrb[8].mxu1 }
 0x28c   : > { %v1348_v52 = vadd.f32 %v1453_v31, %v1347_v26  ;;  %v2107_v53 = vpop.f32.mrb[9].mxu1 }
 0x28e   : > { %v1358_v55 = vmul.f32 %v1356_v54, %v1348_v52 }
 0x290   : > { %v1359_v56 = vadd.f32 %v1358_v55, %v1149_v37 }
 0x292   : > { %1360 = vst [vmem:[%s297_s7] sm:$0xff] %v1359_v56 }
 0x293 PF: > { %s16_s21 = sadd.s32 1, %s2391_s21  }
 0x294   : > { %p13_p4 = scmp.ge.s32.totalorder %s16_s21, 4  }
 0x296   :  { %15 = sbr.rel (!%p13_p4) target bundleno = 1 (0x1), region = 95 }

// kernel: _lastv2_core.13
= control target key start
LH: loop header
LB: loop body
LE: loop exit
PB: predicated region body
PF: predicated region fallthrough
CT: control target
= control target key end

     0   :  { %s807_s18 = smov 0   ;;  %s871_s0 = inlined_call_operand.vmem [shape: f32[3,64,32], index: 0, kind: input, shape index: {}]   ;;  %s872_s1 = inlined_call_operand.vmem [shape: f32[3,32,8], index: 1, kind: input, shape index: {}]   ;;  %s873_s2 = inlined_call_operand.vmem [shape: f32[3,1,8], index: 2, kind: input, shape index: {}]   ;;  %s874_s3 = inlined_call_operand.vmem [shape: f32[3,1,8], index: 3, kind: input, shape index: {}]   ;;  %s875_s4 = inlined_call_operand.vmem [shape: f32[3,1,1], index: 4, kind: input, shape index: {}]   ;;  %s876_s5 = inlined_call_operand.vmem [shape: f32[3,64,1], index: 5, kind: output, shape index: {}]  }
   0x1 LB: > { %s650_s19 = sadd.s32 4294967295, %s775_s18   ;;  %p654_p0 = scmp.ge.s32.totalorder %s775_s18, 1  ;;  %s775_s18 = sphi %s807_s18, %s15_s18  }
   0x2   : > { %p221_p1 = scmp.lt.s32.totalorder %s775_s18, 4 }
   0x4   : > { %p222_p2 = pnand %p654_p0, %p221_p1 }
   0x5   : > { %p263_p3 = scmp.lt.s32.totalorder (!%p222_p2), %s650_s19, 2  ;;  %vm306_vm0 = vcmask (!%p222_p2), 261120   ;;  %vm459_vm1 = vcmask (!%p222_p2), 64512   ;;  %vm547_vm2 = vcmask (!%p222_p2), 7168  }
   0x6   : > { %225 = sbr.rel (%p222_p2) target bundleno = 433 (0x1b1), region = 40 }
   0xd   : > { %s878_s19 = smov (!%p263_p3, %s650_s19), 2 }
   0xe   : > { %s683_s20 = sshll.u32 %s878_s19, 5  ;;  %s682_s21 = sshll.u32 %s878_s19, 6 }
   0xf   : > { %s272_s24 = scalar_lea.vmem %s872_s1, %s683_s20  ;;  %s267_s27 = scalar_lea.vmem %s871_s0, %s682_s21 }
  0x10   : > { %v295_v0 = vld [vmem:[%s272_s24] sm:$0xff]  ;;  %v296_v1 = vld [vmem:[%s272_s24 + $0x8] sm:$0xff]  ;;  %v297_v2 = vld [vmem:[%s272_s24 + $0x10] sm:$0xff]  ;;  %s275_s30 = scalar_lea.vmem %s873_s2, %s878_s19  ;;  %s278_s8 = scalar_lea.vmem %s874_s3, %s878_s19 }
  0x11   : > { %v717_v3 = vpack.c.bf16 %v296_v1, %v295_v0  ;;  %v298_v4 = vld [vmem:[%s272_s24 + $0x18] sm:$0xff]  ;;  %v287_v5 = vld [vmem:[%s267_s27] sm:$0xff]  ;;  %v288_v8 = vld [vmem:[%s267_s27 + $0x8] sm:$0xff]  ;;  %s281_s11 = scalar_lea.vmem %s875_s4, %s878_s19  ;;  %s286_s14 = scalar_lea.vmem %s876_s5, %s682_s21 }
  0x12   : > { %v291_v6 = vld [vmem:[%s267_s27 + $0x20] sm:$0xff]  ;;  %v721_v7 = vpack.c.bf16 %v298_v4, %v297_v2  ;;  %705 = vmatprep.mubr.msk.f32.mxu0 %vm306_vm0, %v287_v5  ;;  %v292_v9 = vld [vmem:[%s267_s27 + $0x28] sm:$0xff]  ;;  %v289_v10 = vld [vmem:[%s267_s27 + $0x10] sm:$0xff] }
  0x13   : > { %711 = vmatprep.mubr.msk.f32.mxu1 %vm306_vm0, %v291_v6  ;;  %718 = vmatprep.subr.bf16.mxu0 %v717_v3  ;;  %v293_v11 = vld [vmem:[%s267_s27 + $0x30] sm:$0xff]  ;;  %v290_v12 = vld [vmem:[%s267_s27 + $0x18] sm:$0xff]  ;;  %v661_v14 = vld [vmem:[%s275_s30] ss:$0 sm:$0xff] }
  0x14   : > { %725 = vmatprep.subr.bf16.mxu1 %v717_v3  ;;  %720 = vmatpush3.bf16.msra.mxu0 %v717_v3  ;;  %v294_v13 = vld [vmem:[%s267_s27 + $0x38] sm:$0xff]  ;;  %v670_v23 = vld [vmem:[%s278_s8] ss:$0 sm:$0xff] }
  0x15   : > { %727 = vmatpush3.bf16.msra.mxu1 %v717_v3  ;;  %722 = vmatprep.subr.bf16.mxu0 %v721_v7  ;;  %v671_v56 = vld [vmem:[%s281_s11] ss:$0 sm:$0xff] }
  0x16   : > { %726 = vmatprep.subr.bf16.mxu1 %v721_v7 }
  0x18   : > { %724 = vmatpush3.bf16.msra.mxu0 %v721_v7 }
  0x19   : > { %728 = vmatpush3.bf16.msra.mxu1 %v721_v7 }
  0x1b   : > { %706 = vmatmul.mubr.msk.f32.vlgmr.msra.gmra.mrb[0].mxu0 %vm306_vm0, %v288_v8 }
  0x1c   : > { %712 = vmatmul.mubr.msk.f32.vlgmr.msra.gmra.mrb[0].mxu1 %vm306_vm0, %v292_v9  ;;  %708 = vmatprep.mubr.msk.f32.mxu0 %vm306_vm0, %v289_v10 }
  0x1d   : > { %714 = vmatprep.mubr.msk.f32.mxu1 %vm306_vm0, %v293_v11 }
  0x1f   : > { %709 = vmatmul.mubr.msk.f32.gmra.mrb[2].mxu0 %vm306_vm0, %v290_v12 }
  0x20   : > { %715 = vmatmul.mubr.msk.f32.gmra.mrb[2].mxu1 %vm306_vm0, %v294_v13 }
  0xee   : > { %v707_v15 = vpop.f32.mrb[0].mxu0 }
  0xef   : > { %v713_v16 = vpop.f32.mrb[0].mxu1  ;;  %v403_v17 = vadd.f32 %v707_v15, %v661_v14  ;;  %v397_v19 = vpop.f32.mrb[1].mxu0 }
  0xf0   : > { %v423_v18 = vadd.f32 %v713_v16, %v661_v14  ;;  %v417_v20 = vpop.f32.mrb[1].mxu1  ;;  %v398_v21 = vadd.f32 %v661_v14, %v397_v19 }
  0xf1   : > { %v418_v22 = vadd.f32 %v661_v14, %v417_v20  ;;  %v437_v24 = vmax.f32 %v403_v17, 0.0 }
  0xf2   : > { %v441_v25 = vmax.f32 %v423_v18, 0.0  ;;  %v436_v26 = vmax.f32 %v398_v21, 0.0  ;;  %v710_v27 = vpop.f32.mrb[2].mxu0 }
  0xf3   : > { %v716_v28 = vpop.f32.mrb[2].mxu1  ;;  %v413_v29 = vadd.f32 %v710_v27, %v661_v14  ;;  %v407_v30 = vpop.f32.mrb[3].mxu0  ;;  %v452_v32 = vmul.f32 %v670_v23, %v437_v24  ;;  %v440_v35 = vmax.f32 %v418_v22, 0.0 }
  0xf4   : > { %v456_v31 = vmul.f32 %v670_v23, %v441_v25  ;;  %v433_v33 = vadd.f32 %v716_v28, %v661_v14  ;;  %v427_v34 = vpop.f32.mrb[3].mxu1  ;;  %v408_v36 = vadd.f32 %v661_v14, %v407_v30  ;;  %v451_v41 = vmul.f32 %v670_v23, %v436_v26 }
  0xf5   : > { %v428_v37 = vadd.f32 %v661_v14, %v427_v34  ;;  %v439_v38 = vmax.f32 %v413_v29, 0.0  ;;  %v463_v40 = vsel %vm459_vm1, %v452_v32, 0.0  ;;  %v455_v49 = vmul.f32 %v670_v23, %v440_v35 }
  0xf6   : > { %v475_v39 = vsel %vm459_vm1, %v456_v31, 0.0  ;;  %v438_v42 = vmax.f32 %v408_v36, 0.0  ;;  %464 = vadd.xlane.f32.xlu0 %v463_v40  ;;  %v443_v43 = vmax.f32 %v433_v33, 0.0  ;;  %v460_v47 = vsel %vm459_vm1, %v451_v41, 0.0 }
  0xf7   : > { %476 = vadd.xlane.f32.xlu1 %v475_v39  ;;  %v442_v44 = vmax.f32 %v428_v37, 0.0  ;;  %v454_v45 = vmul.f32 %v670_v23, %v439_v38  ;;  %v472_v53 = vsel %vm459_vm1, %v455_v49, 0.0 }
  0xf8   : > { %v453_v48 = vmul.f32 %v670_v23, %v438_v42  ;;  %v458_v50 = vmul.f32 %v670_v23, %v443_v43 }
  0xf9   : > { %v469_v46 = vsel %vm459_vm1, %v454_v45, 0.0  ;;  %v457_v51 = vmul.f32 %v670_v23, %v442_v44 }
  0xfa   : > { %461 = vadd.xlane.f32.xlu0 %v460_v47  ;;  %v466_v52 = vsel %vm459_vm1, %v453_v48, 0.0  ;;  %v481_v54 = vsel %vm459_vm1, %v458_v50, 0.0 }
  0xfb   : > { %470 = vadd.xlane.f32.xlu1 %v469_v46  ;;  %v478_v55 = vsel %vm459_vm1, %v457_v51, 0.0 }
  0xfe   : > { %473 = vadd.xlane.f32.xlu0 %v472_v53 }
  0xff   : > { %467 = vadd.xlane.f32.xlu1 %v466_v52 }
 0x102   : > { %479 = vadd.xlane.f32.xlu0 %v478_v55 }
 0x103   : > { %482 = vadd.xlane.f32.xlu1 %v481_v54 }
 0x183   : > { %v465_v58 = vpop.xlane.xlu0 %464 }
 0x184   : > { %v477_v57 = vpop.xlane.xlu1 %476  ;;  %v492_v60 = vadd.f32 %v671_v56, %v465_v58 }
 0x185   : > { %v496_v59 = vadd.f32 %v671_v56, %v477_v57 }
 0x186   : > { %v673_v62 = vmul.f32 -1.442695, %v492_v60 }
 0x187   : > { %v677_v61 = vmul.f32 -1.442695, %v496_v59  ;;  %v462_v0 = vpop.xlane.xlu0 %461 }
 0x188   : > { %v471_v63 = vpop.xlane.xlu1 %470  ;;  %v491_v2 = vadd.f32 %v671_v56, %v462_v0 }
 0x189   : > { %737 = vpow2.f32 %v677_v61  ;;  %v494_v1 = vadd.f32 %v671_v56, %v471_v63 }
 0x18a   : > { %739 = vpow2.f32 %v673_v62  ;;  %v672_v4 = vmul.f32 -1.442695, %v491_v2 }
 0x18b   : > { %v675_v3 = vmul.f32 -1.442695, %v494_v1  ;;  %v474_v6 = vpop.xlane.xlu0 %473 }
 0x18c   : > { %v468_v5 = vpop.xlane.xlu1 %467  ;;  %v495_v8 = vadd.f32 %v671_v56, %v474_v6 }
 0x18d   : > { %741 = vpow2.f32 %v675_v3  ;;  %v493_v7 = vadd.f32 %v671_v56, %v468_v5 }
 0x18e   : > { %743 = vpow2.f32 %v672_v4  ;;  %v676_v10 = vmul.f32 -1.442695, %v495_v8 }
 0x18f   : > { %v674_v9 = vmul.f32 -1.442695, %v493_v7  ;;  %v480_v12 = vpop.xlane.xlu0 %479 }
 0x190   : > { %v483_v11 = vpop.xlane.xlu1 %482  ;;  %v497_v14 = vadd.f32 %v671_v56, %v480_v12 }
 0x191   : > { %745 = vpow2.f32 %v674_v9  ;;  %v498_v13 = vadd.f32 %v671_v56, %v483_v11 }
 0x192   : > { %747 = vpow2.f32 %v676_v10  ;;  %v678_v19 = vmul.f32 -1.442695, %v497_v14 }
 0x193   : > { %v738_v15 = vpop.eup %737  ;;  %v679_v16 = vmul.f32 -1.442695, %v498_v13 }
 0x194   : > { %v740_v17 = vpop.eup %739  ;;  %v528_v18 = vadd.f32 1.0, %v738_v15 }
 0x195   : > { %v524_v20 = vadd.f32 1.0, %v740_v17  ;;  %749 = vpow2.f32 %v679_v16 }
 0x196   : > { %751 = vrcp.f32 %v528_v18 }
 0x197   : > { %v742_v21 = vpop.eup %741  ;;  %753 = vrcp.f32 %v524_v20 }
 0x198   : > { %v744_v22 = vpop.eup %743  ;;  %v526_v23 = vadd.f32 1.0, %v742_v21  ;;  %755 = vpow2.f32 %v678_v19 }
 0x199   : > { %v523_v24 = vadd.f32 1.0, %v744_v22 }
 0x19a   : > { %757 = vrcp.f32 %v526_v23 }
 0x19b   : > { %v746_v25 = vpop.eup %745  ;;  %759 = vrcp.f32 %v523_v24 }
 0x19c   : > { %v748_v26 = vpop.eup %747  ;;  %v525_v27 = vadd.f32 1.0, %v746_v25 }
 0x19d   : > { %v527_v28 = vadd.f32 1.0, %v748_v26 }
 0x19e   : > { %761 = vrcp.f32 %v525_v27 }
 0x19f   : > { %v750_v29 = vpop.eup %749  ;;  %763 = vrcp.f32 %v527_v28 }
 0x1a0   : > { %v752_v30 = vpop.eup %751  ;;  %v530_v31 = vadd.f32 1.0, %v750_v29 }
 0x1a1   : > { %v754_v32 = vpop.eup %753  ;;  %553 = vst.msk [vmem:[%s286_s14 + $0x28] sm:$0xff] %vm547_vm2, %v752_v30 }
 0x1a2   : > { %v756_v33 = vpop.eup %755  ;;  %549 = vst.msk [vmem:[%s286_s14 + $0x8] sm:$0xff] %vm547_vm2, %v754_v32  ;;  %765 = vrcp.f32 %v530_v31 }
 0x1a3   : > { %v529_v34 = vadd.f32 1.0, %v756_v33 }
 0x1a4   : > { %v758_v35 = vpop.eup %757 }
 0x1a5   : > { %v760_v36 = vpop.eup %759  ;;  %551 = vst.msk [vmem:[%s286_s14 + $0x18] sm:$0xff] %vm547_vm2, %v758_v35  ;;  %767 = vrcp.f32 %v529_v34 }
 0x1a6   : > { %548 = vst.msk [vmem:[%s286_s14] sm:$0xff] %vm547_vm2, %v760_v36 }
 0x1a8   : > { %v762_v37 = vpop.eup %761 }
 0x1a9   : > { %v764_v38 = vpop.eup %763  ;;  %550 = vst.msk [vmem:[%s286_s14 + $0x10] sm:$0xff] %vm547_vm2, %v762_v37 }
 0x1aa   : > { %552 = vst.msk [vmem:[%s286_s14 + $0x20] sm:$0xff] %vm547_vm2, %v764_v38 }
 0x1ac   : > { %v766_v39 = vpop.eup %765 }
 0x1ad   : > { %555 = vst.msk [vmem:[%s286_s14 + $0x38] sm:$0xff] %vm547_vm2, %v766_v39 }
 0x1af   : > { %v768_v40 = vpop.eup %767 }
 0x1b0   : > { %554 = vst.msk [vmem:[%s286_s14 + $0x30] sm:$0xff] %vm547_vm2, %v768_v40 }
 0x1b1 PF: > { %s15_s18 = sadd.s32 1, %s775_s18  }
 0x1b2   : > { %p12_p4 = scmp.ge.s32.totalorder %s15_s18, 5  }
 0x1b4   :  { %14 = sbr.rel (!%p12_p4) target bundleno = 1 (0x1), region = 82 }

// kernel: squeeze.85
= control target key start
LH: loop header
LB: loop body
LE: loop exit
PB: predicated region body
PF: predicated region fallthrough
CT: control target
= control target key end

     0   :  { %vm3_vm0 = vcmask 31744   ;;  %s29_s10 = smov 12   ;;  %s31_s17 = smov 8   ;;  %vm9_vm1 = vcmask 130144   ;;  %vm15_vm2 = vcmask 97344   ;;  %vm21_vm3 = vcmask 64544   ;;  %s66_s0 = inlined_call_operand.vmem [shape: f32[1,32,4], index: 0, kind: input, shape index: {}]   ;;  %s67_s1 = inlined_call_operand.vmem [shape: f32[8,16], index: 1, kind: output, shape index: {}]  }
   0x1   :  { %v23_v0 = vld [vmem:[%s66_s0 + $0x3] ss:$4 sm:$0xff]   ;;  %v25_v1 = vld [vmem:[%s66_s0 + $0x1] ss:$4 sm:$0xff]   ;;  %v2_v2 = vld [vmem:[%s66_s0] ss:$4 sm:$0xff]  }
   0x2   :  { %7 = vrot.lane.b32.xlu0 %v23_v0, %s29_s10  ;;  %v24_v3 = vld [vmem:[%s66_s0 + $0x2] ss:$4 sm:$0xff]   ;;  %s30_s0 = smov 4   ;;  %4 = vst.msk [vmem:[%s67_s1] sm:$0xff] %vm3_vm0, %v2_v2  }
   0x3   :  { %19 = vrot.lane.b32.xlu1 %v25_v1, %s30_s0 }
   0x6   :  { %13 = vrot.lane.b32.xlu0 %v24_v3, %s31_s17 }
  0x74   :  { %v8_v4 = vpop.permute.xlu0 %7  }
  0x75   :  { %10 = vst.msk [vmem:[%s67_s1] sm:$0xff] %vm9_vm1, %v8_v4   ;;  %v20_v5 = vpop.permute.xlu1 %19  }
  0x78   :  { %v14_v6 = vpop.permute.xlu0 %13  }
  0x79   :  { %16 = vst.msk [vmem:[%s67_s1] sm:$0xff] %vm15_vm2, %v14_v6  }
  0x7a   :  { %22 = vst.msk [vmem:[%s67_s1] sm:$0xff] %vm21_vm3, %v20_v5  }

// kernel: squeeze.86
= control target key start
LH: loop header
LB: loop body
LE: loop exit
PB: predicated region body
PF: predicated region fallthrough
CT: control target
= control target key end

     0   :  { %s34_s8 = smov 80   ;;  %vm7_vm0 = vcmask 130048   ;;  %s35_s11 = smov 96   ;;  %s61_s0 = inlined_call_operand.vmem [shape: f32[1,2,64], index: 0, kind: input, shape index: {}]   ;;  %s62_s1 = inlined_call_operand.vmem [shape: f32[8,16], index: 1, kind: output, shape index: {}]  }
   0x1   :  { %v4_v0 = vld [vmem:[%s61_s0] sm:$0x3]  ;;  %s33_s0 = smov 112  }
   0x2   :  { %5 = vst [vmem:[#allocation0] sm:$0x3] %v4_v0 }
   0x9   :  { %v9_v1 = vld [vmem:[#allocation0] sm:$0x3]  }
   0xa   :  { %v21_v2 = vld [vmem:[#allocation0] sm:$0x3]   ;;  %10 = vrot.lane.b32.xlu0 %v9_v1, %s33_s0 }
   0xb   :  { %22 = vrot.lane.b32.xlu1 %v21_v2, %s34_s8  ;;  %v6_v3 = vld [vmem:[#allocation0] sm:$0x3]  }
   0xc   :  { %v15_v4 = vld [vmem:[#allocation0] sm:$0x3]   ;;  %8 = vst.msk [vmem:[%s62_s1] ss:$4 sm:$0x3] %vm7_vm0, %v6_v3  }
   0xe   :  { %16 = vrot.lane.b32.xlu0 %v15_v4, %s35_s11 }
  0x7c   :  { %v11_v5 = vpop.permute.xlu0 %10  }
  0x7d   :  { %v23_v6 = vpop.permute.xlu1 %22   ;;  %27 = vst.msk [vmem:[%s62_s1 + $0x1] ss:$4 sm:$0x3] %vm7_vm0, %v11_v5  }
  0x7e   :  { %29 = vst.msk [vmem:[%s62_s1 + $0x3] ss:$4 sm:$0x3] %vm7_vm0, %v23_v6  }
  0x80   :  { %v17_v7 = vpop.permute.xlu0 %16  }
  0x81   :  { %28 = vst.msk [vmem:[%s62_s1 + $0x2] ss:$4 sm:$0x3] %vm7_vm0, %v17_v7  }

// kernel: _lastv2_core.12
= control target key start
LH: loop header
LB: loop body
LE: loop exit
PB: predicated region body
PF: predicated region fallthrough
CT: control target
= control target key end

     0   :  { %s476_s12 = smov 0   ;;  %s503_s0 = inlined_call_operand.vmem [shape: f32[2,32,16], index: 0, kind: input, shape index: {}]   ;;  %s504_s1 = inlined_call_operand.vmem [shape: f32[2,16,4], index: 1, kind: input, shape index: {}]   ;;  %s505_s2 = inlined_call_operand.vmem [shape: f32[2,1,4], index: 2, kind: input, shape index: {}]   ;;  %s506_s3 = inlined_call_operand.vmem [shape: f32[2,32,4], index: 3, kind: output, shape index: {}]  }
   0x1 LB: > { %s397_s13 = sadd.s32 4294967295, %s454_s12   ;;  %p401_p0 = scmp.ge.s32.totalorder %s454_s12, 1  ;;  %s454_s12 = sphi %s476_s12, %s13_s12  }
   0x2   : > { %p155_p1 = scmp.lt.s32.totalorder %s454_s12, 3 }
   0x4   : > { %p156_p2 = pnand %p401_p0, %p155_p1 }
   0x5   : > { %p187_p3 = scmp.lt.s32.totalorder (!%p156_p2), %s397_s13, 1  ;;  %vm218_vm0 = vcmask (!%p156_p2), 130048   ;;  %vm316_vm1 = vcmask (!%p156_p2), 31744  }
   0x6   : > { %159 = sbr.rel (%p156_p2) target bundleno = 239 (0xef), region = 32 }
   0xd   : > { %s508_s13 = smov (!%p187_p3, %s397_s13), 1 }
   0xe   : > { %s416_s14 = sshll.u32 %s508_s13, 4  ;;  %s415_s15 = sshll.u32 %s508_s13, 5 }
   0xf   : > { %s196_s18 = scalar_lea.vmem %s504_s1, %s416_s14  ;;  %s191_s21 = scalar_lea.vmem %s503_s0, %s415_s15 }
  0x10   : > { %v209_v0 = vld [vmem:[%s196_s18] sm:$0xff]  ;;  %v210_v1 = vld [vmem:[%s196_s18 + $0x8] sm:$0xff]  ;;  %v207_v4 = vld [vmem:[%s191_s21 + $0x10] sm:$0xff]  ;;  %s199_s24 = scalar_lea.vmem %s505_s2, %s508_s13  ;;  %s204_s27 = scalar_lea.vmem %s506_s3, %s415_s15 }
  0x11   : > { %v205_v2 = vld [vmem:[%s191_s21] sm:$0xff]  ;;  %v434_v3 = vpack.c.bf16 %v210_v1, %v209_v0  ;;  %431 = vmatprep.mubr.msk.f32.mxu1 %vm218_vm0, %v207_v4  ;;  %v206_v5 = vld [vmem:[%s191_s21 + $0x8] sm:$0xff]  ;;  %v208_v6 = vld [vmem:[%s191_s21 + $0x18] sm:$0xff] }
  0x12   : > { %428 = vmatprep.mubr.msk.f32.mxu0 %vm218_vm0, %v205_v2  ;;  %v408_v7 = vld [vmem:[%s199_s24] ss:$0 sm:$0xff] }
  0x13   : > { %435 = vmatprep.subr.bf16.mxu0 %v434_v3  ;;  %438 = vmatprep.subr.bf16.mxu1 %v434_v3 }
  0x14   : > { %437 = vmatpush3.bf16.msra.mxu0 %v434_v3  ;;  %439 = vmatpush3.bf16.msra.mxu1 %v434_v3 }
  0x17   : > { %429 = vmatmul.mubr.msk.f32.vlgmr.msra.gmra.mrb[0].mxu0 %vm218_vm0, %v206_v5  ;;  %432 = vmatmul.mubr.msk.f32.vlgmr.msra.gmra.mrb[0].mxu1 %vm218_vm0, %v208_v6 }
  0xea   : > { %v430_v8 = vpop.f32.mrb[0].mxu0  ;;  %v433_v9 = vpop.f32.mrb[0].mxu1 }
  0xeb   : > { %v303_v10 = vadd.f32 %v430_v8, %v408_v7  ;;  %v313_v11 = vadd.f32 %v433_v9, %v408_v7  ;;  %v297_v12 = vpop.f32.mrb[1].mxu0  ;;  %v307_v13 = vpop.f32.mrb[1].mxu1 }
  0xec   : > { %v298_v14 = vadd.f32 %v408_v7, %v297_v12  ;;  %v308_v15 = vadd.f32 %v408_v7, %v307_v13 }
  0xed   : > { %318 = vst.msk [vmem:[%s204_s27 + $0x8] sm:$0xff] %vm316_vm1, %v303_v10  ;;  %320 = vst.msk [vmem:[%s204_s27 + $0x18] sm:$0xff] %vm316_vm1, %v313_v11 }
  0xee   : > { %317 = vst.msk [vmem:[%s204_s27] sm:$0xff] %vm316_vm1, %v298_v14  ;;  %319 = vst.msk [vmem:[%s204_s27 + $0x10] sm:$0xff] %vm316_vm1, %v308_v15 }
  0xef PF: > { %s13_s12 = sadd.s32 1, %s454_s12  }
  0xf0   : > { %p10_p4 = scmp.ge.s32.totalorder %s13_s12, 4  }
  0xf2   :  { %12 = sbr.rel (!%p10_p4) target bundleno = 1 (0x1), region = 68 }

// kernel: reverse.5
= control target key start
LH: loop header
LB: loop body
LE: loop exit
PB: predicated region body
PF: predicated region fallthrough
CT: control target
= control target key end

     0   :  { %v2_v0 = vlaneseq  ;;  %s97_s0 = inlined_call_operand.vmem [shape: f32[8,15], index: 0, kind: input, shape index: {}]   ;;  %s98_s1 = inlined_call_operand.vmem [shape: f32[8,15], index: 1, kind: output, shape index: {}]  }
   0x1   :  { %v32_v2 = vld [vmem:[%s97_s0] sm:$0xff] }
   0x2   :  { %v3_v1 = vsub.s32 14, %v2_v0 }
   0x4   :  { %4 = vset.pattern.permute.xlu0 %v3_v1 }
   0x5   :  { %38 = vperm.xlu0 %4, %v32_v2  }
  0x84   :  { %v39_v3 = vpop.permute.xlu0 %38 }
  0x85   :  { %69 = vst [vmem:[%s98_s1] sm:$0xff] %v39_v3 }

// kernel: reverse.3
= control target key start
LH: loop header
LB: loop body
LE: loop exit
PB: predicated region body
PF: predicated region fallthrough
CT: control target
= control target key end

     0   :  { %v2_v0 = vlaneseq  ;;  %s160_s0 = inlined_call_operand.vmem [shape: f32[2,16,11], index: 0, kind: input, shape index: {}]   ;;  %s161_s1 = inlined_call_operand.vmem [shape: f32[2,16,11], index: 1, kind: output, shape index: {}]  }
   0x1   :  { %v42_v2 = vld [vmem:[%s160_s0 + $0x10] sm:$0xff]  ;;  %v38_v3 = vld [vmem:[%s160_s0] sm:$0xff]  ;;  %v44_v4 = vld [vmem:[%s160_s0 + $0x18] sm:$0xff] }
   0x2   :  { %v3_v1 = vsub.s32 10, %v2_v0  ;;  %v40_v5 = vld [vmem:[%s160_s0 + $0x8] sm:$0xff] }
   0x4   :  { %4 = vset.pattern.permute.xlu0 %v3_v1  ;;  %125 = vset.pattern.permute.xlu1 %v3_v1 }
   0x5   :  { %62 = vperm.xlu1 %125, %v42_v2   ;;  %50 = vperm.xlu0 %4, %v38_v3  }
   0x9   :  { %68 = vperm.xlu1 %125, %v44_v4   ;;  %56 = vperm.xlu0 %4, %v40_v5  }
  0x84   :  { %v63_v6 = vpop.permute.xlu1 %62  ;;  %v51_v7 = vpop.permute.xlu0 %50 }
  0x85   :  { %109 = vst [vmem:[%s161_s1 + $0x10] sm:$0xff] %v63_v6  ;;  %105 = vst [vmem:[%s161_s1] sm:$0xff] %v51_v7 }
  0x88   :  { %v69_v8 = vpop.permute.xlu1 %68  ;;  %v57_v9 = vpop.permute.xlu0 %56 }
  0x89   :  { %111 = vst [vmem:[%s161_s1 + $0x18] sm:$0xff] %v69_v8  ;;  %107 = vst [vmem:[%s161_s1 + $0x8] sm:$0xff] %v57_v9 }

// kernel: _lastv2_core.10
= control target key start
LH: loop header
LB: loop body
LE: loop exit
PB: predicated region body
PF: predicated region fallthrough
CT: control target
= control target key end

     0   :  { %vm25_vm0 = vcmask 130048   ;;  %vm107_vm1 = vcmask 31744   ;;  %s173_s1 = inlined_call_operand.vmem [shape: f32[1,16,4], index: 1, kind: input, shape index: {}]   ;;  %s174_s0 = inlined_call_operand.vmem [shape: f32[1,16,16], index: 0, kind: input, shape index: {}]   ;;  %s175_s2 = inlined_call_operand.vmem [shape: f32[1,1,4], index: 2, kind: input, shape index: {}]   ;;  %s176_s3 = inlined_call_operand.vmem [shape: f32[1,16,4], index: 3, kind: output, shape index: {}]  }
   0x1   :  { %v16_v0 = vld [vmem:[%s173_s1] sm:$0xff]  ;;  %v17_v1 = vld [vmem:[%s173_s1 + $0x8] sm:$0xff] }
   0x2   :  { %v14_v2 = vld [vmem:[%s174_s0] sm:$0xff]  ;;  %v128_v3 = vpack.c.bf16 %v17_v1, %v16_v0  ;;  %v15_v4 = vld [vmem:[%s174_s0 + $0x8] sm:$0xff] }
   0x3   :  { %125 = vmatprep.mubr.msk.f32.mxu0 %vm25_vm0, %v14_v2  ;;  %v114_v5 = vld [vmem:[%s175_s2] ss:$0 sm:$0xff] }
   0x4   :  { %129 = vmatprep.subr.bf16.mxu0 %v128_v3 }
   0x5   :  { %131 = vmatpush3.bf16.msra.mxu0 %v128_v3 }
   0x8   :  { %126 = vmatmul.mubr.msk.f32.vlgmr.msra.gmra.mrb[0].mxu0 %vm25_vm0, %v15_v4 }
  0xdb   :  { %v127_v6 = vpop.f32.mrb[0].mxu0 }
  0xdc   :  { %v104_v7 = vadd.f32 %v127_v6, %v114_v5  ;;  %v98_v8 = vpop.f32.mrb[1].mxu0 }
  0xdd   :  { %v99_v9 = vadd.f32 %v114_v5, %v98_v8 }
  0xde   :  { %109 = vst.msk [vmem:[%s176_s3 + $0x8] sm:$0xff] %vm107_vm1, %v104_v7 }
  0xdf   :  { %108 = vst.msk [vmem:[%s176_s3] sm:$0xff] %vm107_vm1, %v99_v9 }

// kernel: _lastv2_core.11
= control target key start
LH: loop header
LB: loop body
LE: loop exit
PB: predicated region body
PF: predicated region fallthrough
CT: control target
= control target key end

     0   :  { %10 = vsyncpa [#allocation3], 0  ;;  %s609_s18 = smov 0   ;;  %s677_s0 = inlined_call_operand.vmem [shape: f32[2,16,16], index: 0, kind: input, shape index: {}]   ;;  %s678_s1 = inlined_call_operand.vmem [shape: f32[8,16], index: 1, kind: input, shape index: {}]   ;;  %s679_s2 = inlined_call_operand.vmem [shape: f32[8,1], index: 2, kind: input, shape index: {}]   ;;  %s680_s3 = inlined_call_operand.vmem [shape: f32[16,4], index: 3, kind: input, shape index: {}]   ;;  %s681_s4 = inlined_call_operand.hbm [shape: f32[1,4], index: 4, kind: input, shape index: {}]   ;;  %s682_s5 = inlined_call_operand.vmem [shape: f32[2,8,4], index: 5, kind: output, shape index: {}]  }
   0x1 LB: > { %s615_s19 = sadd.s32 4294967295, %s572_s18   ;;  %p470_p0 = scmp.ge.s32.totalorder %s572_s18, 1  ;;  %s572_s18 = sphi %s609_s18, %s16_s18  }
   0x2   : > { %p157_p1 = scmp.lt.s32.totalorder %s572_s18, 3  ;;  %p683_p3 = scmp.eq.s32.totalorder %s615_s19, 0 }
   0x3   : > { %s574_s21 = smov [#allocation2]   ;;  %s534_s26 = scalar_lea.hbm %s681_s4, 16 }
   0x4   : > { %p619_p2 = pnand %p470_p0, %p157_p1  ;;  %s179_s22 = sshll.u32 %s574_s21, 4  ;;  %s180_s22 = int_to_ptr.vmem [resolvable:$true] %s179_s22 }
   0x5   : > { %p535_p6 = scmp.ne.s32.totalorder %s681_s4, %s534_s26  ;;  %p541_p10 = scmp.lt.u32.totalorder %s534_s26, %s681_s4 }
   0x6   : > { %s685_s20 = scalar_select %p619_p2, 1, 0 }
   0x7   : > { %p514_p4 = pneg %p619_p2 }
   0x9   : > { %p628_p5 = pnand %p683_p3, %p514_p4 }
   0xb   : > { %p536_p7 = pneg %p628_p5 }
   0xd   : > { %p537_p8 = pnand %p536_p7, %p535_p6 }
   0xf   : > { %p538_p9 = pneg %p537_p8 }
  0x11   : > { %p543_p11 = pnand %p541_p10, %p538_p9 }
  0x13   : > { %546 = shalt.err (!%p543_p11)
}
  0x14   : > { %s547_s6 = scalar_lea.vmem %s180_s22, 16  ;;  %s554_s7 = scalar_lea.vmem %s180_s22, 32 }
  0x15   : > { %p548_p12 = scmp.ne.s32.totalorder %s180_s22, %s547_s6  ;;  %p555_p1 = scmp.lt.s32.totalorder %s180_s22, %s180_s22 }
  0x16   : > { %p556_p4 = scmp.lt.s32.totalorder %s554_s7, %s547_s6 }
  0x17   : > { %p550_p13 = pnand %p548_p12, %p536_p7 }
  0x18   : > { %p557_p3 = por %p556_p4, %p555_p1 }
  0x19   : > { %p551_p0 = pneg %p550_p13 }
  0x1b   : > { %p558_p2 = pnand %p557_p3, %p551_p0 }
  0x1d   : > { %561 = shalt.err (!%p558_p2)
}
  0x1e   : > { %517 = dma.hbm_to_vmem [thread:$0]  (!%p628_p5), %s681_s4, 16, %s180_s22, [#allocation3]  }
  0x1f   : > { %p687_p6 = scmp.ne.s32.totalorder %s685_s20, 0 }
  0x20   : > { %p688_p8 = scmp.eq.s32.totalorder (!%p687_p6), %s615_s19, 0 }
  0x21   : > { %200 = sbr.rel (%p687_p6) target bundleno = 481 (0x1e1), region = 40 }
  0x28   : > { %567 = dma.done.wait (%p688_p8), [#allocation3], 16   ;;  %p689_p7 = pmov %p688_p8 }
  0x29   : > { %p227_p9 = scmp.lt.s32.totalorder %s615_s19, 1  ;;  %v575_v0 = vmov 0.0|0.0   ;;  %vm576_vm0 = vmmov 0   ;;  %v577_v1 = vmov 0.0   ;;  %v578_v2 = vmov 0   ;;  %v239_v6 = vld [vmem:[%s679_s2] sm:$0xff] }
  0x2a   : > { %569 = vsyncadd (%p689_p7), [#allocation3], 4294967280  ;;  %504 = vmatprep.subr.bf16.mxu0 %v575_v0  ;;  %494 = vmatprep.mubr.msk.f32.mxu0 %vm576_vm0, %v577_v1  ;;  %v319_v7 = vld [vmem:[%s680_s3] sm:$0xff]  ;;  %v320_v8 = vld [vmem:[%s680_s3 + $0x8] sm:$0xff]  ;;  %vm245_vm1 = vcmask 130048   ;;  %vm401_vm2 = vcmask 31744  }
  0x2b   : > { %s691_s19 = smov (!%p227_p9, %s615_s19), 1  ;;  %533 = vset.pattern.permute.xlu0 %v578_v2  ;;  %507 = vmatprep.subr.bf16.mxu1 %v575_v0  ;;  %v508_v9 = vpack.c.bf16 %v320_v8, %v319_v7  ;;  %v236_v10 = vld [vmem:[%s678_s1] sm:$0xff] }
  0x2c   : > { %501 = vmatprep.mubr.msk.f32.mxu1 %vm576_vm0, %v577_v1  ;;  %s483_s10 = sshll.u32 %s691_s19, 4  ;;  %242 = vperm.xlu0 %533, %v239_v6   ;;  %s477_s24 = sshll.u32 %s691_s19, 3  ;;  %v479_v15 = vld [vmem:[#allocation2] ss:$0 sm:$0xff] }
  0x2d   : > { %s231_s13 = scalar_lea.vmem %s677_s0, %s483_s10  ;;  %509 = vmatpush3.bf16.msra.mxu1 %v508_v9  ;;  %s235_s27 = scalar_lea.vmem %s682_s5, %s477_s24 }
  0x2e   : > { %v237_v3 = vld [vmem:[%s231_s13] sm:$0xff]  ;;  %v238_v4 = vld [vmem:[%s231_s13 + $0x8] sm:$0xff] }
  0x2f   : > { %v505_v5 = vpack.c.bf16 %v238_v4, %v237_v3 }
  0x31   : > { %506 = vmatpush3.bf16.msra.mxu0 %v505_v5 }
  0x34   : > { %495 = vmatmul.mubr.msk.f32.vlgmr.msra.gmra.mrb[0].mxu0 %vm245_vm1, %v236_v10 }
  0xab   : > { %v243_v11 = vpop.permute.xlu0 %242 }
 0x107   : > { %v315_v12 = vpop.f32.mrb[0].mxu0 }
 0x108   : > { %v316_v13 = vadd.f32 %v315_v12, %v243_v11  ;;  %v496_v14 = vpop.f32.mrb[1].mxu0 }
 0x10a   : > { %502 = vmatmul.mubr.msk.f32.vlgmr.msra.gmra.mrb[0].mxu1 %vm245_vm1, %v316_v13 }
 0x1dd   : > { %v397_v16 = vpop.f32.mrb[0].mxu1 }
 0x1de   : > { %v398_v17 = vadd.f32 %v479_v15, %v397_v16  ;;  %v503_v18 = vpop.f32.mrb[1].mxu1 }
 0x1e0   : > { %402 = vst.msk [vmem:[%s235_s27] sm:$0xff] %vm401_vm2, %v398_v17 }
 0x1e1 PF: > { %s16_s18 = sadd.s32 1, %s572_s18  }
 0x1e2   : > { %p13_p2 = scmp.ge.s32.totalorder %s16_s18, 4  }
 0x1e4   :  { %15 = sbr.rel (!%p13_p2) target bundleno = 1 (0x1), region = 75 }
 0x1eb   :  { %422 = vsyncpa [#allocation3], 1 }
 0x1ec   :  { %424 = vsyncpa [#allocation3 + $0x1], 1 }

</bundles_post_ra>
